<compile_context>
chip_gen: v7x
topology: tpu7x:2x2x1
jax: 0.10.0
libtpu: 0.0.40
codegen_flags: <defaults>
</compile_context>

<pallas_src>
import functools

import jax
import jax.numpy as jnp
from jax.experimental import pallas as pl
from jax.experimental.pallas import tpu as pltpu

LANE = 128    # lane width / alignment target for feature dims
TM_MAX = 256  # max batch tile (rows per grid step); fills the 256-wide MXU


def _round_up(x, m):
    return (x + m - 1) // m * m


def _choose_tiling(batch):
    """Pick (tile_m, padded_batch). Small batches: one tile padded only to a
    multiple of 8 sublanes. Large batches: TM_MAX tiles (<= TM_MAX-8 wasted rows)."""
    b8 = _round_up(batch, 8)
    if b8 <= TM_MAX:
        return b8, b8
    return TM_MAX, _round_up(b8, TM_MAX)


def mlp_kernel(x_ref, w1_ref, b1_ref, w2_ref, b2_ref, w3_ref, b3_ref,
               w4_ref, b4_ref, o_ref):
    # x / weights are bf16 (MXU operands); biases and output are f32.
    # All accumulation happens in f32.
    # Layer 1: Linear + ReLU   (Dropout(p=0.2) -> identity in eval)
    h = jnp.dot(x_ref[...], w1_ref[...], preferred_element_type=jnp.float32)
    h = jnp.maximum(h + b1_ref[...], 0.0)
    # Hidden layer 1: Linear + ReLU   (Dropout(p=0.5) -> identity in eval)
    h = jnp.dot(h.astype(jnp.bfloat16), w2_ref[...],
                preferred_element_type=jnp.float32)
    h = jnp.maximum(h + b2_ref[...], 0.0)
    # Hidden layer 2: Linear + ReLU   (Dropout(p=0.5) -> identity in eval)
    h = jnp.dot(h.astype(jnp.bfloat16), w3_ref[...],
                preferred_element_type=jnp.float32)
    h = jnp.maximum(h + b3_ref[...], 0.0)
    # Output layer: Linear (no activation). Result + bias are already f32.
    o_ref[...] = jnp.dot(h.astype(jnp.bfloat16), w4_ref[...],
                         preferred_element_type=jnp.float32) + b4_ref[...]


def prepare_params(params):
    """One-time (model-load) padding + bf16 cast of all layer parameters.

    Zero-pads every feature dim to a multiple of LANE. Zero padding is exact:
    padded weight rows/cols and bias cols are zero, so padded hidden lanes are
    relu(0) = 0 and contribute nothing downstream. Weights become bf16 (MXU
    operands); biases stay f32 (added to the f32 accumulator).
    Done OUTSIDE the jitted per-call forward so repeated inference calls pay
    zero weight-prep HBM traffic.
    """
    flat = []
    for w, b in params:
        d_in, d_out = w.shape
        pi, po = _round_up(d_in, LANE), _round_up(d_out, LANE)
        w_p = jnp.zeros((pi, po), jnp.bfloat16).at[:d_in, :d_out].set(
            w.astype(jnp.bfloat16))
        b_p = jnp.zeros((1, po), jnp.float32).at[:, :d_out].set(
            b.astype(jnp.float32))
        flat.append(w_p)
        flat.append(b_p)
    return tuple(flat)


@functools.partial(jax.jit, static_argnames=("out_dim",))
def mlp_forward(x, flat, *, out_dim):
    """x: (B, in_dim) f32.  flat: output of prepare_params (padded bf16/f32)."""
    batch, in_dim = x.shape
    k_pad = flat[0].shape[0]    # padded input-feature dim (matches w1 rows)
    n_pad = flat[-1].shape[1]   # padded output-feature dim (matches b4 cols)

    tm, b_pad = _choose_tiling(batch)

    # Pad the batch directly in bf16 (no f32 intermediate slab).
    x_p = jnp.zeros((b_pad, k_pad), jnp.bfloat16)
    x_p = x_p.at[:batch, :in_dim].set(x.astype(jnp.bfloat16))

    grid = (b_pad // tm,)

    # x / out are tiled over the batch; weights & biases keep block index
    # (0, 0) for every grid step -> DMA'd once, VMEM-resident thereafter.
    in_specs = [pl.BlockSpec((tm, k_pad), lambda i: (i, 0))]
    for p in flat:
        in_specs.append(pl.BlockSpec(p.shape, lambda i: (0, 0)))
    out_specs = pl.BlockSpec((tm, n_pad), lambda i: (i, 0))

    out_padded = pl.pallas_call(
        mlp_kernel,
        out_shape=jax.ShapeDtypeStruct((b_pad, n_pad), jnp.float32),
        grid=grid,
        in_specs=in_specs,
        out_specs=out_specs,
        compiler_params=pltpu.CompilerParams(
            dimension_semantics=("parallel",),   # v7x: batch tiles split across TCs
            vmem_limit_bytes=32 * 1024 * 1024,   # headroom on v5e's 16 MiB default
        ),
    )(x_p, *flat)

    return out_padded[:batch, :out_dim]


def init_linear(key, fan_in, fan_out):
    """Deterministic PyTorch-style (kaiming-uniform-ish) init; weight stored [in, out]."""
    kw, kb = jax.random.split(key)
    bound = 1.0 / jnp.sqrt(fan_in)
    w = jax.random.uniform(kw, (fan_in, fan_out), jnp.float32, -bound, bound)
    b = jax.random.uniform(kb, (1, fan_out), jnp.float32, -bound, bound)
    return w, b


def reference_forward(x, params):
    h = x
    for i, (w, b) in enumerate(params):
        h = h @ w + b
        if i < len(params) - 1:
            h = jnp.maximum(h, 0.0)
    return h


if __name__ == "__main__":
    # Module defaults: hidden_size=400, hidden_layer_num=2; MNIST-style
    # input_size=784, output_size=10 (the repo's use case). B=512 exercises
    # two TM=256 batch tiles on the "parallel" grid axis.
    B = 512
    input_size = 784
    hidden_size = 400
    output_size = 10
    hidden_layer_num = 2

    key = jax.random.PRNGKey(0)
    keys = jax.random.split(key, 2 + hidden_layer_num + 2)

    x = jax.random.normal(keys[0], (B, input_size), jnp.float32)

    params = []
    params.append(init_linear(keys[1], input_size, hidden_size))
    for i in range(hidden_layer_num):
        params.append(init_linear(keys[2 + i], hidden_size, hidden_size))
    params.append(init_linear(keys[2 + hidden_layer_num], hidden_size, output_size))

    # One-time weight prep (pad + bf16 cast) -- NOT inside the per-call jit.
    flat = prepare_params(params)
    flat = jax.block_until_ready(flat)

    out = mlp_forward(x, flat, out_dim=output_size)
    out = jax.block_until_ready(out)

    ref = reference_forward(x, params)  # f32 reference
    assert out.shape == (B, output_size)
    # bf16 matmul operands with f32 accumulation: loosen tolerance vs the f32
    # reference (~1e-2 relative error accumulated through four layers).
    assert jnp.allclose(out, ref, atol=5e-2, rtol=5e-2), "mismatch vs reference"

    print("KERNEL_OK")
</pallas_src>

<mosaic_0001>
module attributes {stable_mosaic.version = 11 : i64} {
  func.func @mlp_kernel(%arg0: i32, %arg1: memref<256x896xbf16, #tpu.memory_space<vmem>>, %arg2: memref<896x512xbf16, #tpu.memory_space<vmem>>, %arg3: memref<1x512xf32, #tpu.memory_space<vmem>>, %arg4: memref<512x512xbf16, #tpu.memory_space<vmem>>, %arg5: memref<1x512xf32, #tpu.memory_space<vmem>>, %arg6: memref<512x512xbf16, #tpu.memory_space<vmem>>, %arg7: memref<1x512xf32, #tpu.memory_space<vmem>>, %arg8: memref<512x128xbf16, #tpu.memory_space<vmem>>, %arg9: memref<1x128xf32, #tpu.memory_space<vmem>>, %arg10: memref<256x128xf32, #tpu.memory_space<vmem>>) attributes {dimension_semantics = [#tpu.dimension_semantics<parallel>], iteration_bounds = array<i64: 2>, scalar_prefetch = 0 : i64, scratch_operands = 0 : i64, tpu.core_type = #tpu.core_type<tc>, window_params = [{transform_indices = @transform_0, window_bounds = array<i64: 256, 896>}, {pipeline_mode = #tpu.pipeline_mode<synchronous>, transform_indices = @transform_1, window_bounds = array<i64: 896, 512>}, {pipeline_mode = #tpu.pipeline_mode<synchronous>, transform_indices = @transform_2, window_bounds = array<i64: 1, 512>}, {pipeline_mode = #tpu.pipeline_mode<synchronous>, transform_indices = @transform_3, window_bounds = array<i64: 512, 512>}, {pipeline_mode = #tpu.pipeline_mode<synchronous>, transform_indices = @transform_4, window_bounds = array<i64: 1, 512>}, {pipeline_mode = #tpu.pipeline_mode<synchronous>, transform_indices = @transform_5, window_bounds = array<i64: 512, 512>}, {pipeline_mode = #tpu.pipeline_mode<synchronous>, transform_indices = @transform_6, window_bounds = array<i64: 1, 512>}, {pipeline_mode = #tpu.pipeline_mode<synchronous>, transform_indices = @transform_7, window_bounds = array<i64: 512, 128>}, {pipeline_mode = #tpu.pipeline_mode<synchronous>, transform_indices = @transform_8, window_bounds = array<i64: 1, 128>}, {transform_indices = @transform_9, window_bounds = array<i64: 256, 128>}]} {
    %c0 = arith.constant 0 : index
    %c0_0 = arith.constant 0 : index
    %0 = vector.load %arg1[%c0, %c0_0] : memref<256x896xbf16, #tpu.memory_space<vmem>>, vector<256x896xbf16>
    %c0_1 = arith.constant 0 : index
    %c0_2 = arith.constant 0 : index
    %1 = vector.load %arg2[%c0_1, %c0_2] : memref<896x512xbf16, #tpu.memory_space<vmem>>, vector<896x512xbf16>
    %cst = arith.constant dense<0.000000e+00> : vector<256x512xf32>
    %2 = tpu.matmul %0, %1, %cst {dimension_numbers = #tpu.dot_dimension_numbers<[1], [0], [0], [1], [0, 0, 1, 1], [], []>} : vector<256x896xbf16>, vector<896x512xbf16>, vector<256x512xf32> -> vector<256x512xf32>
    %c0_3 = arith.constant 0 : index
    %c0_4 = arith.constant 0 : index
    %3 = vector.load %arg3[%c0_3, %c0_4] : memref<1x512xf32, #tpu.memory_space<vmem>>, vector<1x512xf32>
    %4 = vector.broadcast %3 : vector<1x512xf32> to vector<256x512xf32>
    %5 = arith.addf %2, %4 : vector<256x512xf32>
    %cst_5 = arith.constant 0.000000e+00 : f32
    %6 = vector.broadcast %cst_5 : f32 to vector<256x512xf32>
    %7 = arith.maximumf %5, %6 : vector<256x512xf32>
    %8 = arith.truncf %7 : vector<256x512xf32> to vector<256x512xbf16>
    %c0_6 = arith.constant 0 : index
    %c0_7 = arith.constant 0 : index
    %9 = vector.load %arg4[%c0_6, %c0_7] : memref<512x512xbf16, #tpu.memory_space<vmem>>, vector<512x512xbf16>
    %cst_8 = arith.constant dense<0.000000e+00> : vector<256x512xf32>
    %10 = tpu.matmul %8, %9, %cst_8 {dimension_numbers = #tpu.dot_dimension_numbers<[1], [0], [0], [1], [0, 0, 1, 1], [], []>} : vector<256x512xbf16>, vector<512x512xbf16>, vector<256x512xf32> -> vector<256x512xf32>
    %c0_9 = arith.constant 0 : index
    %c0_10 = arith.constant 0 : index
    %11 = vector.load %arg5[%c0_9, %c0_10] : memref<1x512xf32, #tpu.memory_space<vmem>>, vector<1x512xf32>
    %12 = vector.broadcast %11 : vector<1x512xf32> to vector<256x512xf32>
    %13 = arith.addf %10, %12 : vector<256x512xf32>
    %cst_11 = arith.constant 0.000000e+00 : f32
    %14 = vector.broadcast %cst_11 : f32 to vector<256x512xf32>
    %15 = arith.maximumf %13, %14 : vector<256x512xf32>
    %16 = arith.truncf %15 : vector<256x512xf32> to vector<256x512xbf16>
    %c0_12 = arith.constant 0 : index
    %c0_13 = arith.constant 0 : index
    %17 = vector.load %arg6[%c0_12, %c0_13] : memref<512x512xbf16, #tpu.memory_space<vmem>>, vector<512x512xbf16>
    %cst_14 = arith.constant dense<0.000000e+00> : vector<256x512xf32>
    %18 = tpu.matmul %16, %17, %cst_14 {dimension_numbers = #tpu.dot_dimension_numbers<[1], [0], [0], [1], [0, 0, 1, 1], [], []>} : vector<256x512xbf16>, vector<512x512xbf16>, vector<256x512xf32> -> vector<256x512xf32>
    %c0_15 = arith.constant 0 : index
    %c0_16 = arith.constant 0 : index
    %19 = vector.load %arg7[%c0_15, %c0_16] : memref<1x512xf32, #tpu.memory_space<vmem>>, vector<1x512xf32>
    %20 = vector.broadcast %19 : vector<1x512xf32> to vector<256x512xf32>
    %21 = arith.addf %18, %20 : vector<256x512xf32>
    %cst_17 = arith.constant 0.000000e+00 : f32
    %22 = vector.broadcast %cst_17 : f32 to vector<256x512xf32>
    %23 = arith.maximumf %21, %22 : vector<256x512xf32>
    %24 = arith.truncf %23 : vector<256x512xf32> to vector<256x512xbf16>
    %c0_18 = arith.constant 0 : index
    %c0_19 = arith.constant 0 : index
    %25 = vector.load %arg8[%c0_18, %c0_19] : memref<512x128xbf16, #tpu.memory_space<vmem>>, vector<512x128xbf16>
    %cst_20 = arith.constant dense<0.000000e+00> : vector<256x128xf32>
    %26 = tpu.matmul %24, %25, %cst_20 {dimension_numbers = #tpu.dot_dimension_numbers<[1], [0], [0], [1], [0, 0, 1, 1], [], []>} : vector<256x512xbf16>, vector<512x128xbf16>, vector<256x128xf32> -> vector<256x128xf32>
    %c0_21 = arith.constant 0 : index
    %c0_22 = arith.constant 0 : index
    %27 = vector.load %arg9[%c0_21, %c0_22] : memref<1x128xf32, #tpu.memory_space<vmem>>, vector<1x128xf32>
    %28 = vector.broadcast %27 : vector<1x128xf32> to vector<256x128xf32>
    %29 = arith.addf %26, %28 : vector<256x128xf32>
    %c0_23 = arith.constant 0 : index
    %c0_24 = arith.constant 0 : index
    %30 = vector.load %arg10[%c0_23, %c0_24] : memref<256x128xf32, #tpu.memory_space<vmem>>, vector<256x128xf32>
    tpu.vector_store %arg10[%c0_23, %c0_24], %29 {strides = array<i32>} : memref<256x128xf32, #tpu.memory_space<vmem>>, vector<256x128xf32>,
    return
  }
  func.func @transform_0(%arg0: i32) -> (i32, i32) {
    %c0_i32 = arith.constant 0 : i32
    %c0_i32_0 = arith.constant 0 : i32
    return %arg0, %c0_i32 : i32, i32
  }
  func.func @transform_1(%arg0: i32) -> (i32, i32) {
    %c0_i32 = arith.constant 0 : i32
    %c0_i32_0 = arith.constant 0 : i32
    %c0_i32_1 = arith.constant 0 : i32
    return %c0_i32, %c0_i32_0 : i32, i32
  }
  func.func @transform_2(%arg0: i32) -> (i32, i32) {
    %c0_i32 = arith.constant 0 : i32
    %c0_i32_0 = arith.constant 0 : i32
    %c0_i32_1 = arith.constant 0 : i32
    return %c0_i32, %c0_i32_0 : i32, i32
  }
  func.func @transform_3(%arg0: i32) -> (i32, i32) {
    %c0_i32 = arith.constant 0 : i32
    %c0_i32_0 = arith.constant 0 : i32
    %c0_i32_1 = arith.constant 0 : i32
    return %c0_i32, %c0_i32_0 : i32, i32
  }
  func.func @transform_4(%arg0: i32) -> (i32, i32) {
    %c0_i32 = arith.constant 0 : i32
    %c0_i32_0 = arith.constant 0 : i32
    %c0_i32_1 = arith.constant 0 : i32
    return %c0_i32, %c0_i32_0 : i32, i32
  }
  func.func @transform_5(%arg0: i32) -> (i32, i32) {
    %c0_i32 = arith.constant 0 : i32
    %c0_i32_0 = arith.constant 0 : i32
    %c0_i32_1 = arith.constant 0 : i32
    return %c0_i32, %c0_i32_0 : i32, i32
  }
  func.func @transform_6(%arg0: i32) -> (i32, i32) {
    %c0_i32 = arith.constant 0 : i32
    %c0_i32_0 = arith.constant 0 : i32
    %c0_i32_1 = arith.constant 0 : i32
    return %c0_i32, %c0_i32_0 : i32, i32
  }
  func.func @transform_7(%arg0: i32) -> (i32, i32) {
    %c0_i32 = arith.constant 0 : i32
    %c0_i32_0 = arith.constant 0 : i32
    %c0_i32_1 = arith.constant 0 : i32
    return %c0_i32, %c0_i32_0 : i32, i32
  }
  func.func @transform_8(%arg0: i32) -> (i32, i32) {
    %c0_i32 = arith.constant 0 : i32
    %c0_i32_0 = arith.constant 0 : i32
    %c0_i32_1 = arith.constant 0 : i32
    return %c0_i32, %c0_i32_0 : i32, i32
  }
  func.func @transform_9(%arg0: i32) -> (i32, i32) {
    %c0_i32 = arith.constant 0 : i32
    %c0_i32_0 = arith.constant 0 : i32
    return %arg0, %c0_i32 : i32, i32
  }
}

</mosaic_0001>

<bundles_post_ra>
// kernel: mlp_forward.1
= control target key start
LH: loop header
LB: loop body
LE: loop exit
PB: predicated region body
PF: predicated region fallthrough
CT: control target
= control target key end

     0   :  { %s11192_s30 = smov 0   ;;  %s13661_s0 = inlined_call_operand.vmem [shape: bf16[512,896], index: 0, kind: input, shape index: {}]   ;;  %s13662_s1 = inlined_call_operand.vmem [shape: bf16[896,512], index: 1, kind: input, shape index: {}]   ;;  %s13663_s2 = inlined_call_operand.vmem [shape: f32[1,512], index: 2, kind: input, shape index: {}]   ;;  %s13664_s3 = inlined_call_operand.vmem [shape: bf16[512,512], index: 3, kind: input, shape index: {}]   ;;  %s13665_s4 = inlined_call_operand.vmem [shape: f32[1,512], index: 4, kind: input, shape index: {}]   ;;  %s13666_s5 = inlined_call_operand.vmem [shape: bf16[512,512], index: 5, kind: input, shape index: {}]   ;;  %s13667_s6 = inlined_call_operand.vmem [shape: f32[1,512], index: 6, kind: input, shape index: {}]   ;;  %s13668_s7 = inlined_call_operand.vmem [shape: bf16[512,128], index: 7, kind: input, shape index: {}]   ;;  %s13669_s8 = inlined_call_operand.vmem [shape: f32[1,128], index: 8, kind: input, shape index: {}]   ;;  %s13670_s9 = inlined_call_operand.vmem [shape: f32[512,128], index: 9, kind: output, shape index: {}]  }
   0x1 LB: > { %s8327_s10 = sadd.s32 4294967295, %s11139_s30   ;;  %p8331_p0 = scmp.ge.s32.totalorder %s11139_s30, 1  ;;  %s11139_s30 = sphi %s11192_s30, %s19_s30  }
   0x2   : > { %p289_p1 = scmp.lt.s32.totalorder %s11139_s30, 3 }
   0x4   : > { %p290_p2 = pnand %p8331_p0, %p289_p1 }
   0x5   : > { %v10221_v0 = vld [vmem:[%s13662_s1 + $0x4] ss:$16 sps:$4 sm:$0xff] (!%p290_p2)   ;;  %v10223_v1 = vld [vmem:[%s13662_s1 + $0xc] ss:$16 sps:$4 sm:$0xff] (!%p290_p2)   ;;  %v10225_v2 = vld [vmem:[%s13662_s1] ss:$16 sps:$4 sm:$0xff] (!%p290_p2)  }
   0x6   : > { %293 = sbr.rel (%p290_p2) target bundleno = 1718 (0x6b6), region = 56  ;;  %2410 = vmatprep.subr.bf16.mxu0 (!%p290_p2), %v10221_v0  ;;  %v10226_v3 = vld [vmem:[%s13662_s1 + $0x8] ss:$16 sps:$4 sm:$0xff] (!%p290_p2)   ;;  %3182 = vmatprep.subr.bf16.mxu1 (!%p290_p2), %v10223_v1  ;;  %v10227_v4 = vld [vmem:[%s13662_s1 + $0x24] ss:$16 sps:$4 sm:$0xff] (!%p290_p2)   ;;  %s8332_s14 = sshll.u32 (!%p290_p2), %s8327_s10, 5 }
   0x7   : > { %2411 = vmatpush1.bf16.msra.mxu0 (!%p290_p2), %v10225_v2  ;;  %3183 = vmatpush1.bf16.msra.mxu1 (!%p290_p2), %v10226_v3  ;;  %v10229_v5 = vld [vmem:[%s13662_s1 + $0x2c] ss:$16 sps:$4 sm:$0xff] (!%p290_p2)   ;;  %v10231_v6 = vld [vmem:[%s13662_s1 + $0x20] ss:$16 sps:$4 sm:$0xff] (!%p290_p2)   ;;  %v10232_v7 = vld [vmem:[%s13662_s1 + $0x28] ss:$16 sps:$4 sm:$0xff] (!%p290_p2)  }
   0x8   : > { %2412 = vmatprep.subr.bf16.mxu0 (!%p290_p2), %v10227_v4  ;;  %3184 = vmatprep.subr.bf16.mxu1 (!%p290_p2), %v10229_v5  ;;  %v10233_v8 = vld [vmem:[%s13662_s1 + $0x44] ss:$16 sps:$4 sm:$0xff] (!%p290_p2)   ;;  %v10235_v9 = vld [vmem:[%s13662_s1 + $0x4c] ss:$16 sps:$4 sm:$0xff] (!%p290_p2)   ;;  %v10237_v10 = vld [vmem:[%s13662_s1 + $0x40] ss:$16 sps:$4 sm:$0xff] (!%p290_p2)  }
   0x9   : > { %v10238_v11 = vld [vmem:[%s13662_s1 + $0x48] ss:$16 sps:$4 sm:$0xff] (!%p290_p2)   ;;  %v10239_v12 = vld [vmem:[%s13662_s1 + $0x64] ss:$16 sps:$4 sm:$0xff] (!%p290_p2)   ;;  %v10241_v13 = vld [vmem:[%s13662_s1 + $0x6c] ss:$16 sps:$4 sm:$0xff] (!%p290_p2)  }
   0xa   : > { %v10243_v14 = vld [vmem:[%s13662_s1 + $0x60] ss:$16 sps:$4 sm:$0xff] (!%p290_p2)   ;;  %v10244_v15 = vld [vmem:[%s13662_s1 + $0x68] ss:$16 sps:$4 sm:$0xff] (!%p290_p2)   ;;  %v10245_v16 = vld [vmem:[%s13662_s1 + $0x84] ss:$16 sps:$4 sm:$0xff] (!%p290_p2)  }
   0xb   : > { %2413 = vmatpush1.bf16.msra.mxu0 (!%p290_p2), %v10231_v6  ;;  %3185 = vmatpush1.bf16.msra.mxu1 (!%p290_p2), %v10232_v7  ;;  %v10247_v17 = vld [vmem:[%s13662_s1 + $0x8c] ss:$16 sps:$4 sm:$0xff] (!%p290_p2)   ;;  %v10249_v18 = vld [vmem:[%s13662_s1 + $0x80] ss:$16 sps:$4 sm:$0xff] (!%p290_p2)   ;;  %v10250_v19 = vld [vmem:[%s13662_s1 + $0x88] ss:$16 sps:$4 sm:$0xff] (!%p290_p2)  }
   0xc   : > { %2414 = vmatprep.subr.bf16.mxu0 (!%p290_p2), %v10233_v8  ;;  %3186 = vmatprep.subr.bf16.mxu1 (!%p290_p2), %v10235_v9  ;;  %v10251_v20 = vld [vmem:[%s13662_s1 + $0xa4] ss:$16 sps:$4 sm:$0xff] (!%p290_p2)   ;;  %v10253_v21 = vld [vmem:[%s13662_s1 + $0xac] ss:$16 sps:$4 sm:$0xff] (!%p290_p2)   ;;  %v10255_v22 = vld [vmem:[%s13662_s1 + $0xa0] ss:$16 sps:$4 sm:$0xff] (!%p290_p2)  }
   0xd   : > { %v10256_v23 = vld [vmem:[%s13662_s1 + $0xa8] ss:$16 sps:$4 sm:$0xff]   ;;  %v10257_v24 = vld [vmem:[%s13662_s1 + $0xc4] ss:$16 sps:$4 sm:$0xff]   ;;  %v10259_v25 = vld [vmem:[%s13662_s1 + $0xcc] ss:$16 sps:$4 sm:$0xff]  }
   0xe   : > { %v10261_v26 = vld [vmem:[%s13662_s1 + $0xc0] ss:$16 sps:$4 sm:$0xff]   ;;  %v10262_v27 = vld [vmem:[%s13662_s1 + $0xc8] ss:$16 sps:$4 sm:$0xff]   ;;  %v10263_v28 = vld [vmem:[%s13662_s1 + $0xe4] ss:$16 sps:$4 sm:$0xff]  }
   0xf   : > { %2415 = vmatpush1.bf16.msra.mxu0 %v10237_v10  ;;  %3187 = vmatpush1.bf16.msra.mxu1 %v10238_v11  ;;  %v10265_v29 = vld [vmem:[%s13662_s1 + $0xec] ss:$16 sps:$4 sm:$0xff]   ;;  %v10267_v30 = vld [vmem:[%s13662_s1 + $0xe0] ss:$16 sps:$4 sm:$0xff]   ;;  %v10268_v31 = vld [vmem:[%s13662_s1 + $0xe8] ss:$16 sps:$4 sm:$0xff]  }
  0x10   : > { %2416 = vmatprep.subr.bf16.mxu0 %v10239_v12  ;;  %3188 = vmatprep.subr.bf16.mxu1 %v10241_v13  ;;  %v10269_v32 = vld [vmem:[%s13662_s1 + $0x104] ss:$16 sps:$4 sm:$0xff]   ;;  %p327_p3 = scmp.lt.s32.totalorder %s8332_s14, 63  ;;  %v10271_v33 = vld [vmem:[%s13662_s1 + $0x10c] ss:$16 sps:$4 sm:$0xff]  }
  0x11   : > { %v10273_v34 = vld [vmem:[%s13662_s1 + $0x100] ss:$16 sps:$4 sm:$0xff]   ;;  %v10274_v35 = vld [vmem:[%s13662_s1 + $0x108] ss:$16 sps:$4 sm:$0xff]   ;;  %v10275_v36 = vld [vmem:[%s13662_s1 + $0x124] ss:$16 sps:$4 sm:$0xff]  }
  0x12   : > { %s13672_s14 = smov (!%p327_p3, %s8332_s14), 63  ;;  %v10277_v37 = vld [vmem:[%s13662_s1 + $0x12c] ss:$16 sps:$4 sm:$0xff]   ;;  %v10279_v38 = vld [vmem:[%s13662_s1 + $0x120] ss:$16 sps:$4 sm:$0xff]  }
  0x13   : > { %2417 = vmatpush1.bf16.msra.mxu0 %v10243_v14  ;;  %3189 = vmatpush1.bf16.msra.mxu1 %v10244_v15  ;;  %v10280_v39 = vld [vmem:[%s13662_s1 + $0x128] ss:$16 sps:$4 sm:$0xff]   ;;  %v10281_v40 = vld [vmem:[%s13662_s1 + $0x144] ss:$16 sps:$4 sm:$0xff]   ;;  %s10211_s18 = smul.u32 28, %s13672_s14  ;;  %s8335_s29 = sshll.u32 %s13672_s14, 3 }
  0x14   : > { %2418 = vmatprep.subr.bf16.mxu0 %v10245_v16  ;;  %3190 = vmatprep.subr.bf16.mxu1 %v10247_v17  ;;  %v10283_v41 = vld [vmem:[%s13662_s1 + $0x14c] ss:$16 sps:$4 sm:$0xff]   ;;  %v10285_v42 = vld [vmem:[%s13662_s1 + $0x140] ss:$16 sps:$4 sm:$0xff]   ;;  %v10286_v43 = vld [vmem:[%s13662_s1 + $0x148] ss:$16 sps:$4 sm:$0xff]   ;;  %s13593_s13 = scalar_lea.vmem %s13670_s9, %s8335_s29 }
  0x15   : > { %v10287_v44 = vld [vmem:[%s13662_s1 + $0x164] ss:$16 sps:$4 sm:$0xff]   ;;  %s11343_s28 = scalar_lea.vmem %s13661_s0, %s10211_s18  ;;  %v10289_v45 = vld [vmem:[%s13662_s1 + $0x16c] ss:$16 sps:$4 sm:$0xff]   ;;  %v10291_v46 = vld [vmem:[%s13662_s1 + $0x160] ss:$16 sps:$4 sm:$0xff]  }
  0x16   : > { %v10292_v47 = vld [vmem:[%s13662_s1 + $0x168] ss:$16 sps:$4 sm:$0xff]   ;;  %v10319_v48 = vld [vmem:[%s11343_s28 + $0x4] ss:$28 sps:$4 sm:$0xff]   ;;  %v10295_v50 = vld [vmem:[%s13662_s1 + $0x18c] ss:$16 sps:$4 sm:$0xff]  }
  0x17   : > { %2419 = vmatpush1.bf16.msra.mxu0 %v10249_v18  ;;  %3191 = vmatpush1.bf16.msra.mxu1 %v10250_v19  ;;  %v10293_v49 = vld [vmem:[%s13662_s1 + $0x184] ss:$16 sps:$4 sm:$0xff]   ;;  %v10297_v51 = vld [vmem:[%s13662_s1 + $0x180] ss:$16 sps:$4 sm:$0xff]   ;;  %v10298_v52 = vld [vmem:[%s13662_s1 + $0x188] ss:$16 sps:$4 sm:$0xff]  }
  0x18   : > { %2420 = vmatprep.subr.bf16.mxu0 %v10251_v20  ;;  %3192 = vmatprep.subr.bf16.mxu1 %v10253_v21  ;;  %v10299_v53 = vld [vmem:[%s13662_s1 + $0x1a4] ss:$16 sps:$4 sm:$0xff]   ;;  %v10301_v54 = vld [vmem:[%s13662_s1 + $0x1ac] ss:$16 sps:$4 sm:$0xff]   ;;  %v10303_v55 = vld [vmem:[%s13662_s1 + $0x1a0] ss:$16 sps:$4 sm:$0xff]  }
  0x19   : > { %2442 = vmatprep.mubr.bf16.mxu0 %v10319_v48  ;;  %3214 = vmatprep.mubr.bf16.mxu1 %v10319_v48  ;;  %v10304_v56 = vld [vmem:[%s13662_s1 + $0x1a8] ss:$16 sps:$4 sm:$0xff]   ;;  %v10305_v57 = vld [vmem:[%s13662_s1 + $0x1c4] ss:$16 sps:$4 sm:$0xff]   ;;  %v10307_v58 = vld [vmem:[%s13662_s1 + $0x1cc] ss:$16 sps:$4 sm:$0xff]  }
  0x1a   : > { %v10309_v59 = vld [vmem:[%s13662_s1 + $0x1c0] ss:$16 sps:$4 sm:$0xff]   ;;  %v10310_v60 = vld [vmem:[%s13662_s1 + $0x1c8] ss:$16 sps:$4 sm:$0xff]   ;;  %v10311_v61 = vld [vmem:[%s13662_s1 + $0x1e4] ss:$16 sps:$4 sm:$0xff]  }
  0x1b   : > { %2421 = vmatpush1.bf16.msra.mxu0 %v10255_v22  ;;  %3193 = vmatpush1.bf16.msra.mxu1 %v10256_v23  ;;  %v10313_v62 = vld [vmem:[%s13662_s1 + $0x1ec] ss:$16 sps:$4 sm:$0xff]   ;;  %v10315_v63 = vld [vmem:[%s13662_s1 + $0x1e0] ss:$16 sps:$4 sm:$0xff]   ;;  %v10316_v0 = vld [vmem:[%s13662_s1 + $0x1e8] ss:$16 sps:$4 sm:$0xff]  }
  0x1c   : > { %2422 = vmatprep.subr.bf16.mxu0 %v10257_v24  ;;  %3194 = vmatprep.subr.bf16.mxu1 %v10259_v25  ;;  %v10322_v1 = vld [vmem:[%s13662_s1 + $0x204] ss:$16 sps:$4 sm:$0xff]   ;;  %v10317_v2 = vld [vmem:[%s11343_s28] ss:$28 sps:$4 sm:$0xff]   ;;  %v10371_v7 = vld [vmem:[%s13662_s1 + $0x208] ss:$16 sps:$4 sm:$0xff]  }
  0x1d   : > { %v10320_v3 = vld [vmem:[%s13662_s1 + $0x200] ss:$16 sps:$4 sm:$0xff]   ;;  %v10323_v4 = vld [vmem:[%s11343_s28 + $0x3c] ss:$28 sps:$4 sm:$0xff]   ;;  %v10328_v5 = vld [vmem:[%s13662_s1 + $0x224] ss:$16 sps:$4 sm:$0xff]  }
  0x1e   : > { %v10326_v6 = vld [vmem:[%s13662_s1 + $0x220] ss:$16 sps:$4 sm:$0xff]   ;;  %v10373_v8 = vld [vmem:[%s13662_s1 + $0x20c] ss:$16 sps:$4 sm:$0xff]   ;;  %v10334_v9 = vld [vmem:[%s13662_s1 + $0x244] ss:$16 sps:$4 sm:$0xff]  }
  0x1f   : > { %2423 = vmatpush1.bf16.msra.mxu0 %v10261_v26  ;;  %3195 = vmatpush1.bf16.msra.mxu1 %v10262_v27  ;;  %v10376_v10 = vld [vmem:[%s13662_s1 + $0x22c] ss:$16 sps:$4 sm:$0xff]   ;;  %v10325_v11 = vld [vmem:[%s11343_s28 + $0x38] ss:$28 sps:$4 sm:$0xff]   ;;  %v10332_v13 = vld [vmem:[%s13662_s1 + $0x240] ss:$16 sps:$4 sm:$0xff]  }
  0x20   : > { %2424 = vmatprep.subr.bf16.mxu0 %v10263_v28  ;;  %3196 = vmatprep.subr.bf16.mxu1 %v10265_v29  ;;  %v10329_v12 = vld [vmem:[%s11343_s28 + $0x74] ss:$28 sps:$4 sm:$0xff]   ;;  %v10374_v14 = vld [vmem:[%s13662_s1 + $0x228] ss:$16 sps:$4 sm:$0xff]   ;;  %v10385_v16 = vld [vmem:[%s13662_s1 + $0x24c] ss:$16 sps:$4 sm:$0xff]  }
  0x21   : > { %v10340_v15 = vld [vmem:[%s13662_s1 + $0x264] ss:$16 sps:$4 sm:$0xff]   ;;  %v10338_v17 = vld [vmem:[%s13662_s1 + $0x260] ss:$16 sps:$4 sm:$0xff]   ;;  %v10383_v18 = vld [vmem:[%s13662_s1 + $0x248] ss:$16 sps:$4 sm:$0xff]  }
  0x22   : > { %v10346_v19 = vld [vmem:[%s13662_s1 + $0x284] ss:$16 sps:$4 sm:$0xff]   ;;  %v10388_v20 = vld [vmem:[%s13662_s1 + $0x26c] ss:$16 sps:$4 sm:$0xff]   ;;  %v10344_v23 = vld [vmem:[%s13662_s1 + $0x280] ss:$16 sps:$4 sm:$0xff]  }
  0x23   : > { %2425 = vmatpush1.bf16.msra.mxu0 %v10267_v30  ;;  %3197 = vmatpush1.bf16.msra.mxu1 %v10268_v31  ;;  %v10331_v21 = vld [vmem:[%s11343_s28 + $0x70] ss:$28 sps:$4 sm:$0xff]   ;;  %v10386_v24 = vld [vmem:[%s13662_s1 + $0x268] ss:$16 sps:$4 sm:$0xff]   ;;  %v10352_v25 = vld [vmem:[%s13662_s1 + $0x2a4] ss:$16 sps:$4 sm:$0xff]  }
  0x24   : > { %2426 = vmatprep.subr.bf16.mxu0 %v10269_v32  ;;  %3198 = vmatprep.subr.bf16.mxu1 %v10271_v33  ;;  %v10335_v22 = vld [vmem:[%s11343_s28 + $0xac] ss:$28 sps:$4 sm:$0xff]   ;;  %v10350_v27 = vld [vmem:[%s13662_s1 + $0x2a0] ss:$16 sps:$4 sm:$0xff]   ;;  %v10358_v29 = vld [vmem:[%s13662_s1 + $0x2c4] ss:$16 sps:$4 sm:$0xff]  }
  0x25   : > { %v10397_v26 = vld [vmem:[%s13662_s1 + $0x28c] ss:$16 sps:$4 sm:$0xff]   ;;  %v10395_v28 = vld [vmem:[%s13662_s1 + $0x288] ss:$16 sps:$4 sm:$0xff]   ;;  %v10341_v32 = vld [vmem:[%s11343_s28 + $0xe4] ss:$28 sps:$4 sm:$0xff]  }
  0x26   : > { %v10400_v30 = vld [vmem:[%s13662_s1 + $0x2ac] ss:$16 sps:$4 sm:$0xff]   ;;  %v10337_v31 = vld [vmem:[%s11343_s28 + $0xa8] ss:$28 sps:$4 sm:$0xff]   ;;  %v10356_v33 = vld [vmem:[%s13662_s1 + $0x2c0] ss:$16 sps:$4 sm:$0xff]  }
  0x27   : > { %2427 = vmatpush1.bf16.msra.mxu0 %v10273_v34  ;;  %3199 = vmatpush1.bf16.msra.mxu1 %v10274_v35  ;;  %v10398_v34 = vld [vmem:[%s13662_s1 + $0x2a8] ss:$16 sps:$4 sm:$0xff]   ;;  %v10364_v35 = vld [vmem:[%s13662_s1 + $0x2e4] ss:$16 sps:$4 sm:$0xff]  }
  0x28   : > { %2428 = vmatprep.subr.bf16.mxu0 %v10275_v36  ;;  %3200 = vmatprep.subr.bf16.mxu1 %v10277_v37  ;;  %v10409_v36 = vld [vmem:[%s13662_s1 + $0x2cc] ss:$16 sps:$4 sm:$0xff]   ;;  %v10362_v37 = vld [vmem:[%s13662_s1 + $0x2e0] ss:$16 sps:$4 sm:$0xff]   ;;  %v10419_v48 = vld [vmem:[%s13662_s1 + $0x308] ss:$16 sps:$4 sm:$0xff]  }
  0x2b   : > { %2429 = vmatpush1.bf16.msra.mxu0 %v10279_v38  ;;  %3201 = vmatpush1.bf16.msra.mxu1 %v10280_v39  ;;  %v10407_v38 = vld [vmem:[%s13662_s1 + $0x2c8] ss:$16 sps:$4 sm:$0xff]   ;;  %v10370_v39 = vld [vmem:[%s13662_s1 + $0x304] ss:$16 sps:$4 sm:$0xff]  }
  0x2c   : > { %2430 = vmatprep.subr.bf16.mxu0 %v10281_v40  ;;  %3202 = vmatprep.subr.bf16.mxu1 %v10283_v41  ;;  %v10412_v40 = vld [vmem:[%s13662_s1 + $0x2ec] ss:$16 sps:$4 sm:$0xff]  }
  0x2d   : > { %v10343_v41 = vld [vmem:[%s11343_s28 + $0xe0] ss:$28 sps:$4 sm:$0xff]  }
  0x2f   : > { %2431 = vmatpush1.bf16.msra.mxu0 %v10285_v42  ;;  %3203 = vmatpush1.bf16.msra.mxu1 %v10286_v43  ;;  %v10347_v42 = vld [vmem:[%s11343_s28 + $0x11c] ss:$28 sps:$4 sm:$0xff]   ;;  %v10368_v43 = vld [vmem:[%s13662_s1 + $0x300] ss:$16 sps:$4 sm:$0xff]  }
  0x30   : > { %2432 = vmatprep.subr.bf16.mxu0 %v10287_v44  ;;  %3204 = vmatprep.subr.bf16.mxu1 %v10289_v45  ;;  %v10410_v44 = vld [vmem:[%s13662_s1 + $0x2e8] ss:$16 sps:$4 sm:$0xff]   ;;  %v10382_v45 = vld [vmem:[%s13662_s1 + $0x324] ss:$16 sps:$4 sm:$0xff]  }
  0x33   : > { %2433 = vmatpush1.bf16.msra.mxu0 %v10291_v46  ;;  %3205 = vmatpush1.bf16.msra.mxu1 %v10292_v47  ;;  %v10421_v46 = vld [vmem:[%s13662_s1 + $0x30c] ss:$16 sps:$4 sm:$0xff]   ;;  %v10380_v47 = vld [vmem:[%s13662_s1 + $0x320] ss:$16 sps:$4 sm:$0xff]  }
  0x34   : > { %2434 = vmatprep.subr.bf16.mxu0 %v10293_v49  ;;  %3206 = vmatprep.subr.bf16.mxu1 %v10295_v50  ;;  %v10394_v49 = vld [vmem:[%s13662_s1 + $0x344] ss:$16 sps:$4 sm:$0xff]   ;;  %v10424_v50 = vld [vmem:[%s13662_s1 + $0x32c] ss:$16 sps:$4 sm:$0xff]  }
  0x37   : > { %2435 = vmatpush1.bf16.msra.mxu0 %v10297_v51  ;;  %3207 = vmatpush1.bf16.msra.mxu1 %v10298_v52  ;;  %v10349_v51 = vld [vmem:[%s11343_s28 + $0x118] ss:$28 sps:$4 sm:$0xff]  }
  0x38   : > { %2436 = vmatprep.subr.bf16.mxu0 %v10299_v53  ;;  %3208 = vmatprep.subr.bf16.mxu1 %v10301_v54  ;;  %v10353_v52 = vld [vmem:[%s11343_s28 + $0x154] ss:$28 sps:$4 sm:$0xff]   ;;  %v10422_v54 = vld [vmem:[%s13662_s1 + $0x328] ss:$16 sps:$4 sm:$0xff]  }
  0x39   : > { %v10392_v53 = vld [vmem:[%s13662_s1 + $0x340] ss:$16 sps:$4 sm:$0xff]  }
  0x3b   : > { %2437 = vmatpush1.bf16.msra.mxu0 %v10303_v55  ;;  %3209 = vmatpush1.bf16.msra.mxu1 %v10304_v56  ;;  %v10406_v55 = vld [vmem:[%s13662_s1 + $0x364] ss:$16 sps:$4 sm:$0xff]   ;;  %v10433_v56 = vld [vmem:[%s13662_s1 + $0x34c] ss:$16 sps:$4 sm:$0xff]  }
  0x3c   : > { %2438 = vmatprep.subr.bf16.mxu0 %v10305_v57  ;;  %3210 = vmatprep.subr.bf16.mxu1 %v10307_v58  ;;  %v10404_v57 = vld [vmem:[%s13662_s1 + $0x360] ss:$16 sps:$4 sm:$0xff]   ;;  %v10431_v58 = vld [vmem:[%s13662_s1 + $0x348] ss:$16 sps:$4 sm:$0xff]  }
  0x3f   : > { %2439 = vmatpush1.bf16.msra.mxu0 %v10309_v59  ;;  %3211 = vmatpush1.bf16.msra.mxu1 %v10310_v60  ;;  %v10418_v59 = vld [vmem:[%s13662_s1 + $0x384] ss:$16 sps:$4 sm:$0xff]   ;;  %v10436_v60 = vld [vmem:[%s13662_s1 + $0x36c] ss:$16 sps:$4 sm:$0xff]  }
  0x40   : > { %2440 = vmatprep.subr.bf16.mxu0 %v10311_v61  ;;  %3212 = vmatprep.subr.bf16.mxu1 %v10313_v62  ;;  %v10355_v61 = vld [vmem:[%s11343_s28 + $0x150] ss:$28 sps:$4 sm:$0xff]  }
  0x41   : > { %v10359_v62 = vld [vmem:[%s11343_s28 + $0x18c] ss:$28 sps:$4 sm:$0xff]  }
  0x43   : > { %2441 = vmatpush1.bf16.msra.mxu0 %v10315_v63  ;;  %3213 = vmatpush1.bf16.msra.mxu1 %v10316_v0  ;;  %v10416_v63 = vld [vmem:[%s13662_s1 + $0x380] ss:$16 sps:$4 sm:$0xff]   ;;  %v10434_v0 = vld [vmem:[%s13662_s1 + $0x368] ss:$16 sps:$4 sm:$0xff]  }
  0x44   : > { %2603 = vmatprep.subr.bf16.mxu0 %v10322_v1  ;;  %3375 = vmatprep.subr.bf16.mxu1 %v10373_v8  ;;  %v10430_v1 = vld [vmem:[%s13662_s1 + $0x3a4] ss:$16 sps:$4 sm:$0xff]  }
  0x45   : > { %v10365_v8 = vld [vmem:[%s11343_s28 + $0x1c4] ss:$28 sps:$4 sm:$0xff]  }
  0x46   : > { %2443 = vmatmul.mubr.bf16.vlgmr.msra.gmra.mrb[0].mxu0 %v10317_v2  ;;  %3215 = vmatmul.mubr.bf16.vlgmr.msra.gmra.mrb[0].mxu1 %v10317_v2  ;;  %v10445_v2 = vld [vmem:[%s13662_s1 + $0x38c] ss:$16 sps:$4 sm:$0xff]  }
  0x47   : > { %2604 = vmatpush1.bf16.msra.mxu0 %v10320_v3  ;;  %2452 = vmatprep.mubr.bf16.mxu0 %v10323_v4  ;;  %v10428_v3 = vld [vmem:[%s13662_s1 + $0x3a0] ss:$16 sps:$4 sm:$0xff]  }
  0x48   : > { %3224 = vmatprep.mubr.bf16.mxu1 %v10323_v4  ;;  %2605 = vmatprep.subr.bf16.mxu0 %v10328_v5  ;;  %v10443_v4 = vld [vmem:[%s13662_s1 + $0x388] ss:$16 sps:$4 sm:$0xff]   ;;  %v10442_v5 = vld [vmem:[%s13662_s1 + $0x3c4] ss:$16 sps:$4 sm:$0xff]  }
  0x49   : > { %3376 = vmatpush1.bf16.msra.mxu1 %v10371_v7  ;;  %v10361_v7 = vld [vmem:[%s11343_s28 + $0x188] ss:$28 sps:$4 sm:$0xff]  }
  0x4a   : > { %3377 = vmatprep.subr.bf16.mxu1 %v10376_v10  ;;  %v10446_v10 = vld [vmem:[%s13662_s1 + $0x3a8] ss:$16 sps:$4 sm:$0xff]  }
  0x4b   : > { %2606 = vmatpush1.bf16.msra.mxu0 %v10326_v6  ;;  %v10448_v6 = vld [vmem:[%s13662_s1 + $0x3ac] ss:$16 sps:$4 sm:$0xff]  }
  0x4c   : > { %2607 = vmatprep.subr.bf16.mxu0 %v10334_v9  ;;  %v10440_v9 = vld [vmem:[%s13662_s1 + $0x3c0] ss:$16 sps:$4 sm:$0xff]  }
  0x4d   : > { %3378 = vmatpush1.bf16.msra.mxu1 %v10374_v14  ;;  %v10455_v14 = vld [vmem:[%s13662_s1 + $0x3c8] ss:$16 sps:$4 sm:$0xff]  }
  0x4e   : > { %2453 = vmatmul.mubr.bf16.gmra.mrb[4].mxu0 %v10325_v11  ;;  %3225 = vmatmul.mubr.bf16.gmra.mrb[4].mxu1 %v10325_v11  ;;  %v10454_v11 = vld [vmem:[%s13662_s1 + $0x3e4] ss:$16 sps:$4 sm:$0xff]  }
  0x4f   : > { %2462 = vmatprep.mubr.bf16.mxu0 %v10329_v12  ;;  %3234 = vmatprep.mubr.bf16.mxu1 %v10329_v12  ;;  %v10457_v12 = vld [vmem:[%s13662_s1 + $0x3cc] ss:$16 sps:$4 sm:$0xff]  }
  0x50   : > { %2608 = vmatpush1.bf16.msra.mxu0 %v10332_v13  ;;  %3379 = vmatprep.subr.bf16.mxu1 %v10385_v16  ;;  %v10452_v13 = vld [vmem:[%s13662_s1 + $0x3e0] ss:$16 sps:$4 sm:$0xff]   ;;  %v10466_v16 = vld [vmem:[%s13662_s1 + $0x404] ss:$16 sps:$4 sm:$0xff]  }
  0x51   : > { %2609 = vmatprep.subr.bf16.mxu0 %v10340_v15  ;;  %3380 = vmatpush1.bf16.msra.mxu1 %v10383_v18  ;;  %v10460_v15 = vld [vmem:[%s13662_s1 + $0x3ec] ss:$16 sps:$4 sm:$0xff]  }
  0x52   : > { %3381 = vmatprep.subr.bf16.mxu1 %v10388_v20  ;;  %v10377_v18 = vld [vmem:[%s11343_s28 + $0x1fc] ss:$28 sps:$4 sm:$0xff]  }
  0x53   : > { %v10517_v20 = vld [vmem:[%s13662_s1 + $0x40c] ss:$16 sps:$4 sm:$0xff]  }
  0x54   : > { %2610 = vmatpush1.bf16.msra.mxu0 %v10338_v17  ;;  %v10367_v17 = vld [vmem:[%s11343_s28 + $0x1c0] ss:$28 sps:$4 sm:$0xff]  }
  0x55   : > { %2611 = vmatprep.subr.bf16.mxu0 %v10346_v19  ;;  %3382 = vmatpush1.bf16.msra.mxu1 %v10386_v24  ;;  %v10458_v19 = vld [vmem:[%s13662_s1 + $0x3e8] ss:$16 sps:$4 sm:$0xff]  }
  0x56   : > { %2463 = vmatmul.mubr.bf16.gmra.mrb[8].mxu0 %v10331_v21  ;;  %3235 = vmatmul.mubr.bf16.gmra.mrb[8].mxu1 %v10331_v21  ;;  %v10379_v21 = vld [vmem:[%s11343_s28 + $0x1f8] ss:$28 sps:$4 sm:$0xff]   ;;  %v10401_v24 = vld [vmem:[%s11343_s28 + $0x26c] ss:$28 sps:$4 sm:$0xff]  }
  0x57   : > { %2472 = vmatprep.mubr.bf16.mxu0 %v10335_v22  ;;  %3244 = vmatprep.mubr.bf16.mxu1 %v10335_v22  ;;  %v10389_v22 = vld [vmem:[%s11343_s28 + $0x234] ss:$28 sps:$4 sm:$0xff]  }
  0x58   : > { %2612 = vmatpush1.bf16.msra.mxu0 %v10344_v23  ;;  %3383 = vmatprep.subr.bf16.mxu1 %v10397_v26  ;;  %v10391_v23 = vld [vmem:[%s11343_s28 + $0x230] ss:$28 sps:$4 sm:$0xff]   ;;  %v10413_v26 = vld [vmem:[%s11343_s28 + $0x2a4] ss:$28 sps:$4 sm:$0xff]  }
  0x59   : > { %2613 = vmatprep.subr.bf16.mxu0 %v10352_v25  ;;  %3384 = vmatpush1.bf16.msra.mxu1 %v10395_v28  ;;  %v10403_v25 = vld [vmem:[%s11343_s28 + $0x268] ss:$28 sps:$4 sm:$0xff]   ;;  %v10425_v28 = vld [vmem:[%s11343_s28 + $0x2dc] ss:$28 sps:$4 sm:$0xff]  }
  0x5a   : > { %3385 = vmatprep.subr.bf16.mxu1 %v10400_v30  ;;  %v10437_v30 = vld [vmem:[%s11343_s28 + $0x314] ss:$28 sps:$4 sm:$0xff]  }
  0x5c   : > { %2614 = vmatpush1.bf16.msra.mxu0 %v10350_v27  ;;  %v10415_v27 = vld [vmem:[%s11343_s28 + $0x2a0] ss:$28 sps:$4 sm:$0xff]  }
  0x5d   : > { %2615 = vmatprep.subr.bf16.mxu0 %v10358_v29  ;;  %3386 = vmatpush1.bf16.msra.mxu1 %v10398_v34  ;;  %v10427_v29 = vld [vmem:[%s11343_s28 + $0x2d8] ss:$28 sps:$4 sm:$0xff]   ;;  %v10463_v34 = vld [vmem:[%s11343_s28 + $0xc] ss:$28 sps:$4 sm:$0xff]  }
  0x5e   : > { %2473 = vmatmul.mubr.bf16.gmra.mrb[12].mxu0 %v10337_v31  ;;  %3245 = vmatmul.mubr.bf16.gmra.mrb[12].mxu1 %v10337_v31  ;;  %v10439_v31 = vld [vmem:[%s11343_s28 + $0x310] ss:$28 sps:$4 sm:$0xff]  }
  0x5f   : > { %2482 = vmatprep.mubr.bf16.mxu0 %v10341_v32  ;;  %3254 = vmatprep.mubr.bf16.mxu1 %v10341_v32  ;;  %v10449_v32 = vld [vmem:[%s11343_s28 + $0x34c] ss:$28 sps:$4 sm:$0xff]  }
  0x60   : > { %2616 = vmatpush1.bf16.msra.mxu0 %v10356_v33  ;;  %3387 = vmatprep.subr.bf16.mxu1 %v10409_v36  ;;  %v10451_v33 = vld [vmem:[%s11343_s28 + $0x348] ss:$28 sps:$4 sm:$0xff]   ;;  %v10464_v36 = vld [vmem:[%s13662_s1 + $0x400] ss:$16 sps:$4 sm:$0xff]  }
  0x61   : > { %2617 = vmatprep.subr.bf16.mxu0 %v10364_v35  ;;  %3388 = vmatpush1.bf16.msra.mxu1 %v10407_v38  ;;  %v10461_v35 = vld [vmem:[%s11343_s28 + $0x8] ss:$28 sps:$4 sm:$0xff]  }
  0x62   : > { %3389 = vmatprep.subr.bf16.mxu1 %v10412_v40  ;;  %v10472_v38 = vld [vmem:[%s13662_s1 + $0x424] ss:$16 sps:$4 sm:$0xff]   ;;  %v10470_v40 = vld [vmem:[%s13662_s1 + $0x420] ss:$16 sps:$4 sm:$0xff]  }
  0x64   : > { %2618 = vmatpush1.bf16.msra.mxu0 %v10362_v37  ;;  %v10467_v37 = vld [vmem:[%s11343_s28 + $0x44] ss:$28 sps:$4 sm:$0xff]  }
  0x65   : > { %2619 = vmatprep.subr.bf16.mxu0 %v10370_v39  ;;  %3390 = vmatpush1.bf16.msra.mxu1 %v10410_v44  ;;  %v10515_v39 = vld [vmem:[%s13662_s1 + $0x408] ss:$16 sps:$4 sm:$0xff]  }
  0x66   : > { %2483 = vmatmul.mubr.bf16.gmra.mrb[16].mxu0 %v10343_v41  ;;  %3255 = vmatmul.mubr.bf16.gmra.mrb[16].mxu1 %v10343_v41  ;;  %v10520_v41 = vld [vmem:[%s13662_s1 + $0x42c] ss:$16 sps:$4 sm:$0xff]   ;;  %v10518_v44 = vld [vmem:[%s13662_s1 + $0x428] ss:$16 sps:$4 sm:$0xff]  }
  0x67   : > { %2492 = vmatprep.mubr.bf16.mxu0 %v10347_v42  ;;  %3264 = vmatprep.mubr.bf16.mxu1 %v10347_v42  ;;  %v10478_v42 = vld [vmem:[%s13662_s1 + $0x444] ss:$16 sps:$4 sm:$0xff]  }
  0x68   : > { %2620 = vmatpush1.bf16.msra.mxu0 %v10368_v43  ;;  %3391 = vmatprep.subr.bf16.mxu1 %v10421_v46  ;;  %v10469_v43 = vld [vmem:[%s11343_s28 + $0x40] ss:$28 sps:$4 sm:$0xff]  }
  0x69   : > { %2621 = vmatprep.subr.bf16.mxu0 %v10382_v45  ;;  %3392 = vmatpush1.bf16.msra.mxu1 %v10419_v48  ;;  %v10473_v45 = vld [vmem:[%s11343_s28 + $0x7c] ss:$28 sps:$4 sm:$0xff]   ;;  %v10476_v46 = vld [vmem:[%s13662_s1 + $0x440] ss:$16 sps:$4 sm:$0xff]   ;;  %v10484_v48 = vld [vmem:[%s13662_s1 + $0x464] ss:$16 sps:$4 sm:$0xff]  }
  0x6a   : > { %3393 = vmatprep.subr.bf16.mxu1 %v10424_v50  ;;  %v10482_v50 = vld [vmem:[%s13662_s1 + $0x460] ss:$16 sps:$4 sm:$0xff]  }
  0x6c   : > { %2622 = vmatpush1.bf16.msra.mxu0 %v10380_v47  ;;  %v10529_v47 = vld [vmem:[%s13662_s1 + $0x44c] ss:$16 sps:$4 sm:$0xff]  }
  0x6d   : > { %2623 = vmatprep.subr.bf16.mxu0 %v10394_v49  ;;  %3394 = vmatpush1.bf16.msra.mxu1 %v10422_v54  ;;  %v10527_v49 = vld [vmem:[%s13662_s1 + $0x448] ss:$16 sps:$4 sm:$0xff]  }
  0x6e   : > { %2493 = vmatmul.mubr.bf16.gmra.mrb[20].mxu0 %v10349_v51  ;;  %3265 = vmatmul.mubr.bf16.gmra.mrb[20].mxu1 %v10349_v51  ;;  %v10532_v51 = vld [vmem:[%s13662_s1 + $0x46c] ss:$16 sps:$4 sm:$0xff]   ;;  %v10475_v54 = vld [vmem:[%s11343_s28 + $0x78] ss:$28 sps:$4 sm:$0xff]  }
  0x6f   : > { %2502 = vmatprep.mubr.bf16.mxu0 %v10353_v52  ;;  %3274 = vmatprep.mubr.bf16.mxu1 %v10353_v52  ;;  %v10490_v52 = vld [vmem:[%s13662_s1 + $0x484] ss:$16 sps:$4 sm:$0xff]  }
  0x70   : > { %2624 = vmatpush1.bf16.msra.mxu0 %v10392_v53  ;;  %3395 = vmatprep.subr.bf16.mxu1 %v10433_v56  ;;  %v10530_v53 = vld [vmem:[%s13662_s1 + $0x468] ss:$16 sps:$4 sm:$0xff]   ;;  %v10488_v56 = vld [vmem:[%s13662_s1 + $0x480] ss:$16 sps:$4 sm:$0xff]  }
  0x71   : > { %2625 = vmatprep.subr.bf16.mxu0 %v10406_v55  ;;  %3396 = vmatpush1.bf16.msra.mxu1 %v10431_v58  ;;  %v10479_v55 = vld [vmem:[%s11343_s28 + $0xb4] ss:$28 sps:$4 sm:$0xff]  }
  0x72   : > { %3397 = vmatprep.subr.bf16.mxu1 %v10436_v60  ;;  %v10496_v58 = vld [vmem:[%s13662_s1 + $0x4a4] ss:$16 sps:$4 sm:$0xff]   ;;  %v10494_v60 = vld [vmem:[%s13662_s1 + $0x4a0] ss:$16 sps:$4 sm:$0xff]  }
  0x74   : > { %2626 = vmatpush1.bf16.msra.mxu0 %v10404_v57  ;;  %v10541_v57 = vld [vmem:[%s13662_s1 + $0x48c] ss:$16 sps:$4 sm:$0xff]  }
  0x75   : > { %2627 = vmatprep.subr.bf16.mxu0 %v10418_v59  ;;  %3398 = vmatpush1.bf16.msra.mxu1 %v10434_v0  ;;  %v10539_v59 = vld [vmem:[%s13662_s1 + $0x488] ss:$16 sps:$4 sm:$0xff]   ;;  %v10481_v0 = vld [vmem:[%s11343_s28 + $0xb0] ss:$28 sps:$4 sm:$0xff]  }
  0x76   : > { %2503 = vmatmul.mubr.bf16.gmra.mrb[24].mxu0 %v10355_v61  ;;  %3275 = vmatmul.mubr.bf16.gmra.mrb[24].mxu1 %v10355_v61  ;;  %v10544_v61 = vld [vmem:[%s13662_s1 + $0x4ac] ss:$16 sps:$4 sm:$0xff]  }
  0x77   : > { %2512 = vmatprep.mubr.bf16.mxu0 %v10359_v62  ;;  %3284 = vmatprep.mubr.bf16.mxu1 %v10359_v62  ;;  %v10502_v62 = vld [vmem:[%s13662_s1 + $0x4c4] ss:$16 sps:$4 sm:$0xff]  }
  0x78   : > { %2628 = vmatpush1.bf16.msra.mxu0 %v10416_v63  ;;  %3399 = vmatprep.subr.bf16.mxu1 %v10445_v2  ;;  %v10542_v63 = vld [vmem:[%s13662_s1 + $0x4a8] ss:$16 sps:$4 sm:$0xff]   ;;  %v10500_v2 = vld [vmem:[%s13662_s1 + $0x4c0] ss:$16 sps:$4 sm:$0xff]  }
  0x79   : > { %2629 = vmatprep.subr.bf16.mxu0 %v10430_v1  ;;  %3400 = vmatpush1.bf16.msra.mxu1 %v10443_v4  ;;  %v10485_v1 = vld [vmem:[%s11343_s28 + $0xec] ss:$28 sps:$4 sm:$0xff]   ;;  %v10508_v4 = vld [vmem:[%s13662_s1 + $0x4e4] ss:$16 sps:$4 sm:$0xff]  }
  0x7a   : > { %3401 = vmatprep.subr.bf16.mxu1 %v10448_v6  ;;  %v10506_v6 = vld [vmem:[%s13662_s1 + $0x4e0] ss:$16 sps:$4 sm:$0xff]  }
  0x7c   : > { %2630 = vmatpush1.bf16.msra.mxu0 %v10428_v3  ;;  %v10553_v3 = vld [vmem:[%s13662_s1 + $0x4cc] ss:$16 sps:$4 sm:$0xff]  }
  0x7d   : > { %2631 = vmatprep.subr.bf16.mxu0 %v10442_v5  ;;  %3402 = vmatpush1.bf16.msra.mxu1 %v10446_v10  ;;  %v10551_v5 = vld [vmem:[%s13662_s1 + $0x4c8] ss:$16 sps:$4 sm:$0xff]  }
  0x7e   : > { %2513 = vmatmul.mubr.bf16.gmra.mrb[28].mxu0 %v10361_v7  ;;  %3285 = vmatmul.mubr.bf16.gmra.mrb[28].mxu1 %v10361_v7  ;;  %v10556_v7 = vld [vmem:[%s13662_s1 + $0x4ec] ss:$16 sps:$4 sm:$0xff]   ;;  %v10487_v10 = vld [vmem:[%s11343_s28 + $0xe8] ss:$28 sps:$4 sm:$0xff]  }
  0x7f   : > { %2522 = vmatprep.mubr.bf16.mxu0 %v10365_v8  ;;  %3294 = vmatprep.mubr.bf16.mxu1 %v10365_v8  ;;  %v10514_v8 = vld [vmem:[%s13662_s1 + $0x504] ss:$16 sps:$4 sm:$0xff]  }
  0x80   : > { %2632 = vmatpush1.bf16.msra.mxu0 %v10440_v9  ;;  %3403 = vmatprep.subr.bf16.mxu1 %v10457_v12  ;;  %v10554_v9 = vld [vmem:[%s13662_s1 + $0x4e8] ss:$16 sps:$4 sm:$0xff]   ;;  %v10512_v12 = vld [vmem:[%s13662_s1 + $0x500] ss:$16 sps:$4 sm:$0xff]  }
  0x81   : > { %2633 = vmatprep.subr.bf16.mxu0 %v10454_v11  ;;  %3404 = vmatpush1.bf16.msra.mxu1 %v10455_v14  ;;  %v10491_v11 = vld [vmem:[%s11343_s28 + $0x124] ss:$28 sps:$4 sm:$0xff]  }
  0x82   : > { %3405 = vmatprep.subr.bf16.mxu1 %v10460_v15  ;;  %v10526_v14 = vld [vmem:[%s13662_s1 + $0x524] ss:$16 sps:$4 sm:$0xff]   ;;  %v10563_v15 = vld [vmem:[%s13662_s1 + $0x508] ss:$16 sps:$4 sm:$0xff]  }
  0x84   : > { %2634 = vmatpush1.bf16.msra.mxu0 %v10452_v13  ;;  %v10565_v13 = vld [vmem:[%s13662_s1 + $0x50c] ss:$16 sps:$4 sm:$0xff]  }
  0x85   : > { %2796 = vmatprep.subr.bf16.mxu0 %v10466_v16  ;;  %3406 = vmatpush1.bf16.msra.mxu1 %v10458_v19  ;;  %v10524_v16 = vld [vmem:[%s13662_s1 + $0x520] ss:$16 sps:$4 sm:$0xff]   ;;  %v10566_v19 = vld [vmem:[%s13662_s1 + $0x528] ss:$16 sps:$4 sm:$0xff]  }
  0x86   : > { %2523 = vmatmul.mubr.bf16.gmra.mrb[32].mxu0 %v10367_v17  ;;  %3295 = vmatmul.mubr.bf16.gmra.mrb[32].mxu1 %v10367_v17  ;;  %v10568_v17 = vld [vmem:[%s13662_s1 + $0x52c] ss:$16 sps:$4 sm:$0xff]  }
  0x87   : > { %2532 = vmatprep.mubr.bf16.mxu0 %v10377_v18  ;;  %3304 = vmatprep.mubr.bf16.mxu1 %v10377_v18  ;;  %v10538_v18 = vld [vmem:[%s13662_s1 + $0x544] ss:$16 sps:$4 sm:$0xff]  }
  0x88   : > { %3568 = vmatprep.subr.bf16.mxu1 %v10517_v20  ;;  %v10493_v20 = vld [vmem:[%s11343_s28 + $0x120] ss:$28 sps:$4 sm:$0xff]  }
  0x8e   : > { %2533 = vmatmul.mubr.bf16.gmra.mrb[36].mxu0 %v10379_v21  ;;  %3305 = vmatmul.mubr.bf16.gmra.mrb[36].mxu1 %v10379_v21  ;;  %v10497_v21 = vld [vmem:[%s11343_s28 + $0x15c] ss:$28 sps:$4 sm:$0xff]  }
  0x8f   : > { %2542 = vmatprep.mubr.bf16.mxu0 %v10389_v22  ;;  %3314 = vmatprep.mubr.bf16.mxu1 %v10389_v22  ;;  %v10536_v22 = vld [vmem:[%s13662_s1 + $0x540] ss:$16 sps:$4 sm:$0xff]  }
  0x96   : > { %2543 = vmatmul.mubr.bf16.gmra.mrb[40].mxu0 %v10391_v23  ;;  %3315 = vmatmul.mubr.bf16.gmra.mrb[40].mxu1 %v10391_v23  ;;  %v10577_v23 = vld [vmem:[%s13662_s1 + $0x54c] ss:$16 sps:$4 sm:$0xff]  }
  0x97   : > { %2552 = vmatprep.mubr.bf16.mxu0 %v10401_v24  ;;  %3324 = vmatprep.mubr.bf16.mxu1 %v10401_v24  ;;  %v10550_v24 = vld [vmem:[%s13662_s1 + $0x564] ss:$16 sps:$4 sm:$0xff]  }
  0x9e   : > { %2553 = vmatmul.mubr.bf16.gmra.mrb[44].mxu0 %v10403_v25  ;;  %3325 = vmatmul.mubr.bf16.gmra.mrb[44].mxu1 %v10403_v25  ;;  %v10575_v25 = vld [vmem:[%s13662_s1 + $0x548] ss:$16 sps:$4 sm:$0xff]  }
  0x9f   : > { %2562 = vmatprep.mubr.bf16.mxu0 %v10413_v26  ;;  %3334 = vmatprep.mubr.bf16.mxu1 %v10413_v26  ;;  %v10548_v26 = vld [vmem:[%s13662_s1 + $0x560] ss:$16 sps:$4 sm:$0xff]  }
  0xa6   : > { %2563 = vmatmul.mubr.bf16.gmra.mrb[48].mxu0 %v10415_v27  ;;  %3335 = vmatmul.mubr.bf16.gmra.mrb[48].mxu1 %v10415_v27  ;;  %v10580_v27 = vld [vmem:[%s13662_s1 + $0x56c] ss:$16 sps:$4 sm:$0xff]  }
  0xa7   : > { %2572 = vmatprep.mubr.bf16.mxu0 %v10425_v28  ;;  %3344 = vmatprep.mubr.bf16.mxu1 %v10425_v28  ;;  %v10562_v28 = vld [vmem:[%s13662_s1 + $0x584] ss:$16 sps:$4 sm:$0xff]  }
  0xae   : > { %2573 = vmatmul.mubr.bf16.gmra.mrb[52].mxu0 %v10427_v29  ;;  %3345 = vmatmul.mubr.bf16.gmra.mrb[52].mxu1 %v10427_v29  ;;  %v10578_v29 = vld [vmem:[%s13662_s1 + $0x568] ss:$16 sps:$4 sm:$0xff]  }
  0xaf   : > { %2582 = vmatprep.mubr.bf16.mxu0 %v10437_v30  ;;  %3354 = vmatprep.mubr.bf16.mxu1 %v10437_v30  ;;  %v10499_v30 = vld [vmem:[%s11343_s28 + $0x158] ss:$28 sps:$4 sm:$0xff]  }
  0xb6   : > { %2583 = vmatmul.mubr.bf16.gmra.mrb[56].mxu0 %v10439_v31  ;;  %3355 = vmatmul.mubr.bf16.gmra.mrb[56].mxu1 %v10439_v31  ;;  %v10503_v31 = vld [vmem:[%s11343_s28 + $0x194] ss:$28 sps:$4 sm:$0xff]  }
  0xb7   : > { %2592 = vmatprep.mubr.bf16.mxu0 %v10449_v32  ;;  %3364 = vmatprep.mubr.bf16.mxu1 %v10449_v32  ;;  %v10560_v32 = vld [vmem:[%s13662_s1 + $0x580] ss:$16 sps:$4 sm:$0xff]  }
  0xbe   : > { %2593 = vmatmul.mubr.bf16.gmra.mrb[60].mxu0 %v10451_v33  ;;  %3365 = vmatmul.mubr.bf16.gmra.mrb[60].mxu1 %v10451_v33  ;;  %v10589_v33 = vld [vmem:[%s13662_s1 + $0x58c] ss:$16 sps:$4 sm:$0xff]  }
  0xbf   : > { %2635 = vmatprep.mubr.bf16.mxu0 %v10463_v34  ;;  %3407 = vmatprep.mubr.bf16.mxu1 %v10463_v34  ;;  %v10574_v34 = vld [vmem:[%s13662_s1 + $0x5a4] ss:$16 sps:$4 sm:$0xff]  }
  0xc6   : > { %2636 = vmatmul.mubr.bf16.vlgmr.msra.gmra.mrb[0].mxu0 %v10461_v35  ;;  %3408 = vmatmul.mubr.bf16.vlgmr.msra.gmra.mrb[0].mxu1 %v10461_v35  ;;  %v10587_v35 = vld [vmem:[%s13662_s1 + $0x588] ss:$16 sps:$4 sm:$0xff]  }
  0xc7   : > { %2797 = vmatpush1.bf16.msra.mxu0 %v10464_v36  ;;  %2645 = vmatprep.mubr.bf16.mxu0 %v10467_v37  ;;  %v10572_v36 = vld [vmem:[%s13662_s1 + $0x5a0] ss:$16 sps:$4 sm:$0xff]  }
  0xc8   : > { %3417 = vmatprep.mubr.bf16.mxu1 %v10467_v37  ;;  %2798 = vmatprep.subr.bf16.mxu0 %v10472_v38  ;;  %v10592_v37 = vld [vmem:[%s13662_s1 + $0x5ac] ss:$16 sps:$4 sm:$0xff]   ;;  %v10586_v38 = vld [vmem:[%s13662_s1 + $0x5c4] ss:$16 sps:$4 sm:$0xff]  }
  0xc9   : > { %3569 = vmatpush1.bf16.msra.mxu1 %v10515_v39  ;;  %v10590_v39 = vld [vmem:[%s13662_s1 + $0x5a8] ss:$16 sps:$4 sm:$0xff]  }
  0xca   : > { %3570 = vmatprep.subr.bf16.mxu1 %v10520_v41  ;;  %v10509_v41 = vld [vmem:[%s11343_s28 + $0x1cc] ss:$28 sps:$4 sm:$0xff]  }
  0xcb   : > { %2799 = vmatpush1.bf16.msra.mxu0 %v10470_v40  ;;  %v10505_v40 = vld [vmem:[%s11343_s28 + $0x190] ss:$28 sps:$4 sm:$0xff]  }
  0xcc   : > { %2800 = vmatprep.subr.bf16.mxu0 %v10478_v42  ;;  %v10584_v42 = vld [vmem:[%s13662_s1 + $0x5c0] ss:$16 sps:$4 sm:$0xff]  }
  0xcd   : > { %3571 = vmatpush1.bf16.msra.mxu1 %v10518_v44  ;;  %v10598_v44 = vld [vmem:[%s13662_s1 + $0x5e4] ss:$16 sps:$4 sm:$0xff]  }
  0xce   : > { %2646 = vmatmul.mubr.bf16.gmra.mrb[4].mxu0 %v10469_v43  ;;  %3418 = vmatmul.mubr.bf16.gmra.mrb[4].mxu1 %v10469_v43  ;;  %v10601_v43 = vld [vmem:[%s13662_s1 + $0x5cc] ss:$16 sps:$4 sm:$0xff]  }
  0xcf   : > { %2655 = vmatprep.mubr.bf16.mxu0 %v10473_v45  ;;  %3427 = vmatprep.mubr.bf16.mxu1 %v10473_v45  ;;  %v10599_v45 = vld [vmem:[%s13662_s1 + $0x5c8] ss:$16 sps:$4 sm:$0xff]  }
  0xd0   : > { %2801 = vmatpush1.bf16.msra.mxu0 %v10476_v46  ;;  %3572 = vmatprep.subr.bf16.mxu1 %v10529_v47  ;;  %v10596_v46 = vld [vmem:[%s13662_s1 + $0x5e0] ss:$16 sps:$4 sm:$0xff]   ;;  %v10604_v47 = vld [vmem:[%s13662_s1 + $0x5ec] ss:$16 sps:$4 sm:$0xff]  }
  0xd1   : > { %2802 = vmatprep.subr.bf16.mxu0 %v10484_v48  ;;  %3573 = vmatpush1.bf16.msra.mxu1 %v10527_v49  ;;  %v10602_v48 = vld [vmem:[%s13662_s1 + $0x5e8] ss:$16 sps:$4 sm:$0xff]   ;;  %v10610_v49 = vld [vmem:[%s13662_s1 + $0x604] ss:$16 sps:$4 sm:$0xff]  }
  0xd2   : > { %3574 = vmatprep.subr.bf16.mxu1 %v10532_v51  ;;  %v10521_v51 = vld [vmem:[%s11343_s28 + $0x204] ss:$28 sps:$4 sm:$0xff]  }
  0xd4   : > { %2803 = vmatpush1.bf16.msra.mxu0 %v10482_v50  ;;  %v10511_v50 = vld [vmem:[%s11343_s28 + $0x1c8] ss:$28 sps:$4 sm:$0xff]  }
  0xd5   : > { %2804 = vmatprep.subr.bf16.mxu0 %v10490_v52  ;;  %3575 = vmatpush1.bf16.msra.mxu1 %v10530_v53  ;;  %v10523_v52 = vld [vmem:[%s11343_s28 + $0x200] ss:$28 sps:$4 sm:$0xff]  }
  0xd6   : > { %2656 = vmatmul.mubr.bf16.gmra.mrb[8].mxu0 %v10475_v54  ;;  %3428 = vmatmul.mubr.bf16.gmra.mrb[8].mxu1 %v10475_v54  ;;  %v10533_v53 = vld [vmem:[%s11343_s28 + $0x23c] ss:$28 sps:$4 sm:$0xff]  }
  0xd7   : > { %2665 = vmatprep.mubr.bf16.mxu0 %v10479_v55  ;;  %3437 = vmatprep.mubr.bf16.mxu1 %v10479_v55  ;;  %v10535_v54 = vld [vmem:[%s11343_s28 + $0x238] ss:$28 sps:$4 sm:$0xff]  }
  0xd8   : > { %2805 = vmatpush1.bf16.msra.mxu0 %v10488_v56  ;;  %3576 = vmatprep.subr.bf16.mxu1 %v10541_v57  ;;  %v10545_v55 = vld [vmem:[%s11343_s28 + $0x274] ss:$28 sps:$4 sm:$0xff]   ;;  %v10557_v57 = vld [vmem:[%s11343_s28 + $0x2ac] ss:$28 sps:$4 sm:$0xff]  }
  0xd9   : > { %2806 = vmatprep.subr.bf16.mxu0 %v10496_v58  ;;  %3577 = vmatpush1.bf16.msra.mxu1 %v10539_v59  ;;  %v10547_v56 = vld [vmem:[%s11343_s28 + $0x270] ss:$28 sps:$4 sm:$0xff]   ;;  %v10559_v58 = vld [vmem:[%s11343_s28 + $0x2a8] ss:$28 sps:$4 sm:$0xff]  }
  0xda   : > { %3578 = vmatprep.subr.bf16.mxu1 %v10544_v61  ;;  %v10569_v59 = vld [vmem:[%s11343_s28 + $0x2e4] ss:$28 sps:$4 sm:$0xff]  }
  0xdb   : > { %v10571_v61 = vld [vmem:[%s11343_s28 + $0x2e0] ss:$28 sps:$4 sm:$0xff]  }
  0xdc   : > { %2807 = vmatpush1.bf16.msra.mxu0 %v10494_v60  ;;  %v10667_v60 = vld [vmem:[%s13662_s1 + $0x60c] ss:$16 sps:$4 sm:$0xff]  }
  0xdd   : > { %2808 = vmatprep.subr.bf16.mxu0 %v10502_v62  ;;  %3579 = vmatpush1.bf16.msra.mxu1 %v10542_v63  ;;  %v10581_v62 = vld [vmem:[%s11343_s28 + $0x31c] ss:$28 sps:$4 sm:$0xff]  }
  0xde   : > { %2666 = vmatmul.mubr.bf16.gmra.mrb[12].mxu0 %v10481_v0  ;;  %3438 = vmatmul.mubr.bf16.gmra.mrb[12].mxu1 %v10481_v0  ;;  %v10583_v63 = vld [vmem:[%s11343_s28 + $0x318] ss:$28 sps:$4 sm:$0xff]  }
  0xdf   : > { %2675 = vmatprep.mubr.bf16.mxu0 %v10485_v1  ;;  %3447 = vmatprep.mubr.bf16.mxu1 %v10485_v1  ;;  %v10593_v0 = vld [vmem:[%s11343_s28 + $0x354] ss:$28 sps:$4 sm:$0xff]  }
  0xe0   : > { %2809 = vmatpush1.bf16.msra.mxu0 %v10500_v2  ;;  %3580 = vmatprep.subr.bf16.mxu1 %v10553_v3  ;;  %v10595_v1 = vld [vmem:[%s11343_s28 + $0x350] ss:$28 sps:$4 sm:$0xff]  }
  0xe1   : > { %2810 = vmatprep.subr.bf16.mxu0 %v10508_v4  ;;  %3581 = vmatpush1.bf16.msra.mxu1 %v10551_v5  ;;  %v10607_v2 = vld [vmem:[%s11343_s28 + $0x14] ss:$28 sps:$4 sm:$0xff]   ;;  %v10611_v5 = vld [vmem:[%s11343_s28 + $0x4c] ss:$28 sps:$4 sm:$0xff]  }
  0xe2   : > { %3582 = vmatprep.subr.bf16.mxu1 %v10556_v7  ;;  %v10605_v3 = vld [vmem:[%s11343_s28 + $0x10] ss:$28 sps:$4 sm:$0xff]   ;;  %v10665_v7 = vld [vmem:[%s13662_s1 + $0x608] ss:$16 sps:$4 sm:$0xff]  }
  0xe3   : > { %v10608_v4 = vld [vmem:[%s13662_s1 + $0x600] ss:$16 sps:$4 sm:$0xff]  }
  0xe4   : > { %2811 = vmatpush1.bf16.msra.mxu0 %v10506_v6  ;;  %v10619_v6 = vld [vmem:[%s13662_s1 + $0x624] ss:$16 sps:$4 sm:$0xff]  }
  0xe5   : > { %2812 = vmatprep.subr.bf16.mxu0 %v10514_v8  ;;  %3583 = vmatpush1.bf16.msra.mxu1 %v10554_v9  ;;  %v10670_v8 = vld [vmem:[%s13662_s1 + $0x62c] ss:$16 sps:$4 sm:$0xff]   ;;  %v10617_v9 = vld [vmem:[%s13662_s1 + $0x620] ss:$16 sps:$4 sm:$0xff]  }
  0xe6   : > { %2676 = vmatmul.mubr.bf16.gmra.mrb[16].mxu0 %v10487_v10  ;;  %3448 = vmatmul.mubr.bf16.gmra.mrb[16].mxu1 %v10487_v10  ;;  %v10628_v10 = vld [vmem:[%s13662_s1 + $0x644] ss:$16 sps:$4 sm:$0xff]  }
  0xe7   : > { %2685 = vmatprep.mubr.bf16.mxu0 %v10491_v11  ;;  %3457 = vmatprep.mubr.bf16.mxu1 %v10491_v11  ;;  %v10668_v11 = vld [vmem:[%s13662_s1 + $0x628] ss:$16 sps:$4 sm:$0xff]  }
  0xe8   : > { %2813 = vmatpush1.bf16.msra.mxu0 %v10512_v12  ;;  %3584 = vmatprep.subr.bf16.mxu1 %v10565_v13  ;;  %v10613_v12 = vld [vmem:[%s11343_s28 + $0x48] ss:$28 sps:$4 sm:$0xff]  }
  0xe9   : > { %2814 = vmatprep.subr.bf16.mxu0 %v10526_v14  ;;  %3585 = vmatpush1.bf16.msra.mxu1 %v10563_v15  ;;  %v10614_v13 = vld [vmem:[%s11343_s28 + $0x84] ss:$28 sps:$4 sm:$0xff]   ;;  %v10676_v15 = vld [vmem:[%s13662_s1 + $0x64c] ss:$16 sps:$4 sm:$0xff]  }
  0xea   : > { %3586 = vmatprep.subr.bf16.mxu1 %v10568_v17  ;;  %v10626_v14 = vld [vmem:[%s13662_s1 + $0x640] ss:$16 sps:$4 sm:$0xff]   ;;  %v10674_v17 = vld [vmem:[%s13662_s1 + $0x648] ss:$16 sps:$4 sm:$0xff]  }
  0xec   : > { %2815 = vmatpush1.bf16.msra.mxu0 %v10524_v16  ;;  %v10637_v16 = vld [vmem:[%s13662_s1 + $0x664] ss:$16 sps:$4 sm:$0xff]  }
  0xed   : > { %2816 = vmatprep.subr.bf16.mxu0 %v10538_v18  ;;  %3587 = vmatpush1.bf16.msra.mxu1 %v10566_v19  ;;  %v10679_v18 = vld [vmem:[%s13662_s1 + $0x66c] ss:$16 sps:$4 sm:$0xff]   ;;  %v10635_v19 = vld [vmem:[%s13662_s1 + $0x660] ss:$16 sps:$4 sm:$0xff]  }
  0xee   : > { %2686 = vmatmul.mubr.bf16.gmra.mrb[20].mxu0 %v10493_v20  ;;  %3458 = vmatmul.mubr.bf16.gmra.mrb[20].mxu1 %v10493_v20  ;;  %v10646_v20 = vld [vmem:[%s13662_s1 + $0x684] ss:$16 sps:$4 sm:$0xff]  }
  0xef   : > { %2695 = vmatprep.mubr.bf16.mxu0 %v10497_v21  ;;  %3467 = vmatprep.mubr.bf16.mxu1 %v10497_v21  ;;  %v10677_v21 = vld [vmem:[%s13662_s1 + $0x668] ss:$16 sps:$4 sm:$0xff]  }
  0xf0   : > { %2817 = vmatpush1.bf16.msra.mxu0 %v10536_v22  ;;  %3588 = vmatprep.subr.bf16.mxu1 %v10577_v23  ;;  %v10616_v22 = vld [vmem:[%s11343_s28 + $0x80] ss:$28 sps:$4 sm:$0xff]  }
  0xf1   : > { %2818 = vmatprep.subr.bf16.mxu0 %v10550_v24  ;;  %3589 = vmatpush1.bf16.msra.mxu1 %v10575_v25  ;;  %v10620_v23 = vld [vmem:[%s11343_s28 + $0xbc] ss:$28 sps:$4 sm:$0xff]   ;;  %v10644_v24 = vld [vmem:[%s13662_s1 + $0x680] ss:$16 sps:$4 sm:$0xff]  }
  0xf2   : > { %3590 = vmatprep.subr.bf16.mxu1 %v10580_v27  ;;  %v10688_v25 = vld [vmem:[%s13662_s1 + $0x68c] ss:$16 sps:$4 sm:$0xff]   ;;  %v10686_v27 = vld [vmem:[%s13662_s1 + $0x688] ss:$16 sps:$4 sm:$0xff]  }
  0xf4   : > { %2819 = vmatpush1.bf16.msra.mxu0 %v10548_v26  ;;  %v10655_v26 = vld [vmem:[%s13662_s1 + $0x6a4] ss:$16 sps:$4 sm:$0xff]  }
  0xf5   : > { %2820 = vmatprep.subr.bf16.mxu0 %v10562_v28  ;;  %3591 = vmatpush1.bf16.msra.mxu1 %v10578_v29  ;;  %v10691_v28 = vld [vmem:[%s13662_s1 + $0x6ac] ss:$16 sps:$4 sm:$0xff]   ;;  %v10653_v29 = vld [vmem:[%s13662_s1 + $0x6a0] ss:$16 sps:$4 sm:$0xff]  }
  0xf6   : > { %2696 = vmatmul.mubr.bf16.gmra.mrb[24].mxu0 %v10499_v30  ;;  %3468 = vmatmul.mubr.bf16.gmra.mrb[24].mxu1 %v10499_v30  ;;  %v10664_v30 = vld [vmem:[%s13662_s1 + $0x6c4] ss:$16 sps:$4 sm:$0xff]  }
  0xf7   : > { %2705 = vmatprep.mubr.bf16.mxu0 %v10503_v31  ;;  %3477 = vmatprep.mubr.bf16.mxu1 %v10503_v31  ;;  %v10689_v31 = vld [vmem:[%s13662_s1 + $0x6a8] ss:$16 sps:$4 sm:$0xff]  }
  0xf8   : > { %2821 = vmatpush1.bf16.msra.mxu0 %v10560_v32  ;;  %3592 = vmatprep.subr.bf16.mxu1 %v10589_v33  ;;  %v10622_v32 = vld [vmem:[%s11343_s28 + $0xb8] ss:$28 sps:$4 sm:$0xff]  }
  0xf9   : > { %2822 = vmatprep.subr.bf16.mxu0 %v10574_v34  ;;  %3593 = vmatpush1.bf16.msra.mxu1 %v10587_v35  ;;  %v10623_v33 = vld [vmem:[%s11343_s28 + $0xf4] ss:$28 sps:$4 sm:$0xff]   ;;  %v10697_v35 = vld [vmem:[%s13662_s1 + $0x6cc] ss:$16 sps:$4 sm:$0xff]  }
  0xfa   : > { %3594 = vmatprep.subr.bf16.mxu1 %v10592_v37  ;;  %v10662_v34 = vld [vmem:[%s13662_s1 + $0x6c0] ss:$16 sps:$4 sm:$0xff]   ;;  %v10695_v37 = vld [vmem:[%s13662_s1 + $0x6c8] ss:$16 sps:$4 sm:$0xff]  }
  0xfc   : > { %2823 = vmatpush1.bf16.msra.mxu0 %v10572_v36  ;;  %v10685_v36 = vld [vmem:[%s13662_s1 + $0x6e4] ss:$16 sps:$4 sm:$0xff]  }
  0xfd   : > { %2824 = vmatprep.subr.bf16.mxu0 %v10586_v38  ;;  %3595 = vmatpush1.bf16.msra.mxu1 %v10590_v39  ;;  %v10700_v38 = vld [vmem:[%s13662_s1 + $0x6ec] ss:$16 sps:$4 sm:$0xff]   ;;  %v10683_v39 = vld [vmem:[%s13662_s1 + $0x6e0] ss:$16 sps:$4 sm:$0xff]  }
  0xfe   : > { %2706 = vmatmul.mubr.bf16.gmra.mrb[28].mxu0 %v10505_v40  ;;  %3478 = vmatmul.mubr.bf16.gmra.mrb[28].mxu1 %v10505_v40  ;;  %v10698_v40 = vld [vmem:[%s13662_s1 + $0x6e8] ss:$16 sps:$4 sm:$0xff]  }
  0xff   : > { %2715 = vmatprep.mubr.bf16.mxu0 %v10509_v41  ;;  %3487 = vmatprep.mubr.bf16.mxu1 %v10509_v41  ;;  %v10625_v41 = vld [vmem:[%s11343_s28 + $0xf0] ss:$28 sps:$4 sm:$0xff]  }
 0x100   : > { %2825 = vmatpush1.bf16.msra.mxu0 %v10584_v42  ;;  %3596 = vmatprep.subr.bf16.mxu1 %v10601_v43  ;;  %v10629_v42 = vld [vmem:[%s11343_s28 + $0x12c] ss:$28 sps:$4 sm:$0xff]  }
 0x101   : > { %2826 = vmatprep.subr.bf16.mxu0 %v10598_v44  ;;  %3597 = vmatpush1.bf16.msra.mxu1 %v10599_v45  ;;  %v10631_v43 = vld [vmem:[%s11343_s28 + $0x128] ss:$28 sps:$4 sm:$0xff]   ;;  %v10634_v45 = vld [vmem:[%s11343_s28 + $0x160] ss:$28 sps:$4 sm:$0xff]  }
 0x102   : > { %3598 = vmatprep.subr.bf16.mxu1 %v10604_v47  ;;  %v10632_v44 = vld [vmem:[%s11343_s28 + $0x164] ss:$28 sps:$4 sm:$0xff]   ;;  %v10640_v47 = vld [vmem:[%s11343_s28 + $0x198] ss:$28 sps:$4 sm:$0xff]  }
 0x104   : > { %2827 = vmatpush1.bf16.msra.mxu0 %v10596_v46  ;;  %v10638_v46 = vld [vmem:[%s11343_s28 + $0x19c] ss:$28 sps:$4 sm:$0xff]  }
 0x105   : > { %3599 = vmatpush1.bf16.msra.mxu1 %v10602_v48  ;;  %2989 = vmatprep.subr.bf16.mxu0 %v10610_v49  ;;  %v10641_v48 = vld [vmem:[%s11343_s28 + $0x1d4] ss:$28 sps:$4 sm:$0xff]  }
 0x106   : > { %2716 = vmatmul.mubr.bf16.gmra.mrb[32].mxu0 %v10511_v50  ;;  %3488 = vmatmul.mubr.bf16.gmra.mrb[32].mxu1 %v10511_v50  ;;  %v10643_v49 = vld [vmem:[%s11343_s28 + $0x1d0] ss:$28 sps:$4 sm:$0xff]  }
 0x107   : > { %2725 = vmatprep.mubr.bf16.mxu0 %v10521_v51  ;;  %3497 = vmatprep.mubr.bf16.mxu1 %v10521_v51  ;;  %v10647_v50 = vld [vmem:[%s11343_s28 + $0x20c] ss:$28 sps:$4 sm:$0xff]  }
 0x108   : > { %3761 = vmatprep.subr.bf16.mxu1 %v10667_v60  ;;  %v10649_v51 = vld [vmem:[%s11343_s28 + $0x208] ss:$28 sps:$4 sm:$0xff]  }
 0x109   : > { %v10673_v60 = vld [vmem:[%s11343_s28 + $0x2e8] ss:$28 sps:$4 sm:$0xff]  }
 0x10e   : > { %2726 = vmatmul.mubr.bf16.gmra.mrb[36].mxu0 %v10523_v52  ;;  %3498 = vmatmul.mubr.bf16.gmra.mrb[36].mxu1 %v10523_v52  ;;  %v10650_v52 = vld [vmem:[%s11343_s28 + $0x244] ss:$28 sps:$4 sm:$0xff]  }
 0x10f   : > { %2735 = vmatprep.mubr.bf16.mxu0 %v10533_v53  ;;  %3507 = vmatprep.mubr.bf16.mxu1 %v10533_v53  ;;  %v10652_v53 = vld [vmem:[%s11343_s28 + $0x240] ss:$28 sps:$4 sm:$0xff]  }
 0x116   : > { %2736 = vmatmul.mubr.bf16.gmra.mrb[40].mxu0 %v10535_v54  ;;  %3508 = vmatmul.mubr.bf16.gmra.mrb[40].mxu1 %v10535_v54  ;;  %v10656_v54 = vld [vmem:[%s11343_s28 + $0x27c] ss:$28 sps:$4 sm:$0xff]  }
 0x117   : > { %2745 = vmatprep.mubr.bf16.mxu0 %v10545_v55  ;;  %3517 = vmatprep.mubr.bf16.mxu1 %v10545_v55  ;;  %v10658_v55 = vld [vmem:[%s11343_s28 + $0x278] ss:$28 sps:$4 sm:$0xff]  }
 0x11e   : > { %2746 = vmatmul.mubr.bf16.gmra.mrb[44].mxu0 %v10547_v56  ;;  %3518 = vmatmul.mubr.bf16.gmra.mrb[44].mxu1 %v10547_v56  ;;  %v10659_v56 = vld [vmem:[%s11343_s28 + $0x2b4] ss:$28 sps:$4 sm:$0xff]  }
 0x11f   : > { %2755 = vmatprep.mubr.bf16.mxu0 %v10557_v57  ;;  %3527 = vmatprep.mubr.bf16.mxu1 %v10557_v57  ;;  %v10715_v57 = vld [vmem:[%s13664_s3 + $0x4] ss:$16 sps:$4 sm:$0xff]  }
 0x126   : > { %2756 = vmatmul.mubr.bf16.gmra.mrb[48].mxu0 %v10559_v58  ;;  %3528 = vmatmul.mubr.bf16.gmra.mrb[48].mxu1 %v10559_v58  ;;  %v10661_v58 = vld [vmem:[%s11343_s28 + $0x2b0] ss:$28 sps:$4 sm:$0xff]  }
 0x127   : > { %2765 = vmatprep.mubr.bf16.mxu0 %v10569_v59  ;;  %3537 = vmatprep.mubr.bf16.mxu1 %v10569_v59  ;;  %v10671_v59 = vld [vmem:[%s11343_s28 + $0x2ec] ss:$28 sps:$4 sm:$0xff]  }
 0x12e   : > { %2766 = vmatmul.mubr.bf16.gmra.mrb[52].mxu0 %v10571_v61  ;;  %3538 = vmatmul.mubr.bf16.gmra.mrb[52].mxu1 %v10571_v61  ;;  %v10680_v61 = vld [vmem:[%s11343_s28 + $0x324] ss:$28 sps:$4 sm:$0xff]  }
 0x12f   : > { %2775 = vmatprep.mubr.bf16.mxu0 %v10581_v62  ;;  %3547 = vmatprep.mubr.bf16.mxu1 %v10581_v62  ;;  %v10682_v62 = vld [vmem:[%s11343_s28 + $0x320] ss:$28 sps:$4 sm:$0xff]  }
 0x136   : > { %2776 = vmatmul.mubr.bf16.gmra.mrb[56].mxu0 %v10583_v63  ;;  %3548 = vmatmul.mubr.bf16.gmra.mrb[56].mxu1 %v10583_v63  ;;  %v10692_v63 = vld [vmem:[%s11343_s28 + $0x35c] ss:$28 sps:$4 sm:$0xff]  }
 0x137   : > { %2785 = vmatprep.mubr.bf16.mxu0 %v10593_v0  ;;  %3557 = vmatprep.mubr.bf16.mxu1 %v10593_v0  ;;  %v10694_v0 = vld [vmem:[%s11343_s28 + $0x358] ss:$28 sps:$4 sm:$0xff]  }
 0x13e   : > { %2786 = vmatmul.mubr.bf16.gmra.mrb[60].mxu0 %v10595_v1  ;;  %3558 = vmatmul.mubr.bf16.gmra.mrb[60].mxu1 %v10595_v1  ;;  %v11141_v1 = vmov 0  }
 0x13f   : > { %2828 = vmatprep.mubr.bf16.mxu0 %v10607_v2  ;;  %3600 = vmatprep.mubr.bf16.mxu1 %v10607_v2  ;;  %v10746_v2 = vld [vmem:[%s13664_s3 + $0xc] ss:$16 sps:$4 sm:$0xff]  }
 0x146   : > { %2829 = vmatmul.mubr.bf16.vlgmr.msra.gmra.mrb[0].mxu0 %v10605_v3  ;;  %3601 = vmatmul.mubr.bf16.vlgmr.msra.gmra.mrb[0].mxu1 %v10605_v3  ;;  %v10701_v3 = vld [vmem:[%s11343_s28 + $0x18] ss:$28 sps:$4 sm:$0xff]  }
 0x147   : > { %2990 = vmatpush1.bf16.msra.mxu0 %v10608_v4  ;;  %2838 = vmatprep.mubr.bf16.mxu0 %v10611_v5  ;;  %v10713_v4 = vld [vmem:[%s13664_s3] ss:$16 sps:$4 sm:$0xff]  }
 0x148   : > { %3610 = vmatprep.mubr.bf16.mxu1 %v10611_v5  ;;  %2991 = vmatprep.subr.bf16.mxu0 %v10619_v6  ;;  %v10744_v5 = vld [vmem:[%s13664_s3 + $0x8] ss:$16 sps:$4 sm:$0xff]   ;;  %v10719_v6 = vld [vmem:[%s13664_s3 + $0x24] ss:$16 sps:$4 sm:$0xff]  }
 0x149   : > { %3762 = vmatpush1.bf16.msra.mxu1 %v10665_v7  ;;  %v10749_v7 = vld [vmem:[%s13664_s3 + $0x2c] ss:$16 sps:$4 sm:$0xff]  }
 0x14a   : > { %3763 = vmatprep.subr.bf16.mxu1 %v10670_v8  ;;  %v10717_v8 = vld [vmem:[%s13664_s3 + $0x20] ss:$16 sps:$4 sm:$0xff]  }
 0x14b   : > { %2992 = vmatpush1.bf16.msra.mxu0 %v10617_v9  ;;  %v10747_v9 = vld [vmem:[%s13664_s3 + $0x28] ss:$16 sps:$4 sm:$0xff]  }
 0x14c   : > { %2993 = vmatprep.subr.bf16.mxu0 %v10628_v10  ;;  %v10723_v10 = vld [vmem:[%s13664_s3 + $0x44] ss:$16 sps:$4 sm:$0xff]  }
 0x14d   : > { %3764 = vmatpush1.bf16.msra.mxu1 %v10668_v11  ;;  %v10755_v11 = vld [vmem:[%s13664_s3 + $0x4c] ss:$16 sps:$4 sm:$0xff]  }
 0x14e   : > { %2839 = vmatmul.mubr.bf16.gmra.mrb[4].mxu0 %v10613_v12  ;;  %3611 = vmatmul.mubr.bf16.gmra.mrb[4].mxu1 %v10613_v12  ;;  %v10702_v12 = vld [vmem:[%s11343_s28 + $0x50] ss:$28 sps:$4 sm:$0xff]  }
 0x14f   : > { %2848 = vmatprep.mubr.bf16.mxu0 %v10614_v13  ;;  %3620 = vmatprep.mubr.bf16.mxu1 %v10614_v13  ;;  %v10721_v13 = vld [vmem:[%s13664_s3 + $0x40] ss:$16 sps:$4 sm:$0xff]  }
 0x150   : > { %2994 = vmatpush1.bf16.msra.mxu0 %v10626_v14  ;;  %3765 = vmatprep.subr.bf16.mxu1 %v10676_v15  ;;  %v10753_v14 = vld [vmem:[%s13664_s3 + $0x48] ss:$16 sps:$4 sm:$0xff]   ;;  %v10727_v15 = vld [vmem:[%s13664_s3 + $0x64] ss:$16 sps:$4 sm:$0xff]  }
 0x151   : > { %2995 = vmatprep.subr.bf16.mxu0 %v10637_v16  ;;  %3766 = vmatpush1.bf16.msra.mxu1 %v10674_v17  ;;  %v10758_v16 = vld [vmem:[%s13664_s3 + $0x6c] ss:$16 sps:$4 sm:$0xff]   ;;  %v10725_v17 = vld [vmem:[%s13664_s3 + $0x60] ss:$16 sps:$4 sm:$0xff]  }
 0x152   : > { %3767 = vmatprep.subr.bf16.mxu1 %v10679_v18  ;;  %v10756_v18 = vld [vmem:[%s13664_s3 + $0x68] ss:$16 sps:$4 sm:$0xff]  }
 0x154   : > { %2996 = vmatpush1.bf16.msra.mxu0 %v10635_v19  ;;  %v10731_v19 = vld [vmem:[%s13664_s3 + $0x84] ss:$16 sps:$4 sm:$0xff]  }
 0x155   : > { %2997 = vmatprep.subr.bf16.mxu0 %v10646_v20  ;;  %3768 = vmatpush1.bf16.msra.mxu1 %v10677_v21  ;;  %v10764_v20 = vld [vmem:[%s13664_s3 + $0x8c] ss:$16 sps:$4 sm:$0xff]   ;;  %v10703_v21 = vld [vmem:[%s11343_s28 + $0x88] ss:$28 sps:$4 sm:$0xff]  }
 0x156   : > { %2849 = vmatmul.mubr.bf16.gmra.mrb[8].mxu0 %v10616_v22  ;;  %3621 = vmatmul.mubr.bf16.gmra.mrb[8].mxu1 %v10616_v22  ;;  %v10729_v22 = vld [vmem:[%s13664_s3 + $0x80] ss:$16 sps:$4 sm:$0xff]  }
 0x157   : > { %2858 = vmatprep.mubr.bf16.mxu0 %v10620_v23  ;;  %3630 = vmatprep.mubr.bf16.mxu1 %v10620_v23  ;;  %v10762_v23 = vld [vmem:[%s13664_s3 + $0x88] ss:$16 sps:$4 sm:$0xff]  }
 0x158   : > { %2998 = vmatpush1.bf16.msra.mxu0 %v10644_v24  ;;  %3769 = vmatprep.subr.bf16.mxu1 %v10688_v25  ;;  %v10734_v24 = vld [vmem:[%s13664_s3 + $0xa4] ss:$16 sps:$4 sm:$0xff]   ;;  %v10767_v25 = vld [vmem:[%s13664_s3 + $0xac] ss:$16 sps:$4 sm:$0xff]  }
 0x159   : > { %2999 = vmatprep.subr.bf16.mxu0 %v10655_v26  ;;  %3770 = vmatpush1.bf16.msra.mxu1 %v10686_v27  ;;  %v10732_v26 = vld [vmem:[%s13664_s3 + $0xa0] ss:$16 sps:$4 sm:$0xff]   ;;  %v10765_v27 = vld [vmem:[%s13664_s3 + $0xa8] ss:$16 sps:$4 sm:$0xff]  }
 0x15a   : > { %3771 = vmatprep.subr.bf16.mxu1 %v10691_v28  ;;  %v10737_v28 = vld [vmem:[%s13664_s3 + $0xc4] ss:$16 sps:$4 sm:$0xff]  }
 0x15c   : > { %3000 = vmatpush1.bf16.msra.mxu0 %v10653_v29  ;;  %v10773_v29 = vld [vmem:[%s13664_s3 + $0xcc] ss:$16 sps:$4 sm:$0xff]  }
 0x15d   : > { %3001 = vmatprep.subr.bf16.mxu0 %v10664_v30  ;;  %3772 = vmatpush1.bf16.msra.mxu1 %v10689_v31  ;;  %v10704_v30 = vld [vmem:[%s11343_s28 + $0xc0] ss:$28 sps:$4 sm:$0xff]  }
 0x15e   : > { %2859 = vmatmul.mubr.bf16.gmra.mrb[12].mxu0 %v10622_v32  ;;  %3631 = vmatmul.mubr.bf16.gmra.mrb[12].mxu1 %v10622_v32  ;;  %v10735_v31 = vld [vmem:[%s13664_s3 + $0xc0] ss:$16 sps:$4 sm:$0xff]   ;;  %v10771_v32 = vld [vmem:[%s13664_s3 + $0xc8] ss:$16 sps:$4 sm:$0xff]  }
 0x15f   : > { %2868 = vmatprep.mubr.bf16.mxu0 %v10623_v33  ;;  %3640 = vmatprep.mubr.bf16.mxu1 %v10623_v33  ;;  %v10740_v33 = vld [vmem:[%s13664_s3 + $0xe4] ss:$16 sps:$4 sm:$0xff]  }
 0x160   : > { %3002 = vmatpush1.bf16.msra.mxu0 %v10662_v34  ;;  %3773 = vmatprep.subr.bf16.mxu1 %v10697_v35  ;;  %v10776_v34 = vld [vmem:[%s13664_s3 + $0xec] ss:$16 sps:$4 sm:$0xff]   ;;  %v10738_v35 = vld [vmem:[%s13664_s3 + $0xe0] ss:$16 sps:$4 sm:$0xff]  }
 0x161   : > { %3003 = vmatprep.subr.bf16.mxu0 %v10685_v36  ;;  %3774 = vmatpush1.bf16.msra.mxu1 %v10695_v37  ;;  %v10774_v36 = vld [vmem:[%s13664_s3 + $0xe8] ss:$16 sps:$4 sm:$0xff]   ;;  %v10743_v37 = vld [vmem:[%s13664_s3 + $0x104] ss:$16 sps:$4 sm:$0xff]  }
 0x162   : > { %3775 = vmatprep.subr.bf16.mxu1 %v10700_v38  ;;  %v10782_v38 = vld [vmem:[%s13664_s3 + $0x10c] ss:$16 sps:$4 sm:$0xff]  }
 0x164   : > { %3004 = vmatpush1.bf16.msra.mxu0 %v10683_v39  ;;  %v10705_v39 = vld [vmem:[%s11343_s28 + $0xf8] ss:$28 sps:$4 sm:$0xff]  }
 0x165   : > { %3776 = vmatpush1.bf16.msra.mxu1 %v10698_v40  ;;  %4936 = vmatprep.subr.bf16.mxu0 %v10715_v57  ;;  %v10741_v40 = vld [vmem:[%s13664_s3 + $0x100] ss:$16 sps:$4 sm:$0xff]   ;;  %v10707_v57 = vld [vmem:[%s11343_s28 + $0x168] ss:$28 sps:$4 sm:$0xff]  }
 0x166   : > { %2869 = vmatmul.mubr.bf16.gmra.mrb[16].mxu0 %v10625_v41  ;;  %3641 = vmatmul.mubr.bf16.gmra.mrb[16].mxu1 %v10625_v41  ;;  %v10780_v41 = vld [vmem:[%s13664_s3 + $0x108] ss:$16 sps:$4 sm:$0xff]  }
 0x167   : > { %2878 = vmatprep.mubr.bf16.mxu0 %v10629_v42  ;;  %3650 = vmatprep.mubr.bf16.mxu1 %v10629_v42  ;;  %v10752_v42 = vld [vmem:[%s13664_s3 + $0x124] ss:$16 sps:$4 sm:$0xff]  }
 0x168   : > { %5322 = vmatprep.subr.bf16.mxu1 %v10746_v2  ;;  %v10708_v2 = vld [vmem:[%s11343_s28 + $0x1a0] ss:$28 sps:$4 sm:$0xff]  }
 0x16e   : > { %2879 = vmatmul.mubr.bf16.gmra.mrb[20].mxu0 %v10631_v43  ;;  %3651 = vmatmul.mubr.bf16.gmra.mrb[20].mxu1 %v10631_v43  ;;  %v10785_v43 = vld [vmem:[%s13664_s3 + $0x12c] ss:$16 sps:$4 sm:$0xff]  }
 0x16f   : > { %2888 = vmatprep.mubr.bf16.mxu0 %v10632_v44  ;;  %3660 = vmatprep.mubr.bf16.mxu1 %v10632_v44  ;;  %v10750_v44 = vld [vmem:[%s13664_s3 + $0x120] ss:$16 sps:$4 sm:$0xff]  }
 0x176   : > { %2889 = vmatmul.mubr.bf16.gmra.mrb[24].mxu0 %v10634_v45  ;;  %3661 = vmatmul.mubr.bf16.gmra.mrb[24].mxu1 %v10634_v45  ;;  %v10783_v45 = vld [vmem:[%s13664_s3 + $0x128] ss:$16 sps:$4 sm:$0xff]  }
 0x177   : > { %2898 = vmatprep.mubr.bf16.mxu0 %v10638_v46  ;;  %3670 = vmatprep.mubr.bf16.mxu1 %v10638_v46  ;;  %v10761_v46 = vld [vmem:[%s13664_s3 + $0x144] ss:$16 sps:$4 sm:$0xff]  }
 0x17e   : > { %2899 = vmatmul.mubr.bf16.gmra.mrb[28].mxu0 %v10640_v47  ;;  %3671 = vmatmul.mubr.bf16.gmra.mrb[28].mxu1 %v10640_v47  ;;  %v10791_v47 = vld [vmem:[%s13664_s3 + $0x14c] ss:$16 sps:$4 sm:$0xff]  }
 0x17f   : > { %2908 = vmatprep.mubr.bf16.mxu0 %v10641_v48  ;;  %3680 = vmatprep.mubr.bf16.mxu1 %v10641_v48  ;;  %v10706_v48 = vld [vmem:[%s11343_s28 + $0x130] ss:$28 sps:$4 sm:$0xff]  }
 0x186   : > { %2909 = vmatmul.mubr.bf16.gmra.mrb[32].mxu0 %v10643_v49  ;;  %3681 = vmatmul.mubr.bf16.gmra.mrb[32].mxu1 %v10643_v49  ;;  %v10759_v49 = vld [vmem:[%s13664_s3 + $0x140] ss:$16 sps:$4 sm:$0xff]  }
 0x187   : > { %2918 = vmatprep.mubr.bf16.mxu0 %v10647_v50  ;;  %3690 = vmatprep.mubr.bf16.mxu1 %v10647_v50  ;;  %v10789_v50 = vld [vmem:[%s13664_s3 + $0x148] ss:$16 sps:$4 sm:$0xff]  }
 0x18e   : > { %2919 = vmatmul.mubr.bf16.gmra.mrb[36].mxu0 %v10649_v51  ;;  %3691 = vmatmul.mubr.bf16.gmra.mrb[36].mxu1 %v10649_v51  ;;  %v10770_v51 = vld [vmem:[%s13664_s3 + $0x164] ss:$16 sps:$4 sm:$0xff]  }
 0x18f   : > { %2928 = vmatprep.mubr.bf16.mxu0 %v10650_v52  ;;  %3700 = vmatprep.mubr.bf16.mxu1 %v10650_v52  ;;  %v10794_v52 = vld [vmem:[%s13664_s3 + $0x16c] ss:$16 sps:$4 sm:$0xff]  }
 0x196   : > { %2929 = vmatmul.mubr.bf16.gmra.mrb[40].mxu0 %v10652_v53  ;;  %3701 = vmatmul.mubr.bf16.gmra.mrb[40].mxu1 %v10652_v53  ;;  %v10768_v53 = vld [vmem:[%s13664_s3 + $0x160] ss:$16 sps:$4 sm:$0xff]  }
 0x197   : > { %2938 = vmatprep.mubr.bf16.mxu0 %v10656_v54  ;;  %3710 = vmatprep.mubr.bf16.mxu1 %v10656_v54  ;;  %v10792_v54 = vld [vmem:[%s13664_s3 + $0x168] ss:$16 sps:$4 sm:$0xff]  }
 0x19e   : > { %2939 = vmatmul.mubr.bf16.gmra.mrb[44].mxu0 %v10658_v55  ;;  %3711 = vmatmul.mubr.bf16.gmra.mrb[44].mxu1 %v10658_v55  ;;  %v10779_v55 = vld [vmem:[%s13664_s3 + $0x184] ss:$16 sps:$4 sm:$0xff]  }
 0x19f   : > { %2948 = vmatprep.mubr.bf16.mxu0 %v10659_v56  ;;  %3720 = vmatprep.mubr.bf16.mxu1 %v10659_v56  ;;  %v10800_v56 = vld [vmem:[%s13664_s3 + $0x18c] ss:$16 sps:$4 sm:$0xff]  }
 0x1a6   : > { %2949 = vmatmul.mubr.bf16.gmra.mrb[48].mxu0 %v10661_v58  ;;  %3721 = vmatmul.mubr.bf16.gmra.mrb[48].mxu1 %v10661_v58  ;;  %v10777_v58 = vld [vmem:[%s13664_s3 + $0x180] ss:$16 sps:$4 sm:$0xff]  }
 0x1a7   : > { %2958 = vmatprep.mubr.bf16.mxu0 %v10671_v59  ;;  %3730 = vmatprep.mubr.bf16.mxu1 %v10671_v59  ;;  %v10798_v59 = vld [vmem:[%s13664_s3 + $0x188] ss:$16 sps:$4 sm:$0xff]  }
 0x1ae   : > { %2959 = vmatmul.mubr.bf16.gmra.mrb[52].mxu0 %v10673_v60  ;;  %3731 = vmatmul.mubr.bf16.gmra.mrb[52].mxu1 %v10673_v60  ;;  %v10788_v60 = vld [vmem:[%s13664_s3 + $0x1a4] ss:$16 sps:$4 sm:$0xff]  }
 0x1af   : > { %2968 = vmatprep.mubr.bf16.mxu0 %v10680_v61  ;;  %3740 = vmatprep.mubr.bf16.mxu1 %v10680_v61  ;;  %v10803_v61 = vld [vmem:[%s13664_s3 + $0x1ac] ss:$16 sps:$4 sm:$0xff]  }
 0x1b6   : > { %2969 = vmatmul.mubr.bf16.gmra.mrb[56].mxu0 %v10682_v62  ;;  %3741 = vmatmul.mubr.bf16.gmra.mrb[56].mxu1 %v10682_v62  ;;  %v10786_v62 = vld [vmem:[%s13664_s3 + $0x1a0] ss:$16 sps:$4 sm:$0xff]  }
 0x1b7   : > { %2978 = vmatprep.mubr.bf16.mxu0 %v10692_v63  ;;  %3750 = vmatprep.mubr.bf16.mxu1 %v10692_v63  ;;  %v10801_v63 = vld [vmem:[%s13664_s3 + $0x1a8] ss:$16 sps:$4 sm:$0xff]  }
 0x1be   : > { %2979 = vmatmul.mubr.bf16.gmra.mrb[60].mxu0 %v10694_v0  ;;  %3751 = vmatmul.mubr.bf16.gmra.mrb[60].mxu1 %v10694_v0  ;;  %v10797_v0 = vld [vmem:[%s13664_s3 + $0x1c4] ss:$16 sps:$4 sm:$0xff]  }
 0x1bf   : > { %3021 = vmatprep.mubr.bf16.mxu0 %v11141_v1  ;;  %3793 = vmatprep.mubr.bf16.mxu1 %v11141_v1 }
 0x1c6   : > { %3022 = vmatmul.mubr.bf16.vlgmr.msra.gmra.mrb[0].mxu0 %v10701_v3  ;;  %3794 = vmatmul.mubr.bf16.vlgmr.msra.gmra.mrb[0].mxu1 %v10701_v3  ;;  %v10795_v3 = vld [vmem:[%s13664_s3 + $0x1c0] ss:$16 sps:$4 sm:$0xff]  }
 0x1c7   : > { %3031 = vmatprep.mubr.bf16.mxu0 %v11141_v1  ;;  %3803 = vmatprep.mubr.bf16.mxu1 %v11141_v1 }
 0x1c8   : > { %4937 = vmatpush1.bf16.msra.mxu0 %v10713_v4  ;;  %5323 = vmatpush1.bf16.msra.mxu1 %v10744_v5  ;;  %v10709_v4 = vld [vmem:[%s11343_s28 + $0x1d8] ss:$28 sps:$4 sm:$0xff]   ;;  %v10710_v5 = vld [vmem:[%s11343_s28 + $0x210] ss:$28 sps:$4 sm:$0xff]  }
 0x1c9   : > { %4938 = vmatprep.subr.bf16.mxu0 %v10719_v6  ;;  %5324 = vmatprep.subr.bf16.mxu1 %v10749_v7  ;;  %v10711_v6 = vld [vmem:[%s11343_s28 + $0x248] ss:$28 sps:$4 sm:$0xff]   ;;  %v10712_v7 = vld [vmem:[%s11343_s28 + $0x280] ss:$28 sps:$4 sm:$0xff]  }
 0x1cc   : > { %4939 = vmatpush1.bf16.msra.mxu0 %v10717_v8  ;;  %5325 = vmatpush1.bf16.msra.mxu1 %v10747_v9  ;;  %v10809_v8 = vld [vmem:[%s13664_s3 + $0x1cc] ss:$16 sps:$4 sm:$0xff]   ;;  %v10807_v9 = vld [vmem:[%s13664_s3 + $0x1c8] ss:$16 sps:$4 sm:$0xff]  }
 0x1cd   : > { %4940 = vmatprep.subr.bf16.mxu0 %v10723_v10  ;;  %5326 = vmatprep.subr.bf16.mxu1 %v10755_v11  ;;  %v10806_v10 = vld [vmem:[%s13664_s3 + $0x1e4] ss:$16 sps:$4 sm:$0xff]   ;;  %v10812_v11 = vld [vmem:[%s13664_s3 + $0x1ec] ss:$16 sps:$4 sm:$0xff]  }
 0x1ce   : > { %3032 = vmatmul.mubr.bf16.gmra.mrb[4].mxu0 %v10702_v12  ;;  %3804 = vmatmul.mubr.bf16.gmra.mrb[4].mxu1 %v10702_v12  ;;  %v10804_v12 = vld [vmem:[%s13664_s3 + $0x1e0] ss:$16 sps:$4 sm:$0xff]  }
 0x1cf   : > { %3041 = vmatprep.mubr.bf16.mxu0 %v11141_v1  ;;  %3813 = vmatprep.mubr.bf16.mxu1 %v11141_v1 }
 0x1d0   : > { %4941 = vmatpush1.bf16.msra.mxu0 %v10721_v13  ;;  %5327 = vmatpush1.bf16.msra.mxu1 %v10753_v14  ;;  %v10810_v13 = vld [vmem:[%s13664_s3 + $0x1e8] ss:$16 sps:$4 sm:$0xff]  }
 0x1d1   : > { %4942 = vmatprep.subr.bf16.mxu0 %v10727_v15  ;;  %5328 = vmatprep.subr.bf16.mxu1 %v10758_v16  ;;  %v10716_v14 = vld [vmem:[%s11343_s28 + $0x2b8] ss:$28 sps:$4 sm:$0xff]   ;;  %v10720_v16 = vld [vmem:[%s11343_s28 + $0x2f0] ss:$28 sps:$4 sm:$0xff]  }
 0x1d2   : > { %v10815_v15 = vld [vmem:[%s13664_s3 + $0x204] ss:$16 sps:$4 sm:$0xff]  }
 0x1d4   : > { %4943 = vmatpush1.bf16.msra.mxu0 %v10725_v17  ;;  %5329 = vmatpush1.bf16.msra.mxu1 %v10756_v18  ;;  %v10724_v17 = vld [vmem:[%s11343_s28 + $0x328] ss:$28 sps:$4 sm:$0xff]   ;;  %v10728_v18 = vld [vmem:[%s11343_s28 + $0x360] ss:$28 sps:$4 sm:$0xff]  }
 0x1d5   : > { %4944 = vmatprep.subr.bf16.mxu0 %v10731_v19  ;;  %5330 = vmatprep.subr.bf16.mxu1 %v10764_v20  ;;  %v10842_v19 = vld [vmem:[%s13664_s3 + $0x20c] ss:$16 sps:$4 sm:$0xff]   ;;  %v694_v20 = vlaneseq }
 0x1d6   : > { %3042 = vmatmul.mubr.bf16.gmra.mrb[8].mxu0 %v10703_v21  ;;  %3814 = vmatmul.mubr.bf16.gmra.mrb[8].mxu1 %v10703_v21 }
 0x1d7   : > { %3051 = vmatprep.mubr.bf16.mxu0 %v11141_v1  ;;  %3823 = vmatprep.mubr.bf16.mxu1 %v11141_v1  ;;  %v695_v21 = vshrl.u32 %v694_v20, 7 }
 0x1d8   : > { %4945 = vmatpush1.bf16.msra.mxu0 %v10729_v22  ;;  %5331 = vmatpush1.bf16.msra.mxu1 %v10762_v23 }
 0x1d9   : > { %4946 = vmatprep.subr.bf16.mxu0 %v10734_v24  ;;  %5332 = vmatprep.subr.bf16.mxu1 %v10767_v25  ;;  %v12224_v22 = vsub.s32 0, %v695_v21  ;;  %v12226_v23 = vsub.s32 2, %v695_v21  ;;  %v692_v24 = vld [vmem:[%s13663_s2] sm:$0xf]  ;;  %v12231_v25 = vsub.s32 1, %v695_v21 }
 0x1dc   : > { %4947 = vmatpush1.bf16.msra.mxu0 %v10732_v26  ;;  %5333 = vmatpush1.bf16.msra.mxu1 %v10765_v27  ;;  %v12236_v26 = vrot.slane %v692_v24, %v12224_v22  ;;  %v12239_v27 = vrot.slane %v692_v24, %v12226_v23 }
 0x1dd   : > { %4948 = vmatprep.subr.bf16.mxu0 %v10737_v28  ;;  %5334 = vmatprep.subr.bf16.mxu1 %v10773_v29  ;;  %v12242_v28 = vrot.slane %v692_v24, %v12231_v25 }
 0x1de   : > { %3052 = vmatmul.mubr.bf16.gmra.mrb[12].mxu0 %v10704_v30  ;;  %3824 = vmatmul.mubr.bf16.gmra.mrb[12].mxu1 %v10704_v30 }
 0x1df   : > { %3061 = vmatprep.mubr.bf16.mxu0 %v11141_v1  ;;  %3833 = vmatprep.mubr.bf16.mxu1 %v11141_v1 }
 0x1e0   : > { %4949 = vmatpush1.bf16.msra.mxu0 %v10735_v31  ;;  %5335 = vmatpush1.bf16.msra.mxu1 %v10771_v32 }
 0x1e1   : > { %4950 = vmatprep.subr.bf16.mxu0 %v10740_v33  ;;  %5336 = vmatprep.subr.bf16.mxu1 %v10776_v34 }
 0x1e4   : > { %4951 = vmatpush1.bf16.msra.mxu0 %v10738_v35  ;;  %5337 = vmatpush1.bf16.msra.mxu1 %v10774_v36 }
 0x1e5   : > { %4952 = vmatprep.subr.bf16.mxu0 %v10743_v37  ;;  %5338 = vmatprep.subr.bf16.mxu1 %v10782_v38 }
 0x1e6   : > { %3062 = vmatmul.mubr.bf16.gmra.mrb[16].mxu0 %v10705_v39  ;;  %3834 = vmatmul.mubr.bf16.gmra.mrb[16].mxu1 %v10705_v39 }
 0x1e7   : > { %3071 = vmatprep.mubr.bf16.mxu0 %v11141_v1  ;;  %3843 = vmatprep.mubr.bf16.mxu1 %v11141_v1 }
 0x1e8   : > { %4953 = vmatpush1.bf16.msra.mxu0 %v10741_v40  ;;  %5339 = vmatpush1.bf16.msra.mxu1 %v10780_v41 }
 0x1e9   : > { %4954 = vmatprep.subr.bf16.mxu0 %v10752_v42  ;;  %5340 = vmatprep.subr.bf16.mxu1 %v10785_v43 }
 0x1ec   : > { %4955 = vmatpush1.bf16.msra.mxu0 %v10750_v44  ;;  %5341 = vmatpush1.bf16.msra.mxu1 %v10783_v45 }
 0x1ed   : > { %4956 = vmatprep.subr.bf16.mxu0 %v10761_v46  ;;  %5342 = vmatprep.subr.bf16.mxu1 %v10791_v47 }
 0x1ee   : > { %3072 = vmatmul.mubr.bf16.gmra.mrb[20].mxu0 %v10706_v48  ;;  %3844 = vmatmul.mubr.bf16.gmra.mrb[20].mxu1 %v10706_v48 }
 0x1ef   : > { %3081 = vmatprep.mubr.bf16.mxu0 %v11141_v1  ;;  %3853 = vmatprep.mubr.bf16.mxu1 %v11141_v1 }
 0x1f0   : > { %4957 = vmatpush1.bf16.msra.mxu0 %v10759_v49  ;;  %5343 = vmatpush1.bf16.msra.mxu1 %v10789_v50 }
 0x1f1   : > { %4958 = vmatprep.subr.bf16.mxu0 %v10770_v51  ;;  %5344 = vmatprep.subr.bf16.mxu1 %v10794_v52 }
 0x1f4   : > { %4959 = vmatpush1.bf16.msra.mxu0 %v10768_v53  ;;  %5345 = vmatpush1.bf16.msra.mxu1 %v10792_v54 }
 0x1f5   : > { %4960 = vmatprep.subr.bf16.mxu0 %v10779_v55  ;;  %5346 = vmatprep.subr.bf16.mxu1 %v10800_v56 }
 0x1f6   : > { %3082 = vmatmul.mubr.bf16.gmra.mrb[24].mxu0 %v10707_v57  ;;  %3854 = vmatmul.mubr.bf16.gmra.mrb[24].mxu1 %v10707_v57 }
 0x1f7   : > { %3091 = vmatprep.mubr.bf16.mxu0 %v11141_v1  ;;  %3863 = vmatprep.mubr.bf16.mxu1 %v11141_v1 }
 0x1f8   : > { %4961 = vmatpush1.bf16.msra.mxu0 %v10777_v58  ;;  %5347 = vmatpush1.bf16.msra.mxu1 %v10798_v59 }
 0x1f9   : > { %4962 = vmatprep.subr.bf16.mxu0 %v10788_v60  ;;  %5348 = vmatprep.subr.bf16.mxu1 %v10803_v61  ;;  %v10813_v60 = vld [vmem:[%s13664_s3 + $0x200] ss:$16 sps:$4 sm:$0xff]   ;;  %v10840_v61 = vld [vmem:[%s13664_s3 + $0x208] ss:$16 sps:$4 sm:$0xff]  }
 0x1fc   : > { %4963 = vmatpush1.bf16.msra.mxu0 %v10786_v62  ;;  %5349 = vmatpush1.bf16.msra.mxu1 %v10801_v63 }
 0x1fd   : > { %4964 = vmatprep.subr.bf16.mxu0 %v10797_v0  ;;  %5350 = vmatprep.subr.bf16.mxu1 %v10809_v8 }
 0x1fe   : > { %3092 = vmatmul.mubr.bf16.gmra.mrb[28].mxu0 %v10708_v2  ;;  %3864 = vmatmul.mubr.bf16.gmra.mrb[28].mxu1 %v10708_v2 }
 0x1ff   : > { %3101 = vmatprep.mubr.bf16.mxu0 %v11141_v1  ;;  %3873 = vmatprep.mubr.bf16.mxu1 %v11141_v1 }
 0x200   : > { %4965 = vmatpush1.bf16.msra.mxu0 %v10795_v3  ;;  %5351 = vmatpush1.bf16.msra.mxu1 %v10807_v9  ;;  %v10818_v3 = vld [vmem:[%s13664_s3 + $0x224] ss:$16 sps:$4 sm:$0xff]  }
 0x201   : > { %4966 = vmatprep.subr.bf16.mxu0 %v10806_v10  ;;  %5352 = vmatprep.subr.bf16.mxu1 %v10812_v11 }
 0x204   : > { %4967 = vmatpush1.bf16.msra.mxu0 %v10804_v12  ;;  %5353 = vmatpush1.bf16.msra.mxu1 %v10810_v13 }
 0x205   : > { %5129 = vmatprep.subr.bf16.mxu0 %v10815_v15  ;;  %5515 = vmatprep.subr.bf16.mxu1 %v10842_v19  ;;  %v10816_v15 = vld [vmem:[%s13664_s3 + $0x220] ss:$16 sps:$4 sm:$0xff]  }
 0x206   : > { %3102 = vmatmul.mubr.bf16.gmra.mrb[32].mxu0 %v10709_v4  ;;  %3874 = vmatmul.mubr.bf16.gmra.mrb[32].mxu1 %v10709_v4  ;;  %v10845_v4 = vld [vmem:[%s13664_s3 + $0x22c] ss:$16 sps:$4 sm:$0xff]  }
 0x207   : > { %3111 = vmatprep.mubr.bf16.mxu0 %v11141_v1  ;;  %3883 = vmatprep.mubr.bf16.mxu1 %v11141_v1 }
 0x20e   : > { %3112 = vmatmul.mubr.bf16.gmra.mrb[36].mxu0 %v10710_v5  ;;  %3884 = vmatmul.mubr.bf16.gmra.mrb[36].mxu1 %v10710_v5 }
 0x20f   : > { %3121 = vmatprep.mubr.bf16.mxu0 %v11141_v1  ;;  %3893 = vmatprep.mubr.bf16.mxu1 %v11141_v1 }
 0x216   : > { %3122 = vmatmul.mubr.bf16.gmra.mrb[40].mxu0 %v10711_v6  ;;  %3894 = vmatmul.mubr.bf16.gmra.mrb[40].mxu1 %v10711_v6 }
 0x217   : > { %3131 = vmatprep.mubr.bf16.mxu0 %v11141_v1  ;;  %3903 = vmatprep.mubr.bf16.mxu1 %v11141_v1 }
 0x21e   : > { %3132 = vmatmul.mubr.bf16.gmra.mrb[44].mxu0 %v10712_v7  ;;  %3904 = vmatmul.mubr.bf16.gmra.mrb[44].mxu1 %v10712_v7 }
 0x21f   : > { %3141 = vmatprep.mubr.bf16.mxu0 %v11141_v1  ;;  %3913 = vmatprep.mubr.bf16.mxu1 %v11141_v1 }
 0x226   : > { %3142 = vmatmul.mubr.bf16.gmra.mrb[48].mxu0 %v10716_v14  ;;  %3914 = vmatmul.mubr.bf16.gmra.mrb[48].mxu1 %v10716_v14 }
 0x227   : > { %3151 = vmatprep.mubr.bf16.mxu0 %v11141_v1  ;;  %3923 = vmatprep.mubr.bf16.mxu1 %v11141_v1 }
 0x22e   : > { %3152 = vmatmul.mubr.bf16.gmra.mrb[52].mxu0 %v10720_v16  ;;  %3924 = vmatmul.mubr.bf16.gmra.mrb[52].mxu1 %v10720_v16  ;;  %v10821_v16 = vld [vmem:[%s13664_s3 + $0x244] ss:$16 sps:$4 sm:$0xff]  }
 0x22f   : > { %3161 = vmatprep.mubr.bf16.mxu0 %v11141_v1  ;;  %3933 = vmatprep.mubr.bf16.mxu1 %v11141_v1 }
 0x236   : > { %3162 = vmatmul.mubr.bf16.gmra.mrb[56].mxu0 %v10724_v17  ;;  %3934 = vmatmul.mubr.bf16.gmra.mrb[56].mxu1 %v10724_v17  ;;  %v10843_v17 = vld [vmem:[%s13664_s3 + $0x228] ss:$16 sps:$4 sm:$0xff]  }
 0x237   : > { %3171 = vmatprep.mubr.bf16.mxu0 %v11141_v1  ;;  %3943 = vmatprep.mubr.bf16.mxu1 %v11141_v1  ;;  %v12233_v1 = vsub.s32 3, %v695_v21 }
 0x239   : > { %v12245_v29 = vrot.slane %v692_v24, %v12233_v1  ;;  %v10851_v24 = vld [vmem:[%s13664_s3 + $0x24c] ss:$16 sps:$4 sm:$0xff]  }
 0x23e   : > { %3172 = vmatmul.mubr.bf16.gmra.mrb[60].mxu0 %v10728_v18  ;;  %3944 = vmatmul.mubr.bf16.gmra.mrb[60].mxu1 %v10728_v18 }
 0x299   : > { %v3023_v30 = vpop.f32.mrb[0].mxu0  ;;  %v3795_v31 = vpop.f32.mrb[0].mxu1 }
 0x29a   : > { %v9187_v32 = vadd.f32 %v3023_v30, %v12236_v26  ;;  %v9251_v33 = vadd.f32 %v3795_v31, %v12239_v27  ;;  %v3025_v34 = vpop.f32.mrb[1].mxu0  ;;  %v3797_v35 = vpop.f32.mrb[1].mxu1 }
 0x29b   : > { %v9188_v36 = vadd.f32 %v3025_v34, %v12242_v28  ;;  %v9252_v37 = vadd.f32 %v3797_v35, %v12245_v29  ;;  %v3027_v38 = vpop.f32.mrb[2].mxu0  ;;  %v3799_v39 = vpop.f32.mrb[2].mxu1 }
 0x29c   : > { %v9189_v40 = vadd.f32 %v3027_v38, %v12236_v26  ;;  %v9253_v41 = vadd.f32 %v3799_v39, %v12239_v27  ;;  %v3029_v42 = vpop.f32.mrb[3].mxu0  ;;  %v3801_v43 = vpop.f32.mrb[3].mxu1  ;;  %v3954_v46 = vmax.f32 %v9187_v32, 0.0  ;;  %v3956_v47 = vmax.f32 %v9251_v33, 0.0 }
 0x29d   : > { %v9190_v44 = vadd.f32 %v3029_v42, %v12242_v28  ;;  %v9254_v45 = vadd.f32 %v3801_v43, %v12245_v29  ;;  %v3955_v50 = vmax.f32 %v9188_v36, 0.0  ;;  %v3957_v51 = vmax.f32 %v9252_v37, 0.0 }
 0x29e   : > { %v3958_v48 = vmax.f32 %v9189_v40, 0.0  ;;  %v3960_v49 = vmax.f32 %v9253_v41, 0.0  ;;  %v10819_v40 = vld [vmem:[%s13664_s3 + $0x240] ss:$16 sps:$4 sm:$0xff]   ;;  %v10849_v41 = vld [vmem:[%s13664_s3 + $0x248] ss:$16 sps:$4 sm:$0xff]  }
 0x29f   : > { %v3959_v52 = vmax.f32 %v9190_v44, 0.0  ;;  %v3961_v53 = vmax.f32 %v9254_v45, 0.0 }
 0x2a0   : > { %v4082_v54 = vpack.c.bf16 %v3958_v48, %v3954_v46  ;;  %v12255_v55 = vpack.c.bf16 %v3960_v49, %v3956_v47  ;;  %v10824_v46 = vld [vmem:[%s13664_s3 + $0x264] ss:$16 sps:$4 sm:$0xff]   ;;  %v10854_v47 = vld [vmem:[%s13664_s3 + $0x26c] ss:$16 sps:$4 sm:$0xff]  }
 0x2a1   : > { %v4083_v56 = vpack.c.bf16 %v3959_v52, %v3955_v50  ;;  %v12257_v57 = vpack.c.bf16 %v3961_v53, %v3957_v51  ;;  %v3033_v58 = vpop.f32.mrb[4].mxu0  ;;  %v3805_v59 = vpop.f32.mrb[4].mxu1 }
 0x2a2   : > { %v9191_v62 = vadd.f32 %v3033_v58, %v12236_v26  ;;  %v9255_v63 = vadd.f32 %v3805_v59, %v12239_v27  ;;  %v3035_v0 = vpop.f32.mrb[5].mxu0  ;;  %v3807_v2 = vpop.f32.mrb[5].mxu1 }
 0x2a3   : > { %v9192_v5 = vadd.f32 %v3035_v0, %v12242_v28  ;;  %v9256_v6 = vadd.f32 %v3807_v2, %v12245_v29  ;;  %v3037_v7 = vpop.f32.mrb[6].mxu0  ;;  %v3809_v8 = vpop.f32.mrb[6].mxu1  ;;  %4968 = vmatprep.mubr.bf16.mxu0 %v4083_v56  ;;  %5354 = vmatprep.mubr.bf16.mxu1 %v4083_v56 }
 0x2a4   : > { %v9193_v9 = vadd.f32 %v3037_v7, %v12236_v26  ;;  %v9257_v10 = vadd.f32 %v3809_v8, %v12239_v27  ;;  %v3039_v11 = vpop.f32.mrb[7].mxu0  ;;  %v3811_v12 = vpop.f32.mrb[7].mxu1  ;;  %4969 = vmatmul.mubr.bf16.vlgmr.msra.gmra.mrb[64].mxu0 %v4082_v54  ;;  %5355 = vmatmul.mubr.bf16.vlgmr.msra.gmra.mrb[64].mxu1 %v4082_v54  ;;  %v3962_v18 = vmax.f32 %v9191_v62, 0.0  ;;  %v3964_v19 = vmax.f32 %v9255_v63, 0.0  ;;  %v10852_v62 = vld [vmem:[%s13664_s3 + $0x268] ss:$16 sps:$4 sm:$0xff]  }
 0x2a5   : > { %v9194_v13 = vadd.f32 %v3039_v11, %v12242_v28  ;;  %v9258_v14 = vadd.f32 %v3811_v12, %v12245_v29  ;;  %5130 = vmatpush1.bf16.msra.mxu0 %v10813_v60  ;;  %5516 = vmatpush1.bf16.msra.mxu1 %v10840_v61  ;;  %v3963_v30 = vmax.f32 %v9192_v5, 0.0  ;;  %v3965_v31 = vmax.f32 %v9256_v6, 0.0  ;;  %v10822_v60 = vld [vmem:[%s13664_s3 + $0x260] ss:$16 sps:$4 sm:$0xff]   ;;  %v10827_v61 = vld [vmem:[%s13664_s3 + $0x284] ss:$16 sps:$4 sm:$0xff]  }
 0x2a6   : > { %v3966_v20 = vmax.f32 %v9193_v9, 0.0  ;;  %v3968_v21 = vmax.f32 %v9257_v10, 0.0  ;;  %5131 = vmatprep.subr.bf16.mxu0 %v10818_v3  ;;  %5517 = vmatprep.subr.bf16.mxu1 %v10845_v4  ;;  %v10860_v4 = vld [vmem:[%s13664_s3 + $0x28c] ss:$16 sps:$4 sm:$0xff]  }
 0x2a7   : > { %v3967_v32 = vmax.f32 %v9194_v13, 0.0  ;;  %v3969_v33 = vmax.f32 %v9258_v14, 0.0 }
 0x2a8   : > { %v4086_v34 = vpack.c.bf16 %v3966_v20, %v3962_v18  ;;  %v12291_v35 = vpack.c.bf16 %v3968_v21, %v3964_v19  ;;  %v10830_v21 = vld [vmem:[%s13664_s3 + $0x2a4] ss:$16 sps:$4 sm:$0xff]  }
 0x2a9   : > { %v4087_v36 = vpack.c.bf16 %v3967_v32, %v3963_v30  ;;  %v12293_v37 = vpack.c.bf16 %v3969_v33, %v3965_v31  ;;  %v3043_v38 = vpop.f32.mrb[8].mxu0  ;;  %v3815_v39 = vpop.f32.mrb[8].mxu1  ;;  %5132 = vmatpush1.bf16.msra.mxu0 %v10816_v15  ;;  %5518 = vmatpush1.bf16.msra.mxu1 %v10843_v17  ;;  %v10825_v15 = vld [vmem:[%s13664_s3 + $0x280] ss:$16 sps:$4 sm:$0xff]  }
 0x2aa   : > { %v9195_v42 = vadd.f32 %v3043_v38, %v12236_v26  ;;  %v9259_v43 = vadd.f32 %v3815_v39, %v12239_v27  ;;  %v3045_v44 = vpop.f32.mrb[9].mxu0  ;;  %v3817_v45 = vpop.f32.mrb[9].mxu1  ;;  %5133 = vmatprep.subr.bf16.mxu0 %v10821_v16  ;;  %5519 = vmatprep.subr.bf16.mxu1 %v10851_v24  ;;  %v10858_v16 = vld [vmem:[%s13664_s3 + $0x288] ss:$16 sps:$4 sm:$0xff]   ;;  %v10863_v24 = vld [vmem:[%s13664_s3 + $0x2ac] ss:$16 sps:$4 sm:$0xff]  }
 0x2ab   : > { %v9196_v48 = vadd.f32 %v3045_v44, %v12242_v28  ;;  %v9260_v49 = vadd.f32 %v3817_v45, %v12245_v29  ;;  %v3047_v50 = vpop.f32.mrb[10].mxu0  ;;  %v3819_v51 = vpop.f32.mrb[10].mxu1  ;;  %4978 = vmatprep.mubr.bf16.mxu0 %v4087_v36  ;;  %5364 = vmatprep.mubr.bf16.mxu1 %v4087_v36  ;;  %v10861_v44 = vld [vmem:[%s13664_s3 + $0x2a8] ss:$16 sps:$4 sm:$0xff]  }
 0x2ac   : > { %v9197_v52 = vadd.f32 %v3047_v50, %v12236_v26  ;;  %v9261_v53 = vadd.f32 %v3819_v51, %v12239_v27  ;;  %v3049_v54 = vpop.f32.mrb[11].mxu0  ;;  %v3821_v56 = vpop.f32.mrb[11].mxu1  ;;  %4979 = vmatmul.mubr.bf16.gmra.mrb[68].mxu0 %v4086_v34  ;;  %5365 = vmatmul.mubr.bf16.gmra.mrb[68].mxu1 %v4086_v34  ;;  %v3970_v63 = vmax.f32 %v9195_v42, 0.0  ;;  %v3972_v0 = vmax.f32 %v9259_v43, 0.0  ;;  %v10828_v42 = vld [vmem:[%s13664_s3 + $0x2a0] ss:$16 sps:$4 sm:$0xff]  }
 0x2ad   : > { %v9198_v58 = vadd.f32 %v3049_v54, %v12242_v28  ;;  %v9262_v59 = vadd.f32 %v3821_v56, %v12245_v29  ;;  %5134 = vmatpush1.bf16.msra.mxu0 %v10819_v40  ;;  %5520 = vmatpush1.bf16.msra.mxu1 %v10849_v41  ;;  %v3971_v5 = vmax.f32 %v9196_v48, 0.0  ;;  %v3973_v6 = vmax.f32 %v9260_v49, 0.0  ;;  %v10833_v43 = vld [vmem:[%s13664_s3 + $0x2c4] ss:$16 sps:$4 sm:$0xff]   ;;  %v10869_v49 = vld [vmem:[%s13664_s3 + $0x2cc] ss:$16 sps:$4 sm:$0xff]  }
 0x2ae   : > { %v3974_v2 = vmax.f32 %v9197_v52, 0.0  ;;  %v3976_v3 = vmax.f32 %v9261_v53, 0.0  ;;  %5135 = vmatprep.subr.bf16.mxu0 %v10824_v46  ;;  %5521 = vmatprep.subr.bf16.mxu1 %v10854_v47 }
 0x2af   : > { %v3975_v7 = vmax.f32 %v9198_v58, 0.0  ;;  %v3977_v8 = vmax.f32 %v9262_v59, 0.0 }
 0x2b0   : > { %v4090_v9 = vpack.c.bf16 %v3974_v2, %v3970_v63  ;;  %v12327_v10 = vpack.c.bf16 %v3976_v3, %v3972_v0  ;;  %v10867_v63 = vld [vmem:[%s13664_s3 + $0x2c8] ss:$16 sps:$4 sm:$0xff]  }
 0x2b1   : > { %v4091_v11 = vpack.c.bf16 %v3975_v7, %v3971_v5  ;;  %v12329_v12 = vpack.c.bf16 %v3977_v8, %v3973_v6  ;;  %v3053_v13 = vpop.f32.mrb[12].mxu0  ;;  %v3825_v14 = vpop.f32.mrb[12].mxu1  ;;  %5136 = vmatpush1.bf16.msra.mxu0 %v10822_v60  ;;  %5522 = vmatpush1.bf16.msra.mxu1 %v10852_v62  ;;  %v10831_v62 = vld [vmem:[%s13664_s3 + $0x2c0] ss:$16 sps:$4 sm:$0xff]   ;;  %v10836_v5 = vld [vmem:[%s13664_s3 + $0x2e4] ss:$16 sps:$4 sm:$0xff]  }
 0x2b2   : > { %v9199_v17 = vadd.f32 %v3053_v13, %v12236_v26  ;;  %v9263_v18 = vadd.f32 %v3825_v14, %v12239_v27  ;;  %v3055_v19 = vpop.f32.mrb[13].mxu0  ;;  %v3827_v20 = vpop.f32.mrb[13].mxu1  ;;  %5137 = vmatprep.subr.bf16.mxu0 %v10827_v61  ;;  %5523 = vmatprep.subr.bf16.mxu1 %v10860_v4  ;;  %v10872_v6 = vld [vmem:[%s13664_s3 + $0x2ec] ss:$16 sps:$4 sm:$0xff]  }
 0x2b3   : > { %v9200_v30 = vadd.f32 %v3055_v19, %v12242_v28  ;;  %v9264_v31 = vadd.f32 %v3827_v20, %v12245_v29  ;;  %v3057_v32 = vpop.f32.mrb[14].mxu0  ;;  %v3829_v33 = vpop.f32.mrb[14].mxu1  ;;  %4988 = vmatprep.mubr.bf16.mxu0 %v4091_v11  ;;  %5374 = vmatprep.mubr.bf16.mxu1 %v4091_v11  ;;  %v10834_v19 = vld [vmem:[%s13664_s3 + $0x2e0] ss:$16 sps:$4 sm:$0xff]   ;;  %v10839_v20 = vld [vmem:[%s13664_s3 + $0x304] ss:$16 sps:$4 sm:$0xff]  }
 0x2b4   : > { %v9201_v34 = vadd.f32 %v3057_v32, %v12236_v26  ;;  %v9265_v36 = vadd.f32 %v3829_v33, %v12239_v27  ;;  %v3059_v38 = vpop.f32.mrb[15].mxu0  ;;  %v3831_v39 = vpop.f32.mrb[15].mxu1  ;;  %4989 = vmatmul.mubr.bf16.gmra.mrb[72].mxu0 %v4090_v9  ;;  %5375 = vmatmul.mubr.bf16.gmra.mrb[72].mxu1 %v4090_v9  ;;  %v3978_v45 = vmax.f32 %v9199_v17, 0.0  ;;  %v3980_v46 = vmax.f32 %v9263_v18, 0.0  ;;  %v10878_v33 = vld [vmem:[%s13664_s3 + $0x30c] ss:$16 sps:$4 sm:$0xff]  }
 0x2b5   : > { %v9202_v40 = vadd.f32 %v3059_v38, %v12242_v28  ;;  %v9266_v41 = vadd.f32 %v3831_v39, %v12245_v29  ;;  %5138 = vmatpush1.bf16.msra.mxu0 %v10825_v15  ;;  %5524 = vmatpush1.bf16.msra.mxu1 %v10858_v16  ;;  %v3979_v50 = vmax.f32 %v9200_v30, 0.0  ;;  %v3981_v51 = vmax.f32 %v9264_v31, 0.0 }
 0x2b6   : > { %v3982_v47 = vmax.f32 %v9201_v34, 0.0  ;;  %v3984_v48 = vmax.f32 %v9265_v36, 0.0  ;;  %5139 = vmatprep.subr.bf16.mxu0 %v10830_v21  ;;  %5525 = vmatprep.subr.bf16.mxu1 %v10863_v24  ;;  %v10870_v21 = vld [vmem:[%s13664_s3 + $0x2e8] ss:$16 sps:$4 sm:$0xff]  }
 0x2b7   : > { %v3983_v52 = vmax.f32 %v9202_v40, 0.0  ;;  %v3985_v53 = vmax.f32 %v9266_v41, 0.0 }
 0x2b8   : > { %v4094_v54 = vpack.c.bf16 %v3982_v47, %v3978_v45  ;;  %v12363_v56 = vpack.c.bf16 %v3984_v48, %v3980_v46  ;;  %v10837_v46 = vld [vmem:[%s13664_s3 + $0x300] ss:$16 sps:$4 sm:$0xff]   ;;  %v10876_v47 = vld [vmem:[%s13664_s3 + $0x308] ss:$16 sps:$4 sm:$0xff]  }
 0x2b9   : > { %v4095_v58 = vpack.c.bf16 %v3983_v52, %v3979_v50  ;;  %v12365_v59 = vpack.c.bf16 %v3985_v53, %v3981_v51  ;;  %v3063_v60 = vpop.f32.mrb[16].mxu0  ;;  %v3835_v61 = vpop.f32.mrb[16].mxu1  ;;  %5140 = vmatpush1.bf16.msra.mxu0 %v10828_v42  ;;  %5526 = vmatpush1.bf16.msra.mxu1 %v10861_v44  ;;  %v10848_v52 = vld [vmem:[%s13664_s3 + $0x324] ss:$16 sps:$4 sm:$0xff]   ;;  %v10881_v53 = vld [vmem:[%s13664_s3 + $0x32c] ss:$16 sps:$4 sm:$0xff]  }
 0x2ba   : > { %v9203_v0 = vadd.f32 %v3063_v60, %v12236_v26  ;;  %v9267_v2 = vadd.f32 %v3835_v61, %v12239_v27  ;;  %v3065_v3 = vpop.f32.mrb[17].mxu0  ;;  %v3837_v4 = vpop.f32.mrb[17].mxu1  ;;  %5141 = vmatprep.subr.bf16.mxu0 %v10833_v43  ;;  %5527 = vmatprep.subr.bf16.mxu1 %v10869_v49 }
 0x2bb   : > { %v9204_v7 = vadd.f32 %v3065_v3, %v12242_v28  ;;  %v9268_v8 = vadd.f32 %v3837_v4, %v12245_v29  ;;  %v3067_v9 = vpop.f32.mrb[18].mxu0  ;;  %v3839_v11 = vpop.f32.mrb[18].mxu1  ;;  %4998 = vmatprep.mubr.bf16.mxu0 %v4095_v58  ;;  %5384 = vmatprep.mubr.bf16.mxu1 %v4095_v58 }
 0x2bc   : > { %v9205_v13 = vadd.f32 %v3067_v9, %v12236_v26  ;;  %v9269_v14 = vadd.f32 %v3839_v11, %v12239_v27  ;;  %v3069_v15 = vpop.f32.mrb[19].mxu0  ;;  %v3841_v16 = vpop.f32.mrb[19].mxu1  ;;  %4999 = vmatmul.mubr.bf16.gmra.mrb[76].mxu0 %v4094_v54  ;;  %5385 = vmatmul.mubr.bf16.gmra.mrb[76].mxu1 %v4094_v54  ;;  %v3986_v24 = vmax.f32 %v9203_v0, 0.0  ;;  %v3988_v30 = vmax.f32 %v9267_v2, 0.0 }
 0x2bd   : > { %v9206_v17 = vadd.f32 %v3069_v15, %v12242_v28  ;;  %v9270_v18 = vadd.f32 %v3841_v16, %v12245_v29  ;;  %5142 = vmatpush1.bf16.msra.mxu0 %v10831_v62  ;;  %5528 = vmatpush1.bf16.msra.mxu1 %v10867_v63  ;;  %v3987_v34 = vmax.f32 %v9204_v7, 0.0  ;;  %v3989_v36 = vmax.f32 %v9268_v8, 0.0  ;;  %v10879_v7 = vld [vmem:[%s13664_s3 + $0x328] ss:$16 sps:$4 sm:$0xff]  }
 0x2be   : > { %v3990_v31 = vmax.f32 %v9205_v13, 0.0  ;;  %v3992_v32 = vmax.f32 %v9269_v14, 0.0  ;;  %5143 = vmatprep.subr.bf16.mxu0 %v10836_v5  ;;  %5529 = vmatprep.subr.bf16.mxu1 %v10872_v6  ;;  %v10846_v5 = vld [vmem:[%s13664_s3 + $0x320] ss:$16 sps:$4 sm:$0xff]   ;;  %v10857_v6 = vld [vmem:[%s13664_s3 + $0x344] ss:$16 sps:$4 sm:$0xff]  }
 0x2bf   : > { %v3991_v38 = vmax.f32 %v9206_v17, 0.0  ;;  %v3993_v39 = vmax.f32 %v9270_v18, 0.0  ;;  %v10887_v14 = vld [vmem:[%s13664_s3 + $0x34c] ss:$16 sps:$4 sm:$0xff]  }
 0x2c0   : > { %v4098_v40 = vpack.c.bf16 %v3990_v31, %v3986_v24  ;;  %v12399_v41 = vpack.c.bf16 %v3992_v32, %v3988_v30  ;;  %v10855_v32 = vld [vmem:[%s13664_s3 + $0x340] ss:$16 sps:$4 sm:$0xff]  }
 0x2c1   : > { %v4099_v42 = vpack.c.bf16 %v3991_v38, %v3987_v34  ;;  %v12401_v43 = vpack.c.bf16 %v3993_v39, %v3989_v36  ;;  %v3073_v44 = vpop.f32.mrb[20].mxu0  ;;  %v3845_v45 = vpop.f32.mrb[20].mxu1  ;;  %5144 = vmatpush1.bf16.msra.mxu0 %v10834_v19  ;;  %5530 = vmatpush1.bf16.msra.mxu1 %v10870_v21 }
 0x2c2   : > { %v9207_v48 = vadd.f32 %v3073_v44, %v12236_v26  ;;  %v9271_v49 = vadd.f32 %v3845_v45, %v12239_v27  ;;  %v3075_v50 = vpop.f32.mrb[21].mxu0  ;;  %v3847_v51 = vpop.f32.mrb[21].mxu1  ;;  %5145 = vmatprep.subr.bf16.mxu0 %v10839_v20  ;;  %5531 = vmatprep.subr.bf16.mxu1 %v10878_v33  ;;  %v10885_v33 = vld [vmem:[%s13664_s3 + $0x348] ss:$16 sps:$4 sm:$0xff]  }
 0x2c3   : > { %v9208_v54 = vadd.f32 %v3075_v50, %v12242_v28  ;;  %v9272_v58 = vadd.f32 %v3847_v51, %v12245_v29  ;;  %v3077_v60 = vpop.f32.mrb[22].mxu0  ;;  %v3849_v61 = vpop.f32.mrb[22].mxu1  ;;  %5008 = vmatprep.mubr.bf16.mxu0 %v4099_v42  ;;  %5394 = vmatprep.mubr.bf16.mxu1 %v4099_v42  ;;  %v10890_v42 = vld [vmem:[%s13664_s3 + $0x36c] ss:$16 sps:$4 sm:$0xff]  }
 0x2c4   : > { %v9209_v62 = vadd.f32 %v3077_v60, %v12236_v26  ;;  %v9273_v63 = vadd.f32 %v3849_v61, %v12239_v27  ;;  %v3079_v0 = vpop.f32.mrb[23].mxu0  ;;  %v3851_v2 = vpop.f32.mrb[23].mxu1  ;;  %5009 = vmatmul.mubr.bf16.gmra.mrb[80].mxu0 %v4098_v40  ;;  %5395 = vmatmul.mubr.bf16.gmra.mrb[80].mxu1 %v4098_v40  ;;  %v3994_v8 = vmax.f32 %v9207_v48, 0.0  ;;  %v3996_v9 = vmax.f32 %v9271_v49, 0.0  ;;  %v10866_v40 = vld [vmem:[%s13664_s3 + $0x364] ss:$16 sps:$4 sm:$0xff]  }
 0x2c5   : > { %v9210_v3 = vadd.f32 %v3079_v0, %v12242_v28  ;;  %v9274_v4 = vadd.f32 %v3851_v2, %v12245_v29  ;;  %5146 = vmatpush1.bf16.msra.mxu0 %v10837_v46  ;;  %5532 = vmatpush1.bf16.msra.mxu1 %v10876_v47  ;;  %v3995_v15 = vmax.f32 %v9208_v54, 0.0  ;;  %v3997_v16 = vmax.f32 %v9272_v58, 0.0  ;;  %v10864_v54 = vld [vmem:[%s13664_s3 + $0x360] ss:$16 sps:$4 sm:$0xff]   ;;  %v10875_v58 = vld [vmem:[%s13664_s3 + $0x384] ss:$16 sps:$4 sm:$0xff]  }
 0x2c6   : > { %v3998_v11 = vmax.f32 %v9209_v62, 0.0  ;;  %v4000_v13 = vmax.f32 %v9273_v63, 0.0  ;;  %5147 = vmatprep.subr.bf16.mxu0 %v10848_v52  ;;  %5533 = vmatprep.subr.bf16.mxu1 %v10881_v53  ;;  %v10888_v60 = vld [vmem:[%s13664_s3 + $0x368] ss:$16 sps:$4 sm:$0xff]   ;;  %v10896_v2 = vld [vmem:[%s13664_s3 + $0x38c] ss:$16 sps:$4 sm:$0xff]  }
 0x2c7   : > { %v3999_v17 = vmax.f32 %v9210_v3, 0.0  ;;  %v4001_v18 = vmax.f32 %v9274_v4, 0.0 }
 0x2c8   : > { %v4102_v19 = vpack.c.bf16 %v3998_v11, %v3994_v8  ;;  %v12435_v20 = vpack.c.bf16 %v4000_v13, %v3996_v9 }
 0x2c9   : > { %v4103_v21 = vpack.c.bf16 %v3999_v17, %v3995_v15  ;;  %v12437_v24 = vpack.c.bf16 %v4001_v18, %v3997_v16  ;;  %v3083_v30 = vpop.f32.mrb[24].mxu0  ;;  %v3855_v31 = vpop.f32.mrb[24].mxu1  ;;  %5148 = vmatpush1.bf16.msra.mxu0 %v10846_v5  ;;  %5534 = vmatpush1.bf16.msra.mxu1 %v10879_v7  ;;  %v10873_v15 = vld [vmem:[%s13664_s3 + $0x380] ss:$16 sps:$4 sm:$0xff]   ;;  %v10894_v16 = vld [vmem:[%s13664_s3 + $0x388] ss:$16 sps:$4 sm:$0xff]  }
 0x2ca   : > { %v9211_v34 = vadd.f32 %v3083_v30, %v12236_v26  ;;  %v9275_v36 = vadd.f32 %v3855_v31, %v12239_v27  ;;  %v3085_v38 = vpop.f32.mrb[25].mxu0  ;;  %v3857_v39 = vpop.f32.mrb[25].mxu1  ;;  %5149 = vmatprep.subr.bf16.mxu0 %v10857_v6  ;;  %5535 = vmatprep.subr.bf16.mxu1 %v10887_v14  ;;  %v10884_v30 = vld [vmem:[%s13664_s3 + $0x3a4] ss:$16 sps:$4 sm:$0xff]   ;;  %v10899_v31 = vld [vmem:[%s13664_s3 + $0x3ac] ss:$16 sps:$4 sm:$0xff]  }
 0x2cb   : > { %v9212_v44 = vadd.f32 %v3085_v38, %v12242_v28  ;;  %v9276_v45 = vadd.f32 %v3857_v39, %v12245_v29  ;;  %v3087_v46 = vpop.f32.mrb[26].mxu0  ;;  %v3859_v47 = vpop.f32.mrb[26].mxu1  ;;  %5018 = vmatprep.mubr.bf16.mxu0 %v4103_v21  ;;  %5404 = vmatprep.mubr.bf16.mxu1 %v4103_v21 }
 0x2cc   : > { %v9213_v48 = vadd.f32 %v3087_v46, %v12236_v26  ;;  %v9277_v49 = vadd.f32 %v3859_v47, %v12239_v27  ;;  %v3089_v50 = vpop.f32.mrb[27].mxu0  ;;  %v3861_v51 = vpop.f32.mrb[27].mxu1  ;;  %5019 = vmatmul.mubr.bf16.gmra.mrb[84].mxu0 %v4102_v19  ;;  %5405 = vmatmul.mubr.bf16.gmra.mrb[84].mxu1 %v4102_v19  ;;  %v4002_v61 = vmax.f32 %v9211_v34, 0.0  ;;  %v4004_v62 = vmax.f32 %v9275_v36, 0.0  ;;  %v10882_v46 = vld [vmem:[%s13664_s3 + $0x3a0] ss:$16 sps:$4 sm:$0xff]  }
 0x2cd   : > { %v9214_v52 = vadd.f32 %v3089_v50, %v12242_v28  ;;  %v9278_v53 = vadd.f32 %v3861_v51, %v12245_v29  ;;  %5150 = vmatpush1.bf16.msra.mxu0 %v10855_v32  ;;  %5536 = vmatpush1.bf16.msra.mxu1 %v10885_v33  ;;  %v4003_v3 = vmax.f32 %v9212_v44, 0.0  ;;  %v4005_v4 = vmax.f32 %v9276_v45, 0.0  ;;  %v10893_v47 = vld [vmem:[%s13664_s3 + $0x3c4] ss:$16 sps:$4 sm:$0xff]  }
 0x2ce   : > { %v4006_v63 = vmax.f32 %v9213_v48, 0.0  ;;  %v4008_v0 = vmax.f32 %v9277_v49, 0.0  ;;  %5151 = vmatprep.subr.bf16.mxu0 %v10866_v40  ;;  %5537 = vmatprep.subr.bf16.mxu1 %v10890_v42  ;;  %v10897_v48 = vld [vmem:[%s13664_s3 + $0x3a8] ss:$16 sps:$4 sm:$0xff]  }
 0x2cf   : > { %v4007_v5 = vmax.f32 %v9214_v52, 0.0  ;;  %v4009_v6 = vmax.f32 %v9278_v53, 0.0  ;;  %v10905_v53 = vld [vmem:[%s13664_s3 + $0x3cc] ss:$16 sps:$4 sm:$0xff]  }
 0x2d0   : > { %v4106_v7 = vpack.c.bf16 %v4006_v63, %v4002_v61  ;;  %v12471_v8 = vpack.c.bf16 %v4008_v0, %v4004_v62 }
 0x2d1   : > { %v4107_v9 = vpack.c.bf16 %v4007_v5, %v4003_v3  ;;  %v12473_v11 = vpack.c.bf16 %v4009_v6, %v4005_v4  ;;  %v3093_v13 = vpop.f32.mrb[28].mxu0  ;;  %v3865_v14 = vpop.f32.mrb[28].mxu1  ;;  %5152 = vmatpush1.bf16.msra.mxu0 %v10864_v54  ;;  %5538 = vmatpush1.bf16.msra.mxu1 %v10888_v60  ;;  %v10891_v5 = vld [vmem:[%s13664_s3 + $0x3c0] ss:$16 sps:$4 sm:$0xff]   ;;  %v10903_v6 = vld [vmem:[%s13664_s3 + $0x3c8] ss:$16 sps:$4 sm:$0xff]  }
 0x2d2   : > { %v9215_v17 = vadd.f32 %v3093_v13, %v12236_v26  ;;  %v9279_v18 = vadd.f32 %v3865_v14, %v12239_v27  ;;  %v3095_v19 = vpop.f32.mrb[29].mxu0  ;;  %v3867_v21 = vpop.f32.mrb[29].mxu1  ;;  %5153 = vmatprep.subr.bf16.mxu0 %v10875_v58  ;;  %5539 = vmatprep.subr.bf16.mxu1 %v10896_v2 }
 0x2d3   : > { %v9216_v32 = vadd.f32 %v3095_v19, %v12242_v28  ;;  %v9280_v33 = vadd.f32 %v3867_v21, %v12245_v29  ;;  %v3097_v34 = vpop.f32.mrb[30].mxu0  ;;  %v3869_v36 = vpop.f32.mrb[30].mxu1  ;;  %5028 = vmatprep.mubr.bf16.mxu0 %v4107_v9  ;;  %5414 = vmatprep.mubr.bf16.mxu1 %v4107_v9 }
 0x2d4   : > { %v9217_v38 = vadd.f32 %v3097_v34, %v12236_v26  ;;  %v9281_v39 = vadd.f32 %v3869_v36, %v12239_v27  ;;  %v3099_v40 = vpop.f32.mrb[31].mxu0  ;;  %v3871_v42 = vpop.f32.mrb[31].mxu1  ;;  %5029 = vmatmul.mubr.bf16.gmra.mrb[88].mxu0 %v4106_v7  ;;  %5415 = vmatmul.mubr.bf16.gmra.mrb[88].mxu1 %v4106_v7  ;;  %v4010_v49 = vmax.f32 %v9215_v17, 0.0  ;;  %v4012_v50 = vmax.f32 %v9279_v18, 0.0 }
 0x2d5   : > { %v9218_v44 = vadd.f32 %v3099_v40, %v12242_v28  ;;  %v9282_v45 = vadd.f32 %v3871_v42, %v12245_v29  ;;  %5154 = vmatpush1.bf16.msra.mxu0 %v10873_v15  ;;  %5540 = vmatpush1.bf16.msra.mxu1 %v10894_v16  ;;  %v4011_v54 = vmax.f32 %v9216_v32, 0.0  ;;  %v4013_v58 = vmax.f32 %v9280_v33, 0.0  ;;  %v10902_v15 = vld [vmem:[%s13664_s3 + $0x3e4] ss:$16 sps:$4 sm:$0xff]   ;;  %v10908_v16 = vld [vmem:[%s13664_s3 + $0x3ec] ss:$16 sps:$4 sm:$0xff]  }
 0x2d6   : > { %v4014_v51 = vmax.f32 %v9217_v38, 0.0  ;;  %v4016_v52 = vmax.f32 %v9281_v39, 0.0  ;;  %5155 = vmatprep.subr.bf16.mxu0 %v10884_v30  ;;  %5541 = vmatprep.subr.bf16.mxu1 %v10899_v31  ;;  %v10900_v38 = vld [vmem:[%s13664_s3 + $0x3e0] ss:$16 sps:$4 sm:$0xff]   ;;  %v10906_v39 = vld [vmem:[%s13664_s3 + $0x3e8] ss:$16 sps:$4 sm:$0xff]  }
 0x2d7   : > { %v4015_v60 = vmax.f32 %v9218_v44, 0.0  ;;  %v4017_v61 = vmax.f32 %v9282_v45, 0.0 }
 0x2d8   : > { %v4110_v62 = vpack.c.bf16 %v4014_v51, %v4010_v49  ;;  %v12507_v63 = vpack.c.bf16 %v4016_v52, %v4012_v50 }
 0x2d9   : > { %v4111_v0 = vpack.c.bf16 %v4015_v60, %v4011_v54  ;;  %v12509_v2 = vpack.c.bf16 %v4017_v61, %v4013_v58  ;;  %v3103_v3 = vpop.f32.mrb[32].mxu0  ;;  %v3875_v4 = vpop.f32.mrb[32].mxu1  ;;  %5156 = vmatpush1.bf16.msra.mxu0 %v10882_v46  ;;  %5542 = vmatpush1.bf16.msra.mxu1 %v10897_v48 }
 0x2da   : > { %v9219_v7 = vadd.f32 %v3103_v3, %v12236_v26  ;;  %v9283_v9 = vadd.f32 %v3875_v4, %v12239_v27  ;;  %v3105_v13 = vpop.f32.mrb[33].mxu0  ;;  %v3877_v14 = vpop.f32.mrb[33].mxu1  ;;  %5157 = vmatprep.subr.bf16.mxu0 %v10893_v47  ;;  %5543 = vmatprep.subr.bf16.mxu1 %v10905_v53 }
 0x2db   : > { %v9220_v17 = vadd.f32 %v3105_v13, %v12242_v28  ;;  %v9284_v18 = vadd.f32 %v3877_v14, %v12245_v29  ;;  %v3107_v19 = vpop.f32.mrb[34].mxu0  ;;  %v3879_v21 = vpop.f32.mrb[34].mxu1  ;;  %5038 = vmatprep.mubr.bf16.mxu0 %v4111_v0  ;;  %5424 = vmatprep.mubr.bf16.mxu1 %v4111_v0 }
 0x2dc   : > { %v9221_v30 = vadd.f32 %v3107_v19, %v12236_v26  ;;  %v9285_v31 = vadd.f32 %v3879_v21, %v12239_v27  ;;  %v3109_v32 = vpop.f32.mrb[35].mxu0  ;;  %v3881_v33 = vpop.f32.mrb[35].mxu1  ;;  %5039 = vmatmul.mubr.bf16.gmra.mrb[92].mxu0 %v4110_v62  ;;  %5425 = vmatmul.mubr.bf16.gmra.mrb[92].mxu1 %v4110_v62  ;;  %v4018_v40 = vmax.f32 %v9219_v7, 0.0  ;;  %v4020_v42 = vmax.f32 %v9283_v9, 0.0 }
 0x2dd   : > { %v9222_v34 = vadd.f32 %v3109_v32, %v12242_v28  ;;  %v9286_v36 = vadd.f32 %v3881_v33, %v12245_v29  ;;  %5158 = vmatpush1.bf16.msra.mxu0 %v10891_v5  ;;  %5544 = vmatpush1.bf16.msra.mxu1 %v10903_v6  ;;  %v4019_v46 = vmax.f32 %v9220_v17, 0.0  ;;  %v4021_v47 = vmax.f32 %v9284_v18, 0.0 }
 0x2de   : > { %v4022_v44 = vmax.f32 %v9221_v30, 0.0  ;;  %v4024_v45 = vmax.f32 %v9285_v31, 0.0  ;;  %5159 = vmatprep.subr.bf16.mxu0 %v10902_v15  ;;  %5545 = vmatprep.subr.bf16.mxu1 %v10908_v16 }
 0x2df   : > { %v4023_v48 = vmax.f32 %v9222_v34, 0.0  ;;  %v4025_v49 = vmax.f32 %v9286_v36, 0.0 }
 0x2e0   : > { %v4114_v50 = vpack.c.bf16 %v4022_v44, %v4018_v40  ;;  %v12537_v51 = vpack.c.bf16 %v4024_v45, %v4020_v42 }
 0x2e1   : > { %v4115_v52 = vpack.c.bf16 %v4023_v48, %v4019_v46  ;;  %v12539_v53 = vpack.c.bf16 %v4025_v49, %v4021_v47  ;;  %v3113_v54 = vpop.f32.mrb[36].mxu0  ;;  %v3885_v58 = vpop.f32.mrb[36].mxu1  ;;  %5160 = vmatpush1.bf16.msra.mxu0 %v10900_v38  ;;  %5546 = vmatpush1.bf16.msra.mxu1 %v10906_v39 }
 0x2e2   : > { %v9223_v60 = vadd.f32 %v3113_v54, %v12236_v26  ;;  %v9287_v61 = vadd.f32 %v3885_v58, %v12239_v27  ;;  %v3115_v62 = vpop.f32.mrb[37].mxu0  ;;  %v3887_v0 = vpop.f32.mrb[37].mxu1 }
 0x2e3   : > { %v9224_v3 = vadd.f32 %v3115_v62, %v12242_v28  ;;  %v9288_v4 = vadd.f32 %v3887_v0, %v12245_v29  ;;  %v3117_v5 = vpop.f32.mrb[38].mxu0  ;;  %v3889_v6 = vpop.f32.mrb[38].mxu1  ;;  %5048 = vmatprep.mubr.bf16.mxu0 %v4115_v52  ;;  %5434 = vmatprep.mubr.bf16.mxu1 %v4115_v52 }
 0x2e4   : > { %v9225_v7 = vadd.f32 %v3117_v5, %v12236_v26  ;;  %v9289_v9 = vadd.f32 %v3889_v6, %v12239_v27  ;;  %v3119_v13 = vpop.f32.mrb[39].mxu0  ;;  %v3891_v14 = vpop.f32.mrb[39].mxu1  ;;  %5049 = vmatmul.mubr.bf16.gmra.mrb[96].mxu0 %v4114_v50  ;;  %5435 = vmatmul.mubr.bf16.gmra.mrb[96].mxu1 %v4114_v50  ;;  %v4026_v17 = vmax.f32 %v9223_v60, 0.0  ;;  %v4028_v18 = vmax.f32 %v9287_v61, 0.0 }
 0x2e5   : > { %v9226_v15 = vadd.f32 %v3119_v13, %v12242_v28  ;;  %v9290_v16 = vadd.f32 %v3891_v14, %v12245_v29  ;;  %v4027_v30 = vmax.f32 %v9224_v3, 0.0  ;;  %v4029_v31 = vmax.f32 %v9288_v4, 0.0 }
 0x2e6   : > { %v4030_v19 = vmax.f32 %v9225_v7, 0.0  ;;  %v4032_v21 = vmax.f32 %v9289_v9, 0.0 }
 0x2e7   : > { %v4031_v32 = vmax.f32 %v9226_v15, 0.0  ;;  %v4033_v33 = vmax.f32 %v9290_v16, 0.0 }
 0x2e8   : > { %v4118_v34 = vpack.c.bf16 %v4030_v19, %v4026_v17  ;;  %v12549_v36 = vpack.c.bf16 %v4032_v21, %v4028_v18 }
 0x2e9   : > { %v4119_v38 = vpack.c.bf16 %v4031_v32, %v4027_v30  ;;  %v12551_v39 = vpack.c.bf16 %v4033_v33, %v4029_v31  ;;  %v3123_v40 = vpop.f32.mrb[40].mxu0  ;;  %v3895_v42 = vpop.f32.mrb[40].mxu1 }
 0x2ea   : > { %v9227_v44 = vadd.f32 %v3123_v40, %v12236_v26  ;;  %v9291_v45 = vadd.f32 %v3895_v42, %v12239_v27  ;;  %v3125_v46 = vpop.f32.mrb[41].mxu0  ;;  %v3897_v47 = vpop.f32.mrb[41].mxu1 }
 0x2eb   : > { %v9228_v48 = vadd.f32 %v3125_v46, %v12242_v28  ;;  %v9292_v49 = vadd.f32 %v3897_v47, %v12245_v29  ;;  %v3127_v50 = vpop.f32.mrb[42].mxu0  ;;  %v3899_v52 = vpop.f32.mrb[42].mxu1  ;;  %5058 = vmatprep.mubr.bf16.mxu0 %v4119_v38  ;;  %5444 = vmatprep.mubr.bf16.mxu1 %v4119_v38 }
 0x2ec   : > { %v9229_v54 = vadd.f32 %v3127_v50, %v12236_v26  ;;  %v9293_v58 = vadd.f32 %v3899_v52, %v12239_v27  ;;  %v3129_v60 = vpop.f32.mrb[43].mxu0  ;;  %v3901_v61 = vpop.f32.mrb[43].mxu1  ;;  %5059 = vmatmul.mubr.bf16.gmra.mrb[100].mxu0 %v4118_v34  ;;  %5445 = vmatmul.mubr.bf16.gmra.mrb[100].mxu1 %v4118_v34  ;;  %v4034_v3 = vmax.f32 %v9227_v44, 0.0  ;;  %v4036_v4 = vmax.f32 %v9291_v45, 0.0 }
 0x2ed   : > { %v9230_v62 = vadd.f32 %v3129_v60, %v12242_v28  ;;  %v9294_v0 = vadd.f32 %v3901_v61, %v12245_v29  ;;  %v4035_v7 = vmax.f32 %v9228_v48, 0.0  ;;  %v4037_v9 = vmax.f32 %v9292_v49, 0.0 }
 0x2ee   : > { %v4038_v5 = vmax.f32 %v9229_v54, 0.0  ;;  %v4040_v6 = vmax.f32 %v9293_v58, 0.0 }
 0x2ef   : > { %v4039_v13 = vmax.f32 %v9230_v62, 0.0  ;;  %v4041_v14 = vmax.f32 %v9294_v0, 0.0 }
 0x2f0   : > { %v4122_v15 = vpack.c.bf16 %v4038_v5, %v4034_v3  ;;  %v12561_v16 = vpack.c.bf16 %v4040_v6, %v4036_v4 }
 0x2f1   : > { %v4123_v17 = vpack.c.bf16 %v4039_v13, %v4035_v7  ;;  %v12563_v18 = vpack.c.bf16 %v4041_v14, %v4037_v9  ;;  %v3133_v19 = vpop.f32.mrb[44].mxu0  ;;  %v3905_v21 = vpop.f32.mrb[44].mxu1 }
 0x2f2   : > { %v9231_v30 = vadd.f32 %v3133_v19, %v12236_v26  ;;  %v9295_v31 = vadd.f32 %v3905_v21, %v12239_v27  ;;  %v3135_v32 = vpop.f32.mrb[45].mxu0  ;;  %v3907_v33 = vpop.f32.mrb[45].mxu1 }
 0x2f3   : > { %v9232_v34 = vadd.f32 %v3135_v32, %v12242_v28  ;;  %v9296_v38 = vadd.f32 %v3907_v33, %v12245_v29  ;;  %v3137_v40 = vpop.f32.mrb[46].mxu0  ;;  %v3909_v42 = vpop.f32.mrb[46].mxu1  ;;  %5068 = vmatprep.mubr.bf16.mxu0 %v4123_v17  ;;  %5454 = vmatprep.mubr.bf16.mxu1 %v4123_v17 }
 0x2f4   : > { %v9233_v44 = vadd.f32 %v3137_v40, %v12236_v26  ;;  %v9297_v45 = vadd.f32 %v3909_v42, %v12239_v27  ;;  %v3139_v46 = vpop.f32.mrb[47].mxu0  ;;  %v3911_v47 = vpop.f32.mrb[47].mxu1  ;;  %5069 = vmatmul.mubr.bf16.gmra.mrb[104].mxu0 %v4122_v15  ;;  %5455 = vmatmul.mubr.bf16.gmra.mrb[104].mxu1 %v4122_v15  ;;  %v4042_v50 = vmax.f32 %v9231_v30, 0.0  ;;  %v4044_v52 = vmax.f32 %v9295_v31, 0.0 }
 0x2f5   : > { %v9234_v48 = vadd.f32 %v3139_v46, %v12242_v28  ;;  %v9298_v49 = vadd.f32 %v3911_v47, %v12245_v29  ;;  %v4043_v60 = vmax.f32 %v9232_v34, 0.0  ;;  %v4045_v61 = vmax.f32 %v9296_v38, 0.0 }
 0x2f6   : > { %v4046_v54 = vmax.f32 %v9233_v44, 0.0  ;;  %v4048_v58 = vmax.f32 %v9297_v45, 0.0  ;;  %v10911_v44 = vld [vmem:[%s13666_s5 + $0x4] ss:$16 sps:$4 sm:$0xff]  }
 0x2f7   : > { %v4047_v62 = vmax.f32 %v9234_v48, 0.0  ;;  %v4049_v0 = vmax.f32 %v9298_v49, 0.0  ;;  %6690 = vmatprep.subr.bf16.mxu0 %v10911_v44 }
 0x2f8   : > { %v4126_v3 = vpack.c.bf16 %v4046_v54, %v4042_v50  ;;  %v12573_v4 = vpack.c.bf16 %v4048_v58, %v4044_v52 }
 0x2f9   : > { %v4127_v5 = vpack.c.bf16 %v4047_v62, %v4043_v60  ;;  %v12575_v6 = vpack.c.bf16 %v4049_v0, %v4045_v61  ;;  %v3143_v7 = vpop.f32.mrb[48].mxu0  ;;  %v3915_v9 = vpop.f32.mrb[48].mxu1 }
 0x2fa   : > { %v9235_v13 = vadd.f32 %v3143_v7, %v12236_v26  ;;  %v9299_v14 = vadd.f32 %v3915_v9, %v12239_v27  ;;  %v3145_v15 = vpop.f32.mrb[49].mxu0  ;;  %v3917_v17 = vpop.f32.mrb[49].mxu1 }
 0x2fb   : > { %v9236_v19 = vadd.f32 %v3145_v15, %v12242_v28  ;;  %v9300_v21 = vadd.f32 %v3917_v17, %v12245_v29  ;;  %v3147_v30 = vpop.f32.mrb[50].mxu0  ;;  %v3919_v31 = vpop.f32.mrb[50].mxu1  ;;  %5078 = vmatprep.mubr.bf16.mxu0 %v4127_v5  ;;  %5464 = vmatprep.mubr.bf16.mxu1 %v4127_v5 }
 0x2fc   : > { %v9237_v32 = vadd.f32 %v3147_v30, %v12236_v26  ;;  %v9301_v33 = vadd.f32 %v3919_v31, %v12239_v27  ;;  %v3149_v34 = vpop.f32.mrb[51].mxu0  ;;  %v3921_v38 = vpop.f32.mrb[51].mxu1  ;;  %5079 = vmatmul.mubr.bf16.gmra.mrb[108].mxu0 %v4126_v3  ;;  %5465 = vmatmul.mubr.bf16.gmra.mrb[108].mxu1 %v4126_v3  ;;  %v4050_v45 = vmax.f32 %v9235_v13, 0.0  ;;  %v4052_v46 = vmax.f32 %v9299_v14, 0.0 }
 0x2fd   : > { %v9238_v40 = vadd.f32 %v3149_v34, %v12242_v28  ;;  %v9302_v42 = vadd.f32 %v3921_v38, %v12245_v29  ;;  %v4051_v49 = vmax.f32 %v9236_v19, 0.0  ;;  %v4053_v50 = vmax.f32 %v9300_v21, 0.0  ;;  %v10914_v38 = vld [vmem:[%s13666_s5 + $0xc] ss:$16 sps:$4 sm:$0xff]  }
 0x2fe   : > { %v4054_v47 = vmax.f32 %v9237_v32, 0.0  ;;  %v4056_v48 = vmax.f32 %v9301_v33, 0.0  ;;  %7076 = vmatprep.subr.bf16.mxu1 %v10914_v38 }
 0x2ff   : > { %v4055_v52 = vmax.f32 %v9238_v40, 0.0  ;;  %v4057_v54 = vmax.f32 %v9302_v42, 0.0 }
 0x300   : > { %v4130_v58 = vpack.c.bf16 %v4054_v47, %v4050_v45  ;;  %v12588_v60 = vpack.c.bf16 %v4056_v48, %v4052_v46 }
 0x301   : > { %v4131_v61 = vpack.c.bf16 %v4055_v52, %v4051_v49  ;;  %v12590_v62 = vpack.c.bf16 %v4057_v54, %v4053_v50  ;;  %v3153_v0 = vpop.f32.mrb[52].mxu0  ;;  %v3925_v3 = vpop.f32.mrb[52].mxu1 }
 0x302   : > { %v9239_v5 = vadd.f32 %v3153_v0, %v12236_v26  ;;  %v9303_v7 = vadd.f32 %v3925_v3, %v12239_v27  ;;  %v3155_v9 = vpop.f32.mrb[53].mxu0  ;;  %v3927_v13 = vpop.f32.mrb[53].mxu1 }
 0x303   : > { %v9240_v14 = vadd.f32 %v3155_v9, %v12242_v28  ;;  %v9304_v15 = vadd.f32 %v3927_v13, %v12245_v29  ;;  %v3157_v17 = vpop.f32.mrb[54].mxu0  ;;  %v3929_v19 = vpop.f32.mrb[54].mxu1  ;;  %5088 = vmatprep.mubr.bf16.mxu0 %v4131_v61  ;;  %5474 = vmatprep.mubr.bf16.mxu1 %v4131_v61 }
 0x304   : > { %v9241_v21 = vadd.f32 %v3157_v17, %v12236_v26  ;;  %v9305_v30 = vadd.f32 %v3929_v19, %v12239_v27  ;;  %v3159_v31 = vpop.f32.mrb[55].mxu0  ;;  %v3931_v32 = vpop.f32.mrb[55].mxu1  ;;  %5089 = vmatmul.mubr.bf16.gmra.mrb[112].mxu0 %v4130_v58  ;;  %5475 = vmatmul.mubr.bf16.gmra.mrb[112].mxu1 %v4130_v58  ;;  %v4058_v40 = vmax.f32 %v9239_v5, 0.0  ;;  %v4060_v42 = vmax.f32 %v9303_v7, 0.0 }
 0x305   : > { %v9242_v33 = vadd.f32 %v3159_v31, %v12242_v28  ;;  %v9306_v34 = vadd.f32 %v3931_v32, %v12245_v29  ;;  %v4059_v46 = vmax.f32 %v9240_v14, 0.0  ;;  %v4061_v47 = vmax.f32 %v9304_v15, 0.0 }
 0x306   : > { %v4062_v44 = vmax.f32 %v9241_v21, 0.0  ;;  %v4064_v45 = vmax.f32 %v9305_v30, 0.0 }
 0x307   : > { %v4063_v48 = vmax.f32 %v9242_v33, 0.0  ;;  %v4065_v49 = vmax.f32 %v9306_v34, 0.0 }
 0x308   : > { %v4134_v50 = vpack.c.bf16 %v4062_v44, %v4058_v40  ;;  %v12603_v52 = vpack.c.bf16 %v4064_v45, %v4060_v42 }
 0x309   : > { %v4135_v54 = vpack.c.bf16 %v4063_v48, %v4059_v46  ;;  %v12605_v58 = vpack.c.bf16 %v4065_v49, %v4061_v47  ;;  %v3163_v61 = vpop.f32.mrb[56].mxu0  ;;  %v3935_v0 = vpop.f32.mrb[56].mxu1 }
 0x30a   : > { %v9243_v3 = vadd.f32 %v3163_v61, %v12236_v26  ;;  %v9307_v5 = vadd.f32 %v3935_v0, %v12239_v27  ;;  %v3165_v7 = vpop.f32.mrb[57].mxu0  ;;  %v3937_v9 = vpop.f32.mrb[57].mxu1 }
 0x30b   : > { %v9244_v13 = vadd.f32 %v3165_v7, %v12242_v28  ;;  %v9308_v14 = vadd.f32 %v3937_v9, %v12245_v29  ;;  %v3167_v15 = vpop.f32.mrb[58].mxu0  ;;  %v3939_v17 = vpop.f32.mrb[58].mxu1  ;;  %5098 = vmatprep.mubr.bf16.mxu0 %v4135_v54  ;;  %5484 = vmatprep.mubr.bf16.mxu1 %v4135_v54 }
 0x30c   : > { %v9245_v19 = vadd.f32 %v3167_v15, %v12236_v26  ;;  %v9309_v21 = vadd.f32 %v3939_v17, %v12239_v27  ;;  %v3169_v30 = vpop.f32.mrb[59].mxu0  ;;  %v3941_v31 = vpop.f32.mrb[59].mxu1  ;;  %5099 = vmatmul.mubr.bf16.gmra.mrb[116].mxu0 %v4134_v50  ;;  %5485 = vmatmul.mubr.bf16.gmra.mrb[116].mxu1 %v4134_v50  ;;  %v4066_v34 = vmax.f32 %v9243_v3, 0.0  ;;  %v4068_v38 = vmax.f32 %v9307_v5, 0.0 }
 0x30d   : > { %v9246_v32 = vadd.f32 %v3169_v30, %v12242_v28  ;;  %v9310_v33 = vadd.f32 %v3941_v31, %v12245_v29  ;;  %v4067_v44 = vmax.f32 %v9244_v13, 0.0  ;;  %v4069_v45 = vmax.f32 %v9308_v14, 0.0 }
 0x30e   : > { %v4070_v40 = vmax.f32 %v9245_v19, 0.0  ;;  %v4072_v42 = vmax.f32 %v9309_v21, 0.0 }
 0x30f   : > { %v4071_v46 = vmax.f32 %v9246_v32, 0.0  ;;  %v4073_v47 = vmax.f32 %v9310_v33, 0.0 }
 0x310   : > { %v4138_v48 = vpack.c.bf16 %v4070_v40, %v4066_v34  ;;  %v12615_v49 = vpack.c.bf16 %v4072_v42, %v4068_v38 }
 0x311   : > { %v4139_v54 = vpack.c.bf16 %v4071_v46, %v4067_v44  ;;  %v12617_v61 = vpack.c.bf16 %v4073_v47, %v4069_v45  ;;  %v3173_v0 = vpop.f32.mrb[60].mxu0  ;;  %v3945_v50 = vpop.f32.mrb[60].mxu1 }
 0x312   : > { %v9247_v7 = vadd.f32 %v3173_v0, %v12236_v26  ;;  %v9311_v9 = vadd.f32 %v3945_v50, %v12239_v27  ;;  %v3175_v3 = vpop.f32.mrb[61].mxu0  ;;  %v3947_v5 = vpop.f32.mrb[61].mxu1  ;;  %v10920_v50 = vld [vmem:[%s13666_s5 + $0x2c] ss:$16 sps:$4 sm:$0xff]  }
 0x313   : > { %v9248_v15 = vadd.f32 %v3175_v3, %v12242_v28  ;;  %v9312_v13 = vadd.f32 %v3947_v5, %v12245_v29  ;;  %v3177_v14 = vpop.f32.mrb[62].mxu0  ;;  %v3949_v17 = vpop.f32.mrb[62].mxu1  ;;  %5108 = vmatprep.mubr.bf16.mxu0 %v4139_v54  ;;  %5494 = vmatprep.mubr.bf16.mxu1 %v4139_v54  ;;  %v10924_v3 = vld [vmem:[%s13666_s5 + $0x48] ss:$16 sps:$4 sm:$0xff]   ;;  %v10929_v5 = vld [vmem:[%s13666_s5 + $0x64] ss:$16 sps:$4 sm:$0xff]  }
 0x314   : > { %v9249_v19 = vadd.f32 %v3177_v14, %v12236_v26  ;;  %v9313_v21 = vadd.f32 %v3949_v17, %v12239_v27  ;;  %v3179_v30 = vpop.f32.mrb[63].mxu0  ;;  %v3951_v31 = vpop.f32.mrb[63].mxu1  ;;  %5109 = vmatmul.mubr.bf16.gmra.mrb[120].mxu0 %v4138_v48  ;;  %5495 = vmatmul.mubr.bf16.gmra.mrb[120].mxu1 %v4138_v48  ;;  %v4074_v34 = vmax.f32 %v9247_v7, 0.0  ;;  %v4076_v38 = vmax.f32 %v9311_v9, 0.0  ;;  %v10917_v48 = vld [vmem:[%s13666_s5 + $0x24] ss:$16 sps:$4 sm:$0xff]  }
 0x315   : > { %v9250_v32 = vadd.f32 %v3179_v30, %v12242_v28  ;;  %v9314_v33 = vadd.f32 %v3951_v31, %v12245_v29  ;;  %v4075_v44 = vmax.f32 %v9248_v15, 0.0  ;;  %v4077_v45 = vmax.f32 %v9312_v13, 0.0  ;;  %v10909_v28 = vld [vmem:[%s13666_s5] ss:$16 sps:$4 sm:$0xff]   ;;  %v10912_v29 = vld [vmem:[%s13666_s5 + $0x8] ss:$16 sps:$4 sm:$0xff]  }
 0x316   : > { %v4078_v40 = vmax.f32 %v9249_v19, 0.0  ;;  %v4080_v42 = vmax.f32 %v9313_v21, 0.0  ;;  %v10918_v7 = vld [vmem:[%s13666_s5 + $0x28] ss:$16 sps:$4 sm:$0xff]   ;;  %v10921_v9 = vld [vmem:[%s13666_s5 + $0x40] ss:$16 sps:$4 sm:$0xff]  }
 0x317   : > { %v4079_v46 = vmax.f32 %v9250_v32, 0.0  ;;  %v4081_v47 = vmax.f32 %v9314_v33, 0.0  ;;  %v10932_v15 = vld [vmem:[%s13666_s5 + $0x6c] ss:$16 sps:$4 sm:$0xff]   ;;  %v10927_v13 = vld [vmem:[%s13666_s5 + $0x60] ss:$16 sps:$4 sm:$0xff]  }
 0x318   : > { %v4142_v54 = vpack.c.bf16 %v4078_v40, %v4074_v34  ;;  %v12627_v26 = vpack.c.bf16 %v4080_v42, %v4076_v38  ;;  %v10930_v14 = vld [vmem:[%s13666_s5 + $0x68] ss:$16 sps:$4 sm:$0xff]   ;;  %v10933_v17 = vld [vmem:[%s13666_s5 + $0x80] ss:$16 sps:$4 sm:$0xff]   ;;  %v10941_v21 = vld [vmem:[%s13666_s5 + $0xa4] ss:$16 sps:$4 sm:$0xff]  }
 0x319   : > { %v4143_v27 = vpack.c.bf16 %v4079_v46, %v4075_v44  ;;  %v12629_v0 = vpack.c.bf16 %v4081_v47, %v4077_v45  ;;  %v10936_v19 = vld [vmem:[%s13666_s5 + $0x88] ss:$16 sps:$4 sm:$0xff]   ;;  %v10944_v30 = vld [vmem:[%s13666_s5 + $0xac] ss:$16 sps:$4 sm:$0xff]   ;;  %v10939_v31 = vld [vmem:[%s13666_s5 + $0xa0] ss:$16 sps:$4 sm:$0xff]  }
 0x31a   : > { %v10942_v32 = vld [vmem:[%s13666_s5 + $0xa8] ss:$16 sps:$4 sm:$0xff]   ;;  %v10945_v33 = vld [vmem:[%s13666_s5 + $0xc0] ss:$16 sps:$4 sm:$0xff]   ;;  %v10953_v38 = vld [vmem:[%s13666_s5 + $0xe4] ss:$16 sps:$4 sm:$0xff]  }
 0x31b   : > { %5118 = vmatprep.mubr.bf16.mxu0 %v4143_v27  ;;  %5504 = vmatprep.mubr.bf16.mxu1 %v4143_v27  ;;  %v10948_v34 = vld [vmem:[%s13666_s5 + $0xc8] ss:$16 sps:$4 sm:$0xff]   ;;  %v10956_v40 = vld [vmem:[%s13666_s5 + $0xec] ss:$16 sps:$4 sm:$0xff]   ;;  %v10951_v42 = vld [vmem:[%s13666_s5 + $0xe0] ss:$16 sps:$4 sm:$0xff]  }
 0x31c   : > { %5119 = vmatmul.mubr.bf16.gmra.mrb[124].mxu0 %v4142_v54  ;;  %5505 = vmatmul.mubr.bf16.gmra.mrb[124].mxu1 %v4142_v54  ;;  %v10954_v44 = vld [vmem:[%s13666_s5 + $0xe8] ss:$16 sps:$4 sm:$0xff]   ;;  %v10957_v45 = vld [vmem:[%s13666_s5 + $0x100] ss:$16 sps:$4 sm:$0xff]   ;;  %v10965_v47 = vld [vmem:[%s13666_s5 + $0x124] ss:$16 sps:$4 sm:$0xff]  }
 0x31d   : > { %5161 = vmatprep.mubr.bf16.mxu0 %v12257_v57  ;;  %5547 = vmatprep.mubr.bf16.mxu1 %v12257_v57  ;;  %v10915_v57 = vld [vmem:[%s13666_s5 + $0x20] ss:$16 sps:$4 sm:$0xff]   ;;  %v10960_v46 = vld [vmem:[%s13666_s5 + $0x108] ss:$16 sps:$4 sm:$0xff]   ;;  %v10968_v54 = vld [vmem:[%s13666_s5 + $0x12c] ss:$16 sps:$4 sm:$0xff]  }
 0x31e   : > { %v10963_v27 = vld [vmem:[%s13666_s5 + $0x120] ss:$16 sps:$4 sm:$0xff]  }
 0x324   : > { %5162 = vmatmul.mubr.bf16.vlgmr.msra.gmra.mrb[64].mxu0 %v12255_v55  ;;  %5548 = vmatmul.mubr.bf16.vlgmr.msra.gmra.mrb[64].mxu1 %v12255_v55  ;;  %v10923_v55 = vld [vmem:[%s13666_s5 + $0x44] ss:$16 sps:$4 sm:$0xff]  }
 0x325   : > { %5171 = vmatprep.mubr.bf16.mxu0 %v12293_v37  ;;  %5557 = vmatprep.mubr.bf16.mxu1 %v12293_v37  ;;  %v10926_v37 = vld [vmem:[%s13666_s5 + $0x4c] ss:$16 sps:$4 sm:$0xff]  }
 0x326   : > { %6691 = vmatpush1.bf16.msra.mxu0 %v10909_v28  ;;  %7077 = vmatpush1.bf16.msra.mxu1 %v10912_v29  ;;  %v10966_v28 = vld [vmem:[%s13666_s5 + $0x128] ss:$16 sps:$4 sm:$0xff]   ;;  %v10969_v29 = vld [vmem:[%s13666_s5 + $0x140] ss:$16 sps:$4 sm:$0xff]  }
 0x327   : > { %6692 = vmatprep.subr.bf16.mxu0 %v10917_v48  ;;  %7078 = vmatprep.subr.bf16.mxu1 %v10920_v50  ;;  %v10972_v48 = vld [vmem:[%s13666_s5 + $0x148] ss:$16 sps:$4 sm:$0xff]   ;;  %v10977_v50 = vld [vmem:[%s13666_s5 + $0x164] ss:$16 sps:$4 sm:$0xff]  }
 0x32a   : > { %6693 = vmatpush1.bf16.msra.mxu0 %v10915_v57  ;;  %7079 = vmatpush1.bf16.msra.mxu1 %v10918_v7  ;;  %v10980_v57 = vld [vmem:[%s13666_s5 + $0x16c] ss:$16 sps:$4 sm:$0xff]   ;;  %v10975_v7 = vld [vmem:[%s13666_s5 + $0x160] ss:$16 sps:$4 sm:$0xff]  }
 0x32b   : > { %6694 = vmatprep.subr.bf16.mxu0 %v10923_v55  ;;  %7080 = vmatprep.subr.bf16.mxu1 %v10926_v37  ;;  %v10978_v55 = vld [vmem:[%s13666_s5 + $0x168] ss:$16 sps:$4 sm:$0xff]   ;;  %v10981_v37 = vld [vmem:[%s13666_s5 + $0x180] ss:$16 sps:$4 sm:$0xff]  }
 0x32c   : > { %5172 = vmatmul.mubr.bf16.gmra.mrb[68].mxu0 %v12291_v35  ;;  %5558 = vmatmul.mubr.bf16.gmra.mrb[68].mxu1 %v12291_v35  ;;  %v10935_v35 = vld [vmem:[%s13666_s5 + $0x84] ss:$16 sps:$4 sm:$0xff]  }
 0x32d   : > { %5181 = vmatprep.mubr.bf16.mxu0 %v12329_v12  ;;  %5567 = vmatprep.mubr.bf16.mxu1 %v12329_v12  ;;  %v10938_v12 = vld [vmem:[%s13666_s5 + $0x8c] ss:$16 sps:$4 sm:$0xff]  }
 0x32e   : > { %6695 = vmatpush1.bf16.msra.mxu0 %v10921_v9  ;;  %7081 = vmatpush1.bf16.msra.mxu1 %v10924_v3  ;;  %v10984_v9 = vld [vmem:[%s13666_s5 + $0x188] ss:$16 sps:$4 sm:$0xff]   ;;  %v10989_v3 = vld [vmem:[%s13666_s5 + $0x1a4] ss:$16 sps:$4 sm:$0xff]  }
 0x32f   : > { %6696 = vmatprep.subr.bf16.mxu0 %v10929_v5  ;;  %7082 = vmatprep.subr.bf16.mxu1 %v10932_v15  ;;  %v10992_v5 = vld [vmem:[%s13666_s5 + $0x1ac] ss:$16 sps:$4 sm:$0xff]   ;;  %v10987_v15 = vld [vmem:[%s13666_s5 + $0x1a0] ss:$16 sps:$4 sm:$0xff]  }
 0x332   : > { %6697 = vmatpush1.bf16.msra.mxu0 %v10927_v13  ;;  %7083 = vmatpush1.bf16.msra.mxu1 %v10930_v14  ;;  %v10990_v13 = vld [vmem:[%s13666_s5 + $0x1a8] ss:$16 sps:$4 sm:$0xff]   ;;  %v10993_v14 = vld [vmem:[%s13666_s5 + $0x1c0] ss:$16 sps:$4 sm:$0xff]  }
 0x333   : > { %6698 = vmatprep.subr.bf16.mxu0 %v10935_v35  ;;  %7084 = vmatprep.subr.bf16.mxu1 %v10938_v12  ;;  %v10996_v35 = vld [vmem:[%s13666_s5 + $0x1c8] ss:$16 sps:$4 sm:$0xff]  }
 0x334   : > { %5182 = vmatmul.mubr.bf16.gmra.mrb[72].mxu0 %v12327_v10  ;;  %5568 = vmatmul.mubr.bf16.gmra.mrb[72].mxu1 %v12327_v10  ;;  %v10947_v10 = vld [vmem:[%s13666_s5 + $0xc4] ss:$16 sps:$4 sm:$0xff]  }
 0x335   : > { %5191 = vmatprep.mubr.bf16.mxu0 %v12365_v59  ;;  %5577 = vmatprep.mubr.bf16.mxu1 %v12365_v59  ;;  %v10950_v59 = vld [vmem:[%s13666_s5 + $0xcc] ss:$16 sps:$4 sm:$0xff]  }
 0x336   : > { %6699 = vmatpush1.bf16.msra.mxu0 %v10933_v17  ;;  %7085 = vmatpush1.bf16.msra.mxu1 %v10936_v19 }
 0x337   : > { %6700 = vmatprep.subr.bf16.mxu0 %v10941_v21  ;;  %7086 = vmatprep.subr.bf16.mxu1 %v10944_v30 }
 0x33a   : > { %6701 = vmatpush1.bf16.msra.mxu0 %v10939_v31  ;;  %7087 = vmatpush1.bf16.msra.mxu1 %v10942_v32 }
 0x33b   : > { %6702 = vmatprep.subr.bf16.mxu0 %v10947_v10  ;;  %7088 = vmatprep.subr.bf16.mxu1 %v10950_v59 }
 0x33c   : > { %5192 = vmatmul.mubr.bf16.gmra.mrb[76].mxu0 %v12363_v56  ;;  %5578 = vmatmul.mubr.bf16.gmra.mrb[76].mxu1 %v12363_v56  ;;  %v10959_v56 = vld [vmem:[%s13666_s5 + $0x104] ss:$16 sps:$4 sm:$0xff]  }
 0x33d   : > { %5201 = vmatprep.mubr.bf16.mxu0 %v12401_v43  ;;  %5587 = vmatprep.mubr.bf16.mxu1 %v12401_v43  ;;  %v10962_v43 = vld [vmem:[%s13666_s5 + $0x10c] ss:$16 sps:$4 sm:$0xff]  }
 0x33e   : > { %6703 = vmatpush1.bf16.msra.mxu0 %v10945_v33  ;;  %7089 = vmatpush1.bf16.msra.mxu1 %v10948_v34 }
 0x33f   : > { %6704 = vmatprep.subr.bf16.mxu0 %v10953_v38  ;;  %7090 = vmatprep.subr.bf16.mxu1 %v10956_v40 }
 0x342   : > { %6705 = vmatpush1.bf16.msra.mxu0 %v10951_v42  ;;  %7091 = vmatpush1.bf16.msra.mxu1 %v10954_v44 }
 0x343   : > { %6706 = vmatprep.subr.bf16.mxu0 %v10959_v56  ;;  %7092 = vmatprep.subr.bf16.mxu1 %v10962_v43 }
 0x344   : > { %5202 = vmatmul.mubr.bf16.gmra.mrb[80].mxu0 %v12399_v41  ;;  %5588 = vmatmul.mubr.bf16.gmra.mrb[80].mxu1 %v12399_v41  ;;  %v10971_v41 = vld [vmem:[%s13666_s5 + $0x144] ss:$16 sps:$4 sm:$0xff]  }
 0x345   : > { %5211 = vmatprep.mubr.bf16.mxu0 %v12437_v24  ;;  %5597 = vmatprep.mubr.bf16.mxu1 %v12437_v24  ;;  %v10974_v24 = vld [vmem:[%s13666_s5 + $0x14c] ss:$16 sps:$4 sm:$0xff]  }
 0x346   : > { %6707 = vmatpush1.bf16.msra.mxu0 %v10957_v45  ;;  %7093 = vmatpush1.bf16.msra.mxu1 %v10960_v46 }
 0x347   : > { %6708 = vmatprep.subr.bf16.mxu0 %v10965_v47  ;;  %7094 = vmatprep.subr.bf16.mxu1 %v10968_v54 }
 0x34a   : > { %6709 = vmatpush1.bf16.msra.mxu0 %v10963_v27  ;;  %7095 = vmatpush1.bf16.msra.mxu1 %v10966_v28 }
 0x34b   : > { %6710 = vmatprep.subr.bf16.mxu0 %v10971_v41  ;;  %7096 = vmatprep.subr.bf16.mxu1 %v10974_v24  ;;  %v11005_v24 = vld [vmem:[%s13666_s5 + $0x200] ss:$16 sps:$4 sm:$0xff]  }
 0x34c   : > { %5212 = vmatmul.mubr.bf16.gmra.mrb[84].mxu0 %v12435_v20  ;;  %5598 = vmatmul.mubr.bf16.gmra.mrb[84].mxu1 %v12435_v20  ;;  %v10983_v20 = vld [vmem:[%s13666_s5 + $0x184] ss:$16 sps:$4 sm:$0xff]  }
 0x34d   : > { %5221 = vmatprep.mubr.bf16.mxu0 %v12473_v11  ;;  %5607 = vmatprep.mubr.bf16.mxu1 %v12473_v11  ;;  %v10986_v11 = vld [vmem:[%s13666_s5 + $0x18c] ss:$16 sps:$4 sm:$0xff]  }
 0x34e   : > { %6711 = vmatpush1.bf16.msra.mxu0 %v10969_v29  ;;  %7097 = vmatpush1.bf16.msra.mxu1 %v10972_v48  ;;  %v11008_v29 = vld [vmem:[%s13666_s5 + $0x208] ss:$16 sps:$4 sm:$0xff]  }
 0x34f   : > { %6712 = vmatprep.subr.bf16.mxu0 %v10977_v50  ;;  %7098 = vmatprep.subr.bf16.mxu1 %v10980_v57 }
 0x352   : > { %6713 = vmatpush1.bf16.msra.mxu0 %v10975_v7  ;;  %7099 = vmatpush1.bf16.msra.mxu1 %v10978_v55  ;;  %v11013_v55 = vld [vmem:[%s13666_s5 + $0x224] ss:$16 sps:$4 sm:$0xff]  }
 0x353   : > { %6714 = vmatprep.subr.bf16.mxu0 %v10983_v20  ;;  %7100 = vmatprep.subr.bf16.mxu1 %v10986_v11  ;;  %v11016_v20 = vld [vmem:[%s13666_s5 + $0x22c] ss:$16 sps:$4 sm:$0xff]  }
 0x354   : > { %5222 = vmatmul.mubr.bf16.gmra.mrb[88].mxu0 %v12471_v8  ;;  %5608 = vmatmul.mubr.bf16.gmra.mrb[88].mxu1 %v12471_v8  ;;  %v10995_v8 = vld [vmem:[%s13666_s5 + $0x1c4] ss:$16 sps:$4 sm:$0xff]  }
 0x355   : > { %5231 = vmatprep.mubr.bf16.mxu0 %v12509_v2  ;;  %5617 = vmatprep.mubr.bf16.mxu1 %v12509_v2  ;;  %v10998_v2 = vld [vmem:[%s13666_s5 + $0x1cc] ss:$16 sps:$4 sm:$0xff]  }
 0x356   : > { %6715 = vmatpush1.bf16.msra.mxu0 %v10981_v37  ;;  %7101 = vmatpush1.bf16.msra.mxu1 %v10984_v9 }
 0x357   : > { %6716 = vmatprep.subr.bf16.mxu0 %v10989_v3  ;;  %7102 = vmatprep.subr.bf16.mxu1 %v10992_v5 }
 0x35a   : > { %6717 = vmatpush1.bf16.msra.mxu0 %v10987_v15  ;;  %7103 = vmatpush1.bf16.msra.mxu1 %v10990_v13 }
 0x35b   : > { %6718 = vmatprep.subr.bf16.mxu0 %v10995_v8  ;;  %7104 = vmatprep.subr.bf16.mxu1 %v10998_v2 }
 0x35c   : > { %5232 = vmatmul.mubr.bf16.gmra.mrb[92].mxu0 %v12507_v63  ;;  %5618 = vmatmul.mubr.bf16.gmra.mrb[92].mxu1 %v12507_v63  ;;  %v11001_v63 = vld [vmem:[%s13666_s5 + $0x1e4] ss:$16 sps:$4 sm:$0xff]  }
 0x35d   : > { %5241 = vmatprep.mubr.bf16.mxu0 %v12539_v53  ;;  %5627 = vmatprep.mubr.bf16.mxu1 %v12539_v53  ;;  %v10999_v53 = vld [vmem:[%s13666_s5 + $0x1e0] ss:$16 sps:$4 sm:$0xff]  }
 0x35e   : > { %6719 = vmatpush1.bf16.msra.mxu0 %v10993_v14  ;;  %7105 = vmatpush1.bf16.msra.mxu1 %v10996_v35  ;;  %v11011_v35 = vld [vmem:[%s13666_s5 + $0x220] ss:$16 sps:$4 sm:$0xff]  }
 0x35f   : > { %6720 = vmatprep.subr.bf16.mxu0 %v11001_v63  ;;  %v11014_v63 = vld [vmem:[%s13666_s5 + $0x228] ss:$16 sps:$4 sm:$0xff]  }
 0x362   : > { %6721 = vmatpush1.bf16.msra.mxu0 %v10999_v53 }
 0x364   : > { %5242 = vmatmul.mubr.bf16.gmra.mrb[96].mxu0 %v12537_v51  ;;  %5628 = vmatmul.mubr.bf16.gmra.mrb[96].mxu1 %v12537_v51  ;;  %v11004_v51 = vld [vmem:[%s13666_s5 + $0x1ec] ss:$16 sps:$4 sm:$0xff]  }
 0x365   : > { %5251 = vmatprep.mubr.bf16.mxu0 %v12551_v39  ;;  %5637 = vmatprep.mubr.bf16.mxu1 %v12551_v39  ;;  %v11007_v39 = vld [vmem:[%s13666_s5 + $0x204] ss:$16 sps:$4 sm:$0xff]  }
 0x366   : > { %7106 = vmatprep.subr.bf16.mxu1 %v11004_v51  ;;  %6883 = vmatprep.subr.bf16.mxu0 %v11007_v39  ;;  %v11019_v51 = vld [vmem:[%s13666_s5 + $0x244] ss:$16 sps:$4 sm:$0xff]  }
 0x36c   : > { %5252 = vmatmul.mubr.bf16.gmra.mrb[100].mxu0 %v12549_v36  ;;  %5638 = vmatmul.mubr.bf16.gmra.mrb[100].mxu1 %v12549_v36  ;;  %v11002_v36 = vld [vmem:[%s13666_s5 + $0x1e8] ss:$16 sps:$4 sm:$0xff]  }
 0x36d   : > { %5261 = vmatprep.mubr.bf16.mxu0 %v12563_v18  ;;  %5647 = vmatprep.mubr.bf16.mxu1 %v12563_v18  ;;  %v4274_v18 = vld [vmem:[%s13665_s4] sm:$0xf] }
 0x36e   : > { %7107 = vmatpush1.bf16.msra.mxu1 %v11002_v36 }
 0x374   : > { %5262 = vmatmul.mubr.bf16.gmra.mrb[104].mxu0 %v12561_v16  ;;  %5648 = vmatmul.mubr.bf16.gmra.mrb[104].mxu1 %v12561_v16  ;;  %v11010_v16 = vld [vmem:[%s13666_s5 + $0x20c] ss:$16 sps:$4 sm:$0xff]  }
 0x375   : > { %5271 = vmatprep.mubr.bf16.mxu0 %v12575_v6  ;;  %5657 = vmatprep.mubr.bf16.mxu1 %v12575_v6  ;;  %v12894_v6 = vrot.slane %v4274_v18, %v12226_v23 }
 0x376   : > { %7269 = vmatprep.subr.bf16.mxu1 %v11010_v16 }
 0x37c   : > { %5272 = vmatmul.mubr.bf16.gmra.mrb[108].mxu0 %v12573_v4  ;;  %5658 = vmatmul.mubr.bf16.gmra.mrb[108].mxu1 %v12573_v4  ;;  %v12891_v4 = vrot.slane %v4274_v18, %v12224_v22 }
 0x37d   : > { %5281 = vmatprep.mubr.bf16.mxu0 %v12590_v62  ;;  %5667 = vmatprep.mubr.bf16.mxu1 %v12590_v62  ;;  %v12900_v62 = vrot.slane %v4274_v18, %v12233_v1 }
 0x384   : > { %5282 = vmatmul.mubr.bf16.gmra.mrb[112].mxu0 %v12588_v60  ;;  %5668 = vmatmul.mubr.bf16.gmra.mrb[112].mxu1 %v12588_v60  ;;  %v12897_v60 = vrot.slane %v4274_v18, %v12231_v25  ;;  %v11022_v18 = vld [vmem:[%s13666_s5 + $0x24c] ss:$16 sps:$4 sm:$0xff]  }
 0x385   : > { %5291 = vmatprep.mubr.bf16.mxu0 %v12605_v58  ;;  %5677 = vmatprep.mubr.bf16.mxu1 %v12605_v58 }
 0x38c   : > { %5292 = vmatmul.mubr.bf16.gmra.mrb[116].mxu0 %v12603_v52  ;;  %5678 = vmatmul.mubr.bf16.gmra.mrb[116].mxu1 %v12603_v52 }
 0x38d   : > { %5301 = vmatprep.mubr.bf16.mxu0 %v12617_v61  ;;  %5687 = vmatprep.mubr.bf16.mxu1 %v12617_v61 }
 0x394   : > { %5302 = vmatmul.mubr.bf16.gmra.mrb[120].mxu0 %v12615_v49  ;;  %5688 = vmatmul.mubr.bf16.gmra.mrb[120].mxu1 %v12615_v49 }
 0x395   : > { %5311 = vmatprep.mubr.bf16.mxu0 %v12629_v0  ;;  %5697 = vmatprep.mubr.bf16.mxu1 %v12629_v0 }
 0x39c   : > { %5312 = vmatmul.mubr.bf16.gmra.mrb[124].mxu0 %v12627_v26  ;;  %5698 = vmatmul.mubr.bf16.gmra.mrb[124].mxu1 %v12627_v26 }
 0x3f7   : > { %v5163_v52 = vpop.f32.mrb[64].mxu0  ;;  %v5549_v58 = vpop.f32.mrb[64].mxu1 }
 0x3f8   : > { %v9315_v49 = vadd.f32 %v5163_v52, %v12891_v4  ;;  %v9379_v61 = vadd.f32 %v5549_v58, %v12894_v6  ;;  %v5165_v26 = vpop.f32.mrb[65].mxu0  ;;  %v5551_v0 = vpop.f32.mrb[65].mxu1 }
 0x3f9   : > { %v9316_v12 = vadd.f32 %v5165_v26, %v12897_v60  ;;  %v9380_v17 = vadd.f32 %v5551_v0, %v12900_v62  ;;  %v5167_v19 = vpop.f32.mrb[66].mxu0  ;;  %v5553_v21 = vpop.f32.mrb[66].mxu1 }
 0x3fa   : > { %v9317_v30 = vadd.f32 %v5167_v19, %v12891_v4  ;;  %v9381_v31 = vadd.f32 %v5553_v21, %v12894_v6  ;;  %v5169_v32 = vpop.f32.mrb[67].mxu0  ;;  %v5555_v10 = vpop.f32.mrb[67].mxu1  ;;  %v5708_v34 = vmax.f32 %v9315_v49, 0.0  ;;  %v5710_v38 = vmax.f32 %v9379_v61, 0.0 }
 0x3fb   : > { %v9318_v59 = vadd.f32 %v5169_v32, %v12897_v60  ;;  %v9382_v33 = vadd.f32 %v5555_v10, %v12900_v62  ;;  %v5709_v44 = vmax.f32 %v9316_v12, 0.0  ;;  %v5711_v56 = vmax.f32 %v9380_v17, 0.0 }
 0x3fc   : > { %v5712_v40 = vmax.f32 %v9317_v30, 0.0  ;;  %v5714_v42 = vmax.f32 %v9381_v31, 0.0  ;;  %v11017_v30 = vld [vmem:[%s13666_s5 + $0x240] ss:$16 sps:$4 sm:$0xff]   ;;  %v11020_v31 = vld [vmem:[%s13666_s5 + $0x248] ss:$16 sps:$4 sm:$0xff]  }
 0x3fd   : > { %v5713_v43 = vmax.f32 %v9318_v59, 0.0  ;;  %v5715_v45 = vmax.f32 %v9382_v33, 0.0 }
 0x3fe   : > { %v5836_v46 = vpack.c.bf16 %v5712_v40, %v5708_v34  ;;  %v12910_v47 = vpack.c.bf16 %v5714_v42, %v5710_v38  ;;  %v11025_v34 = vld [vmem:[%s13666_s5 + $0x264] ss:$16 sps:$4 sm:$0xff]   ;;  %v11028_v38 = vld [vmem:[%s13666_s5 + $0x26c] ss:$16 sps:$4 sm:$0xff]  }
 0x3ff   : > { %v5837_v54 = vpack.c.bf16 %v5713_v43, %v5709_v44  ;;  %v12912_v27 = vpack.c.bf16 %v5715_v45, %v5711_v56  ;;  %v5173_v28 = vpop.f32.mrb[68].mxu0  ;;  %v5559_v41 = vpop.f32.mrb[68].mxu1 }
 0x400   : > { %v9319_v48 = vadd.f32 %v5173_v28, %v12891_v4  ;;  %v9383_v50 = vadd.f32 %v5559_v41, %v12894_v6  ;;  %v5175_v57 = vpop.f32.mrb[69].mxu0  ;;  %v5561_v7 = vpop.f32.mrb[69].mxu1 }
 0x401   : > { %v9320_v11 = vadd.f32 %v5175_v57, %v12897_v60  ;;  %v9384_v37 = vadd.f32 %v5561_v7, %v12900_v62  ;;  %v5177_v9 = vpop.f32.mrb[70].mxu0  ;;  %v5563_v3 = vpop.f32.mrb[70].mxu1  ;;  %6722 = vmatprep.mubr.bf16.mxu0 %v5837_v54  ;;  %7108 = vmatprep.mubr.bf16.mxu1 %v5837_v54 }
 0x402   : > { %v9321_v5 = vadd.f32 %v5177_v9, %v12891_v4  ;;  %v9385_v15 = vadd.f32 %v5563_v3, %v12894_v6  ;;  %v5179_v13 = vpop.f32.mrb[71].mxu0  ;;  %v5565_v8 = vpop.f32.mrb[71].mxu1  ;;  %6723 = vmatmul.mubr.bf16.vlgmr.msra.gmra.mrb[128].mxu0 %v5836_v46  ;;  %7109 = vmatmul.mubr.bf16.vlgmr.msra.gmra.mrb[128].mxu1 %v5836_v46  ;;  %v5716_v53 = vmax.f32 %v9319_v48, 0.0  ;;  %v5718_v36 = vmax.f32 %v9383_v50, 0.0  ;;  %v11031_v48 = vld [vmem:[%s13666_s5 + $0x284] ss:$16 sps:$4 sm:$0xff]  }
 0x403   : > { %v9322_v2 = vadd.f32 %v5179_v13, %v12897_v60  ;;  %v9386_v14 = vadd.f32 %v5565_v8, %v12900_v62  ;;  %6884 = vmatpush1.bf16.msra.mxu0 %v11005_v24  ;;  %7270 = vmatpush1.bf16.msra.mxu1 %v11008_v29  ;;  %v5717_v52 = vmax.f32 %v9320_v11, 0.0  ;;  %v5719_v58 = vmax.f32 %v9384_v37, 0.0  ;;  %v11023_v24 = vld [vmem:[%s13666_s5 + $0x260] ss:$16 sps:$4 sm:$0xff]   ;;  %v11026_v29 = vld [vmem:[%s13666_s5 + $0x268] ss:$16 sps:$4 sm:$0xff]  }
 0x404   : > { %v5720_v39 = vmax.f32 %v9321_v5, 0.0  ;;  %v5722_v16 = vmax.f32 %v9385_v15, 0.0  ;;  %6885 = vmatprep.subr.bf16.mxu0 %v11013_v55  ;;  %7271 = vmatprep.subr.bf16.mxu1 %v11016_v20  ;;  %v11034_v20 = vld [vmem:[%s13666_s5 + $0x28c] ss:$16 sps:$4 sm:$0xff]  }
 0x405   : > { %v5721_v49 = vmax.f32 %v9322_v2, 0.0  ;;  %v5723_v61 = vmax.f32 %v9386_v14, 0.0 }
 0x406   : > { %v5840_v26 = vpack.c.bf16 %v5720_v39, %v5716_v53  ;;  %v12946_v0 = vpack.c.bf16 %v5722_v16, %v5718_v36  ;;  %v11037_v16 = vld [vmem:[%s13666_s5 + $0x2a4] ss:$16 sps:$4 sm:$0xff]  }
 0x407   : > { %v5841_v12 = vpack.c.bf16 %v5721_v49, %v5717_v52  ;;  %v12948_v17 = vpack.c.bf16 %v5723_v61, %v5719_v58  ;;  %v5183_v19 = vpop.f32.mrb[72].mxu0  ;;  %v5569_v21 = vpop.f32.mrb[72].mxu1  ;;  %6886 = vmatpush1.bf16.msra.mxu0 %v11011_v35  ;;  %7272 = vmatpush1.bf16.msra.mxu1 %v11014_v63  ;;  %v11029_v35 = vld [vmem:[%s13666_s5 + $0x280] ss:$16 sps:$4 sm:$0xff]   ;;  %v11032_v63 = vld [vmem:[%s13666_s5 + $0x288] ss:$16 sps:$4 sm:$0xff]  }
 0x408   : > { %v9323_v32 = vadd.f32 %v5183_v19, %v12891_v4  ;;  %v9387_v10 = vadd.f32 %v5569_v21, %v12894_v6  ;;  %v5185_v59 = vpop.f32.mrb[73].mxu0  ;;  %v5571_v33 = vpop.f32.mrb[73].mxu1  ;;  %6887 = vmatprep.subr.bf16.mxu0 %v11019_v51  ;;  %7273 = vmatprep.subr.bf16.mxu1 %v11022_v18  ;;  %v11040_v18 = vld [vmem:[%s13666_s5 + $0x2ac] ss:$16 sps:$4 sm:$0xff]  }
 0x409   : > { %v9324_v40 = vadd.f32 %v5185_v59, %v12897_v60  ;;  %v9388_v42 = vadd.f32 %v5571_v33, %v12900_v62  ;;  %v5187_v44 = vpop.f32.mrb[74].mxu0  ;;  %v5573_v56 = vpop.f32.mrb[74].mxu1  ;;  %6732 = vmatprep.mubr.bf16.mxu0 %v5841_v12  ;;  %7118 = vmatprep.mubr.bf16.mxu1 %v5841_v12  ;;  %v11043_v59 = vld [vmem:[%s13666_s5 + $0x2c4] ss:$16 sps:$4 sm:$0xff]  }
 0x40a   : > { %v9325_v43 = vadd.f32 %v5187_v44, %v12891_v4  ;;  %v9389_v45 = vadd.f32 %v5573_v56, %v12894_v6  ;;  %v5189_v46 = vpop.f32.mrb[75].mxu0  ;;  %v5575_v54 = vpop.f32.mrb[75].mxu1  ;;  %6733 = vmatmul.mubr.bf16.gmra.mrb[132].mxu0 %v5840_v26  ;;  %7119 = vmatmul.mubr.bf16.gmra.mrb[132].mxu1 %v5840_v26  ;;  %v5724_v50 = vmax.f32 %v9323_v32, 0.0  ;;  %v5726_v57 = vmax.f32 %v9387_v10, 0.0  ;;  %v11035_v32 = vld [vmem:[%s13666_s5 + $0x2a0] ss:$16 sps:$4 sm:$0xff]  }
 0x40b   : > { %v9326_v28 = vadd.f32 %v5189_v46, %v12897_v60  ;;  %v9390_v41 = vadd.f32 %v5575_v54, %v12900_v62  ;;  %6888 = vmatpush1.bf16.msra.mxu0 %v11017_v30  ;;  %7274 = vmatpush1.bf16.msra.mxu1 %v11020_v31  ;;  %v5725_v11 = vmax.f32 %v9324_v40, 0.0  ;;  %v5727_v37 = vmax.f32 %v9388_v42, 0.0  ;;  %v11038_v10 = vld [vmem:[%s13666_s5 + $0x2a8] ss:$16 sps:$4 sm:$0xff]   ;;  %v11046_v42 = vld [vmem:[%s13666_s5 + $0x2cc] ss:$16 sps:$4 sm:$0xff]  }
 0x40c   : > { %v5728_v7 = vmax.f32 %v9325_v43, 0.0  ;;  %v5730_v55 = vmax.f32 %v9389_v45, 0.0  ;;  %6889 = vmatprep.subr.bf16.mxu0 %v11025_v34  ;;  %7275 = vmatprep.subr.bf16.mxu1 %v11028_v38 }
 0x40d   : > { %v5729_v9 = vmax.f32 %v9326_v28, 0.0  ;;  %v5731_v3 = vmax.f32 %v9390_v41, 0.0 }
 0x40e   : > { %v5844_v5 = vpack.c.bf16 %v5728_v7, %v5724_v50  ;;  %v12982_v15 = vpack.c.bf16 %v5730_v55, %v5726_v57  ;;  %v11044_v50 = vld [vmem:[%s13666_s5 + $0x2c8] ss:$16 sps:$4 sm:$0xff]  }
 0x40f   : > { %v5845_v13 = vpack.c.bf16 %v5729_v9, %v5725_v11  ;;  %v12984_v8 = vpack.c.bf16 %v5731_v3, %v5727_v37  ;;  %v5193_v2 = vpop.f32.mrb[76].mxu0  ;;  %v5579_v14 = vpop.f32.mrb[76].mxu1  ;;  %6890 = vmatpush1.bf16.msra.mxu0 %v11023_v24  ;;  %7276 = vmatpush1.bf16.msra.mxu1 %v11026_v29  ;;  %v11049_v11 = vld [vmem:[%s13666_s5 + $0x2e4] ss:$16 sps:$4 sm:$0xff]   ;;  %v11052_v37 = vld [vmem:[%s13666_s5 + $0x2ec] ss:$16 sps:$4 sm:$0xff]  }
 0x410   : > { %v9327_v51 = vadd.f32 %v5193_v2, %v12891_v4  ;;  %v9391_v53 = vadd.f32 %v5579_v14, %v12894_v6  ;;  %v5195_v36 = vpop.f32.mrb[77].mxu0  ;;  %v5581_v39 = vpop.f32.mrb[77].mxu1  ;;  %6891 = vmatprep.subr.bf16.mxu0 %v11031_v48  ;;  %7277 = vmatprep.subr.bf16.mxu1 %v11034_v20  ;;  %v11041_v48 = vld [vmem:[%s13666_s5 + $0x2c0] ss:$16 sps:$4 sm:$0xff]  }
 0x411   : > { %v9328_v52 = vadd.f32 %v5195_v36, %v12897_v60  ;;  %v9392_v58 = vadd.f32 %v5581_v39, %v12900_v62  ;;  %v5197_v49 = vpop.f32.mrb[78].mxu0  ;;  %v5583_v61 = vpop.f32.mrb[78].mxu1  ;;  %6742 = vmatprep.mubr.bf16.mxu0 %v5845_v13  ;;  %7128 = vmatprep.mubr.bf16.mxu1 %v5845_v13  ;;  %v11047_v36 = vld [vmem:[%s13666_s5 + $0x2e0] ss:$16 sps:$4 sm:$0xff]   ;;  %v11050_v39 = vld [vmem:[%s13666_s5 + $0x2e8] ss:$16 sps:$4 sm:$0xff]  }
 0x412   : > { %v9329_v26 = vadd.f32 %v5197_v49, %v12891_v4  ;;  %v9393_v12 = vadd.f32 %v5583_v61, %v12894_v6  ;;  %v5199_v19 = vpop.f32.mrb[79].mxu0  ;;  %v5585_v21 = vpop.f32.mrb[79].mxu1  ;;  %6743 = vmatmul.mubr.bf16.gmra.mrb[136].mxu0 %v5844_v5  ;;  %7129 = vmatmul.mubr.bf16.gmra.mrb[136].mxu1 %v5844_v5  ;;  %v5732_v33 = vmax.f32 %v9327_v51, 0.0  ;;  %v5734_v34 = vmax.f32 %v9391_v53, 0.0  ;;  %v11058_v61 = vld [vmem:[%s13666_s5 + $0x30c] ss:$16 sps:$4 sm:$0xff]  }
 0x413   : > { %v9330_v30 = vadd.f32 %v5199_v19, %v12897_v60  ;;  %v9394_v31 = vadd.f32 %v5585_v21, %v12900_v62  ;;  %6892 = vmatpush1.bf16.msra.mxu0 %v11029_v35  ;;  %7278 = vmatpush1.bf16.msra.mxu1 %v11032_v63  ;;  %v5733_v44 = vmax.f32 %v9328_v52, 0.0  ;;  %v5735_v56 = vmax.f32 %v9392_v58, 0.0 }
 0x414   : > { %v5736_v38 = vmax.f32 %v9329_v26, 0.0  ;;  %v5738_v40 = vmax.f32 %v9393_v12, 0.0  ;;  %6893 = vmatprep.subr.bf16.mxu0 %v11037_v16  ;;  %7279 = vmatprep.subr.bf16.mxu1 %v11040_v18  ;;  %v11055_v16 = vld [vmem:[%s13666_s5 + $0x304] ss:$16 sps:$4 sm:$0xff]  }
 0x415   : > { %v5737_v43 = vmax.f32 %v9330_v30, 0.0  ;;  %v5739_v45 = vmax.f32 %v9394_v31, 0.0 }
 0x416   : > { %v5848_v46 = vpack.c.bf16 %v5736_v38, %v5732_v33  ;;  %v13018_v54 = vpack.c.bf16 %v5738_v40, %v5734_v34  ;;  %v11053_v34 = vld [vmem:[%s13666_s5 + $0x300] ss:$16 sps:$4 sm:$0xff]   ;;  %v11056_v38 = vld [vmem:[%s13666_s5 + $0x308] ss:$16 sps:$4 sm:$0xff]  }
 0x417   : > { %v5849_v28 = vpack.c.bf16 %v5737_v43, %v5733_v44  ;;  %v13020_v41 = vpack.c.bf16 %v5739_v45, %v5735_v56  ;;  %v5203_v24 = vpop.f32.mrb[80].mxu0  ;;  %v5589_v29 = vpop.f32.mrb[80].mxu1  ;;  %6894 = vmatpush1.bf16.msra.mxu0 %v11035_v32  ;;  %7280 = vmatpush1.bf16.msra.mxu1 %v11038_v10  ;;  %v11061_v43 = vld [vmem:[%s13666_s5 + $0x324] ss:$16 sps:$4 sm:$0xff]   ;;  %v11064_v45 = vld [vmem:[%s13666_s5 + $0x32c] ss:$16 sps:$4 sm:$0xff]  }
 0x418   : > { %v9331_v57 = vadd.f32 %v5203_v24, %v12891_v4  ;;  %v9395_v7 = vadd.f32 %v5589_v29, %v12894_v6  ;;  %v5205_v55 = vpop.f32.mrb[81].mxu0  ;;  %v5591_v20 = vpop.f32.mrb[81].mxu1  ;;  %6895 = vmatprep.subr.bf16.mxu0 %v11043_v59  ;;  %7281 = vmatprep.subr.bf16.mxu1 %v11046_v42 }
 0x419   : > { %v9332_v9 = vadd.f32 %v5205_v55, %v12897_v60  ;;  %v9396_v3 = vadd.f32 %v5591_v20, %v12900_v62  ;;  %v5207_v5 = vpop.f32.mrb[82].mxu0  ;;  %v5593_v13 = vpop.f32.mrb[82].mxu1  ;;  %6752 = vmatprep.mubr.bf16.mxu0 %v5849_v28  ;;  %7138 = vmatprep.mubr.bf16.mxu1 %v5849_v28 }
 0x41a   : > { %v9333_v2 = vadd.f32 %v5207_v5, %v12891_v4  ;;  %v9397_v14 = vadd.f32 %v5593_v13, %v12894_v6  ;;  %v5209_v35 = vpop.f32.mrb[83].mxu0  ;;  %v5595_v63 = vpop.f32.mrb[83].mxu1  ;;  %6753 = vmatmul.mubr.bf16.gmra.mrb[140].mxu0 %v5848_v46  ;;  %7139 = vmatmul.mubr.bf16.gmra.mrb[140].mxu1 %v5848_v46  ;;  %v5740_v18 = vmax.f32 %v9331_v57, 0.0  ;;  %v5742_v52 = vmax.f32 %v9395_v7, 0.0 }
 0x41b   : > { %v9334_v51 = vadd.f32 %v5209_v35, %v12897_v60  ;;  %v9398_v53 = vadd.f32 %v5595_v63, %v12900_v62  ;;  %6896 = vmatpush1.bf16.msra.mxu0 %v11041_v48  ;;  %7282 = vmatpush1.bf16.msra.mxu1 %v11044_v50  ;;  %v5741_v26 = vmax.f32 %v9332_v9, 0.0  ;;  %v5743_v12 = vmax.f32 %v9396_v3, 0.0  ;;  %v11067_v9 = vld [vmem:[%s13666_s5 + $0x344] ss:$16 sps:$4 sm:$0xff]  }
 0x41c   : > { %v5744_v58 = vmax.f32 %v9333_v2, 0.0  ;;  %v5746_v49 = vmax.f32 %v9397_v14, 0.0  ;;  %6897 = vmatprep.subr.bf16.mxu0 %v11049_v11  ;;  %7283 = vmatprep.subr.bf16.mxu1 %v11052_v37  ;;  %v11059_v11 = vld [vmem:[%s13666_s5 + $0x320] ss:$16 sps:$4 sm:$0xff]   ;;  %v11062_v37 = vld [vmem:[%s13666_s5 + $0x328] ss:$16 sps:$4 sm:$0xff]  }
 0x41d   : > { %v5745_v19 = vmax.f32 %v9334_v51, 0.0  ;;  %v5747_v21 = vmax.f32 %v9398_v53, 0.0  ;;  %v11070_v14 = vld [vmem:[%s13666_s5 + $0x34c] ss:$16 sps:$4 sm:$0xff]  }
 0x41e   : > { %v5852_v30 = vpack.c.bf16 %v5744_v58, %v5740_v18  ;;  %v13054_v31 = vpack.c.bf16 %v5746_v49, %v5742_v52  ;;  %v11065_v49 = vld [vmem:[%s13666_s5 + $0x340] ss:$16 sps:$4 sm:$0xff]  }
 0x41f   : > { %v5853_v32 = vpack.c.bf16 %v5745_v19, %v5741_v26  ;;  %v13056_v10 = vpack.c.bf16 %v5747_v21, %v5743_v12  ;;  %v5213_v59 = vpop.f32.mrb[84].mxu0  ;;  %v5599_v33 = vpop.f32.mrb[84].mxu1  ;;  %6898 = vmatpush1.bf16.msra.mxu0 %v11047_v36  ;;  %7284 = vmatpush1.bf16.msra.mxu1 %v11050_v39 }
 0x420   : > { %v9335_v40 = vadd.f32 %v5213_v59, %v12891_v4  ;;  %v9399_v42 = vadd.f32 %v5599_v33, %v12894_v6  ;;  %v5215_v44 = vpop.f32.mrb[85].mxu0  ;;  %v5601_v56 = vpop.f32.mrb[85].mxu1  ;;  %6899 = vmatprep.subr.bf16.mxu0 %v11055_v16  ;;  %7285 = vmatprep.subr.bf16.mxu1 %v11058_v61  ;;  %v11068_v61 = vld [vmem:[%s13666_s5 + $0x348] ss:$16 sps:$4 sm:$0xff]  }
 0x421   : > { %v9336_v46 = vadd.f32 %v5215_v44, %v12897_v60  ;;  %v9400_v28 = vadd.f32 %v5601_v56, %v12900_v62  ;;  %v5217_v24 = vpop.f32.mrb[86].mxu0  ;;  %v5603_v29 = vpop.f32.mrb[86].mxu1  ;;  %6762 = vmatprep.mubr.bf16.mxu0 %v5853_v32  ;;  %7148 = vmatprep.mubr.bf16.mxu1 %v5853_v32  ;;  %v11076_v32 = vld [vmem:[%s13666_s5 + $0x36c] ss:$16 sps:$4 sm:$0xff]  }
 0x422   : > { %v9337_v48 = vadd.f32 %v5217_v24, %v12891_v4  ;;  %v9401_v50 = vadd.f32 %v5603_v29, %v12894_v6  ;;  %v5219_v57 = vpop.f32.mrb[87].mxu0  ;;  %v5605_v7 = vpop.f32.mrb[87].mxu1  ;;  %6763 = vmatmul.mubr.bf16.gmra.mrb[144].mxu0 %v5852_v30  ;;  %7149 = vmatmul.mubr.bf16.gmra.mrb[144].mxu1 %v5852_v30  ;;  %v5748_v3 = vmax.f32 %v9335_v40, 0.0  ;;  %v5750_v5 = vmax.f32 %v9399_v42, 0.0  ;;  %v11073_v30 = vld [vmem:[%s13666_s5 + $0x364] ss:$16 sps:$4 sm:$0xff]  }
 0x423   : > { %v9338_v55 = vadd.f32 %v5219_v57, %v12897_v60  ;;  %v9402_v20 = vadd.f32 %v5605_v7, %v12900_v62  ;;  %6900 = vmatpush1.bf16.msra.mxu0 %v11053_v34  ;;  %7286 = vmatpush1.bf16.msra.mxu1 %v11056_v38  ;;  %v5749_v35 = vmax.f32 %v9336_v46, 0.0  ;;  %v5751_v63 = vmax.f32 %v9400_v28, 0.0  ;;  %v11071_v46 = vld [vmem:[%s13666_s5 + $0x360] ss:$16 sps:$4 sm:$0xff]   ;;  %v11074_v28 = vld [vmem:[%s13666_s5 + $0x368] ss:$16 sps:$4 sm:$0xff]  }
 0x424   : > { %v5752_v13 = vmax.f32 %v9337_v48, 0.0  ;;  %v5754_v2 = vmax.f32 %v9401_v50, 0.0  ;;  %6901 = vmatprep.subr.bf16.mxu0 %v11061_v43  ;;  %7287 = vmatprep.subr.bf16.mxu1 %v11064_v45  ;;  %v11079_v24 = vld [vmem:[%s13666_s5 + $0x384] ss:$16 sps:$4 sm:$0xff]   ;;  %v11082_v7 = vld [vmem:[%s13666_s5 + $0x38c] ss:$16 sps:$4 sm:$0xff]  }
 0x425   : > { %v5753_v51 = vmax.f32 %v9338_v55, 0.0  ;;  %v5755_v53 = vmax.f32 %v9402_v20, 0.0 }
 0x426   : > { %v5856_v36 = vpack.c.bf16 %v5752_v13, %v5748_v3  ;;  %v13090_v39 = vpack.c.bf16 %v5754_v2, %v5750_v5 }
 0x427   : > { %v5857_v16 = vpack.c.bf16 %v5753_v51, %v5749_v35  ;;  %v13092_v18 = vpack.c.bf16 %v5755_v53, %v5751_v63  ;;  %v5223_v52 = vpop.f32.mrb[88].mxu0  ;;  %v5609_v58 = vpop.f32.mrb[88].mxu1  ;;  %6902 = vmatpush1.bf16.msra.mxu0 %v11059_v11  ;;  %7288 = vmatpush1.bf16.msra.mxu1 %v11062_v37  ;;  %v11077_v35 = vld [vmem:[%s13666_s5 + $0x380] ss:$16 sps:$4 sm:$0xff]   ;;  %v11080_v63 = vld [vmem:[%s13666_s5 + $0x388] ss:$16 sps:$4 sm:$0xff]  }
 0x428   : > { %v9339_v26 = vadd.f32 %v5223_v52, %v12891_v4  ;;  %v9403_v12 = vadd.f32 %v5609_v58, %v12894_v6  ;;  %v5225_v19 = vpop.f32.mrb[89].mxu0  ;;  %v5611_v21 = vpop.f32.mrb[89].mxu1  ;;  %6903 = vmatprep.subr.bf16.mxu0 %v11067_v9  ;;  %7289 = vmatprep.subr.bf16.mxu1 %v11070_v14  ;;  %v11085_v52 = vld [vmem:[%s13666_s5 + $0x3a4] ss:$16 sps:$4 sm:$0xff]   ;;  %v11088_v58 = vld [vmem:[%s13666_s5 + $0x3ac] ss:$16 sps:$4 sm:$0xff]  }
 0x429   : > { %v9340_v59 = vadd.f32 %v5225_v19, %v12897_v60  ;;  %v9404_v33 = vadd.f32 %v5611_v21, %v12900_v62  ;;  %v5227_v34 = vpop.f32.mrb[90].mxu0  ;;  %v5613_v38 = vpop.f32.mrb[90].mxu1  ;;  %6772 = vmatprep.mubr.bf16.mxu0 %v5857_v16  ;;  %7158 = vmatprep.mubr.bf16.mxu1 %v5857_v16 }
 0x42a   : > { %v9341_v40 = vadd.f32 %v5227_v34, %v12891_v4  ;;  %v9405_v42 = vadd.f32 %v5613_v38, %v12894_v6  ;;  %v5229_v44 = vpop.f32.mrb[91].mxu0  ;;  %v5615_v56 = vpop.f32.mrb[91].mxu1  ;;  %6773 = vmatmul.mubr.bf16.gmra.mrb[148].mxu0 %v5856_v36  ;;  %7159 = vmatmul.mubr.bf16.gmra.mrb[148].mxu1 %v5856_v36  ;;  %v5756_v29 = vmax.f32 %v9339_v26, 0.0  ;;  %v5758_v48 = vmax.f32 %v9403_v12, 0.0  ;;  %v11083_v34 = vld [vmem:[%s13666_s5 + $0x3a0] ss:$16 sps:$4 sm:$0xff]  }
 0x42b   : > { %v9342_v43 = vadd.f32 %v5229_v44, %v12897_v60  ;;  %v9406_v45 = vadd.f32 %v5615_v56, %v12900_v62  ;;  %6904 = vmatpush1.bf16.msra.mxu0 %v11065_v49  ;;  %7290 = vmatpush1.bf16.msra.mxu1 %v11068_v61  ;;  %v5757_v55 = vmax.f32 %v9340_v59, 0.0  ;;  %v5759_v20 = vmax.f32 %v9404_v33, 0.0  ;;  %v11086_v38 = vld [vmem:[%s13666_s5 + $0x3a8] ss:$16 sps:$4 sm:$0xff]  }
 0x42c   : > { %v5760_v50 = vmax.f32 %v9341_v40, 0.0  ;;  %v5762_v57 = vmax.f32 %v9405_v42, 0.0  ;;  %6905 = vmatprep.subr.bf16.mxu0 %v11073_v30  ;;  %7291 = vmatprep.subr.bf16.mxu1 %v11076_v32  ;;  %v11091_v40 = vld [vmem:[%s13666_s5 + $0x3c4] ss:$16 sps:$4 sm:$0xff]  }
 0x42d   : > { %v5761_v11 = vmax.f32 %v9342_v43, 0.0  ;;  %v5763_v37 = vmax.f32 %v9406_v45, 0.0  ;;  %v11094_v45 = vld [vmem:[%s13666_s5 + $0x3cc] ss:$16 sps:$4 sm:$0xff]  }
 0x42e   : > { %v5860_v9 = vpack.c.bf16 %v5760_v50, %v5756_v29  ;;  %v13126_v3 = vpack.c.bf16 %v5762_v57, %v5758_v48 }
 0x42f   : > { %v5861_v5 = vpack.c.bf16 %v5761_v11, %v5757_v55  ;;  %v13128_v13 = vpack.c.bf16 %v5763_v37, %v5759_v20  ;;  %v5233_v2 = vpop.f32.mrb[92].mxu0  ;;  %v5619_v14 = vpop.f32.mrb[92].mxu1  ;;  %6906 = vmatpush1.bf16.msra.mxu0 %v11071_v46  ;;  %7292 = vmatpush1.bf16.msra.mxu1 %v11074_v28  ;;  %v11089_v11 = vld [vmem:[%s13666_s5 + $0x3c0] ss:$16 sps:$4 sm:$0xff]   ;;  %v11092_v37 = vld [vmem:[%s13666_s5 + $0x3c8] ss:$16 sps:$4 sm:$0xff]  }
 0x430   : > { %v9343_v51 = vadd.f32 %v5233_v2, %v12891_v4  ;;  %v9407_v53 = vadd.f32 %v5619_v14, %v12894_v6  ;;  %v5235_v36 = vpop.f32.mrb[93].mxu0  ;;  %v5621_v16 = vpop.f32.mrb[93].mxu1  ;;  %6907 = vmatprep.subr.bf16.mxu0 %v11079_v24  ;;  %7293 = vmatprep.subr.bf16.mxu1 %v11082_v7 }
 0x431   : > { %v9344_v49 = vadd.f32 %v5235_v36, %v12897_v60  ;;  %v9408_v61 = vadd.f32 %v5621_v16, %v12900_v62  ;;  %v5237_v26 = vpop.f32.mrb[94].mxu0  ;;  %v5623_v12 = vpop.f32.mrb[94].mxu1  ;;  %6782 = vmatprep.mubr.bf16.mxu0 %v5861_v5  ;;  %7168 = vmatprep.mubr.bf16.mxu1 %v5861_v5 }
 0x432   : > { %v9345_v19 = vadd.f32 %v5237_v26, %v12891_v4  ;;  %v9409_v21 = vadd.f32 %v5623_v12, %v12894_v6  ;;  %v5239_v30 = vpop.f32.mrb[95].mxu0  ;;  %v5625_v32 = vpop.f32.mrb[95].mxu1  ;;  %6783 = vmatmul.mubr.bf16.gmra.mrb[152].mxu0 %v5860_v9  ;;  %7169 = vmatmul.mubr.bf16.gmra.mrb[152].mxu1 %v5860_v9  ;;  %v5764_v42 = vmax.f32 %v9343_v51, 0.0  ;;  %v5766_v44 = vmax.f32 %v9407_v53, 0.0 }
 0x433   : > { %v9346_v59 = vadd.f32 %v5239_v30, %v12897_v60  ;;  %v9410_v33 = vadd.f32 %v5625_v32, %v12900_v62  ;;  %6908 = vmatpush1.bf16.msra.mxu0 %v11077_v35  ;;  %7294 = vmatpush1.bf16.msra.mxu1 %v11080_v63  ;;  %v5765_v46 = vmax.f32 %v9344_v49, 0.0  ;;  %v5767_v28 = vmax.f32 %v9408_v61, 0.0  ;;  %v11097_v35 = vld [vmem:[%s13666_s5 + $0x3e4] ss:$16 sps:$4 sm:$0xff]   ;;  %v11100_v63 = vld [vmem:[%s13666_s5 + $0x3ec] ss:$16 sps:$4 sm:$0xff]  }
 0x434   : > { %v5768_v56 = vmax.f32 %v9345_v19, 0.0  ;;  %v5770_v43 = vmax.f32 %v9409_v21, 0.0  ;;  %6909 = vmatprep.subr.bf16.mxu0 %v11085_v52  ;;  %7295 = vmatprep.subr.bf16.mxu1 %v11088_v58  ;;  %v11095_v19 = vld [vmem:[%s13666_s5 + $0x3e0] ss:$16 sps:$4 sm:$0xff]   ;;  %v11098_v21 = vld [vmem:[%s13666_s5 + $0x3e8] ss:$16 sps:$4 sm:$0xff]  }
 0x435   : > { %v5769_v24 = vmax.f32 %v9346_v59, 0.0  ;;  %v5771_v29 = vmax.f32 %v9410_v33, 0.0 }
 0x436   : > { %v5864_v48 = vpack.c.bf16 %v5768_v56, %v5764_v42  ;;  %v13162_v50 = vpack.c.bf16 %v5770_v43, %v5766_v44 }
 0x437   : > { %v5865_v57 = vpack.c.bf16 %v5769_v24, %v5765_v46  ;;  %v13164_v7 = vpack.c.bf16 %v5771_v29, %v5767_v28  ;;  %v5243_v55 = vpop.f32.mrb[96].mxu0  ;;  %v5629_v20 = vpop.f32.mrb[96].mxu1  ;;  %6910 = vmatpush1.bf16.msra.mxu0 %v11083_v34  ;;  %7296 = vmatpush1.bf16.msra.mxu1 %v11086_v38 }
 0x438   : > { %v9347_v9 = vadd.f32 %v5243_v55, %v12891_v4  ;;  %v9411_v5 = vadd.f32 %v5629_v20, %v12894_v6  ;;  %v5245_v2 = vpop.f32.mrb[97].mxu0  ;;  %v5631_v14 = vpop.f32.mrb[97].mxu1  ;;  %6911 = vmatprep.subr.bf16.mxu0 %v11091_v40  ;;  %7297 = vmatprep.subr.bf16.mxu1 %v11094_v45 }
 0x439   : > { %v9348_v51 = vadd.f32 %v5245_v2, %v12897_v60  ;;  %v9412_v53 = vadd.f32 %v5631_v14, %v12900_v62  ;;  %v5247_v36 = vpop.f32.mrb[98].mxu0  ;;  %v5633_v16 = vpop.f32.mrb[98].mxu1  ;;  %6792 = vmatprep.mubr.bf16.mxu0 %v5865_v57  ;;  %7178 = vmatprep.mubr.bf16.mxu1 %v5865_v57 }
 0x43a   : > { %v9349_v52 = vadd.f32 %v5247_v36, %v12891_v4  ;;  %v9413_v58 = vadd.f32 %v5633_v16, %v12894_v6  ;;  %v5249_v49 = vpop.f32.mrb[99].mxu0  ;;  %v5635_v61 = vpop.f32.mrb[99].mxu1  ;;  %6793 = vmatmul.mubr.bf16.gmra.mrb[156].mxu0 %v5864_v48  ;;  %7179 = vmatmul.mubr.bf16.gmra.mrb[156].mxu1 %v5864_v48  ;;  %v5772_v30 = vmax.f32 %v9347_v9, 0.0  ;;  %v5774_v32 = vmax.f32 %v9411_v5, 0.0 }
 0x43b   : > { %v9350_v26 = vadd.f32 %v5249_v49, %v12897_v60  ;;  %v9414_v12 = vadd.f32 %v5635_v61, %v12900_v62  ;;  %6912 = vmatpush1.bf16.msra.mxu0 %v11089_v11  ;;  %7298 = vmatpush1.bf16.msra.mxu1 %v11092_v37  ;;  %v5773_v34 = vmax.f32 %v9348_v51, 0.0  ;;  %v5775_v38 = vmax.f32 %v9412_v53, 0.0 }
 0x43c   : > { %v5776_v59 = vmax.f32 %v9349_v52, 0.0  ;;  %v5778_v33 = vmax.f32 %v9413_v58, 0.0  ;;  %6913 = vmatprep.subr.bf16.mxu0 %v11097_v35  ;;  %7299 = vmatprep.subr.bf16.mxu1 %v11100_v63 }
 0x43d   : > { %v5777_v40 = vmax.f32 %v9350_v26, 0.0  ;;  %v5779_v42 = vmax.f32 %v9414_v12, 0.0 }
 0x43e   : > { %v5868_v44 = vpack.c.bf16 %v5776_v59, %v5772_v30  ;;  %v13192_v56 = vpack.c.bf16 %v5778_v33, %v5774_v32 }
 0x43f   : > { %v5869_v43 = vpack.c.bf16 %v5777_v40, %v5773_v34  ;;  %v13194_v45 = vpack.c.bf16 %v5779_v42, %v5775_v38  ;;  %v5253_v46 = vpop.f32.mrb[100].mxu0  ;;  %v5639_v28 = vpop.f32.mrb[100].mxu1  ;;  %6914 = vmatpush1.bf16.msra.mxu0 %v11095_v19  ;;  %7300 = vmatpush1.bf16.msra.mxu1 %v11098_v21 }
 0x440   : > { %v9351_v24 = vadd.f32 %v5253_v46, %v12891_v4  ;;  %v9415_v29 = vadd.f32 %v5639_v28, %v12894_v6  ;;  %v5255_v48 = vpop.f32.mrb[101].mxu0  ;;  %v5641_v57 = vpop.f32.mrb[101].mxu1 }
 0x441   : > { %v9352_v55 = vadd.f32 %v5255_v48, %v12897_v60  ;;  %v9416_v20 = vadd.f32 %v5641_v57, %v12900_v62  ;;  %v5257_v11 = vpop.f32.mrb[102].mxu0  ;;  %v5643_v37 = vpop.f32.mrb[102].mxu1  ;;  %6802 = vmatprep.mubr.bf16.mxu0 %v5869_v43  ;;  %7188 = vmatprep.mubr.bf16.mxu1 %v5869_v43 }
 0x442   : > { %v9353_v9 = vadd.f32 %v5257_v11, %v12891_v4  ;;  %v9417_v5 = vadd.f32 %v5643_v37, %v12894_v6  ;;  %v5259_v2 = vpop.f32.mrb[103].mxu0  ;;  %v5645_v14 = vpop.f32.mrb[103].mxu1  ;;  %6803 = vmatmul.mubr.bf16.gmra.mrb[160].mxu0 %v5868_v44  ;;  %7189 = vmatmul.mubr.bf16.gmra.mrb[160].mxu1 %v5868_v44  ;;  %v5780_v51 = vmax.f32 %v9351_v24, 0.0  ;;  %v5782_v53 = vmax.f32 %v9415_v29, 0.0 }
 0x443   : > { %v9354_v35 = vadd.f32 %v5259_v2, %v12897_v60  ;;  %v9418_v63 = vadd.f32 %v5645_v14, %v12900_v62  ;;  %v5781_v52 = vmax.f32 %v9352_v55, 0.0  ;;  %v5783_v58 = vmax.f32 %v9416_v20, 0.0 }
 0x444   : > { %v5784_v36 = vmax.f32 %v9353_v9, 0.0  ;;  %v5786_v16 = vmax.f32 %v9417_v5, 0.0 }
 0x445   : > { %v5785_v49 = vmax.f32 %v9354_v35, 0.0  ;;  %v5787_v61 = vmax.f32 %v9418_v63, 0.0 }
 0x446   : > { %v5872_v26 = vpack.c.bf16 %v5784_v36, %v5780_v51  ;;  %v13204_v12 = vpack.c.bf16 %v5786_v16, %v5782_v53 }
 0x447   : > { %v5873_v19 = vpack.c.bf16 %v5785_v49, %v5781_v52  ;;  %v13206_v21 = vpack.c.bf16 %v5787_v61, %v5783_v58  ;;  %v5263_v30 = vpop.f32.mrb[104].mxu0  ;;  %v5649_v32 = vpop.f32.mrb[104].mxu1 }
 0x448   : > { %v9355_v59 = vadd.f32 %v5263_v30, %v12891_v4  ;;  %v9419_v33 = vadd.f32 %v5649_v32, %v12894_v6  ;;  %v5265_v34 = vpop.f32.mrb[105].mxu0  ;;  %v5651_v38 = vpop.f32.mrb[105].mxu1 }
 0x449   : > { %v9356_v40 = vadd.f32 %v5265_v34, %v12897_v60  ;;  %v9420_v42 = vadd.f32 %v5651_v38, %v12900_v62  ;;  %v5267_v44 = vpop.f32.mrb[106].mxu0  ;;  %v5653_v43 = vpop.f32.mrb[106].mxu1  ;;  %6812 = vmatprep.mubr.bf16.mxu0 %v5873_v19  ;;  %7198 = vmatprep.mubr.bf16.mxu1 %v5873_v19 }
 0x44a   : > { %v9357_v46 = vadd.f32 %v5267_v44, %v12891_v4  ;;  %v9421_v28 = vadd.f32 %v5653_v43, %v12894_v6  ;;  %v5269_v24 = vpop.f32.mrb[107].mxu0  ;;  %v5655_v29 = vpop.f32.mrb[107].mxu1  ;;  %6813 = vmatmul.mubr.bf16.gmra.mrb[164].mxu0 %v5872_v26  ;;  %7199 = vmatmul.mubr.bf16.gmra.mrb[164].mxu1 %v5872_v26  ;;  %v5788_v55 = vmax.f32 %v9355_v59, 0.0  ;;  %v5790_v20 = vmax.f32 %v9419_v33, 0.0 }
 0x44b   : > { %v9358_v48 = vadd.f32 %v5269_v24, %v12897_v60  ;;  %v9422_v57 = vadd.f32 %v5655_v29, %v12900_v62  ;;  %v5789_v9 = vmax.f32 %v9356_v40, 0.0  ;;  %v5791_v5 = vmax.f32 %v9420_v42, 0.0 }
 0x44c   : > { %v5792_v11 = vmax.f32 %v9357_v46, 0.0  ;;  %v5794_v37 = vmax.f32 %v9421_v28, 0.0 }
 0x44d   : > { %v5793_v2 = vmax.f32 %v9358_v48, 0.0  ;;  %v5795_v14 = vmax.f32 %v9422_v57, 0.0 }
 0x44e   : > { %v5876_v35 = vpack.c.bf16 %v5792_v11, %v5788_v55  ;;  %v13216_v63 = vpack.c.bf16 %v5794_v37, %v5790_v20 }
 0x44f   : > { %v5877_v51 = vpack.c.bf16 %v5793_v2, %v5789_v9  ;;  %v13218_v53 = vpack.c.bf16 %v5795_v14, %v5791_v5  ;;  %v5273_v36 = vpop.f32.mrb[108].mxu0  ;;  %v5659_v16 = vpop.f32.mrb[108].mxu1 }
 0x450   : > { %v9359_v52 = vadd.f32 %v5273_v36, %v12891_v4  ;;  %v9423_v58 = vadd.f32 %v5659_v16, %v12894_v6  ;;  %v5275_v49 = vpop.f32.mrb[109].mxu0  ;;  %v5661_v61 = vpop.f32.mrb[109].mxu1 }
 0x451   : > { %v9360_v26 = vadd.f32 %v5275_v49, %v12897_v60  ;;  %v9424_v19 = vadd.f32 %v5661_v61, %v12900_v62  ;;  %v5277_v30 = vpop.f32.mrb[110].mxu0  ;;  %v5663_v32 = vpop.f32.mrb[110].mxu1  ;;  %6822 = vmatprep.mubr.bf16.mxu0 %v5877_v51  ;;  %7208 = vmatprep.mubr.bf16.mxu1 %v5877_v51 }
 0x452   : > { %v9361_v59 = vadd.f32 %v5277_v30, %v12891_v4  ;;  %v9425_v33 = vadd.f32 %v5663_v32, %v12894_v6  ;;  %v5279_v34 = vpop.f32.mrb[111].mxu0  ;;  %v5665_v38 = vpop.f32.mrb[111].mxu1  ;;  %6823 = vmatmul.mubr.bf16.gmra.mrb[168].mxu0 %v5876_v35  ;;  %7209 = vmatmul.mubr.bf16.gmra.mrb[168].mxu1 %v5876_v35  ;;  %v5796_v44 = vmax.f32 %v9359_v52, 0.0  ;;  %v5798_v43 = vmax.f32 %v9423_v58, 0.0 }
 0x453   : > { %v9362_v40 = vadd.f32 %v5279_v34, %v12897_v60  ;;  %v9426_v42 = vadd.f32 %v5665_v38, %v12900_v62  ;;  %v5797_v24 = vmax.f32 %v9360_v26, 0.0  ;;  %v5799_v29 = vmax.f32 %v9424_v19, 0.0 }
 0x454   : > { %v5800_v46 = vmax.f32 %v9361_v59, 0.0  ;;  %v5802_v28 = vmax.f32 %v9425_v33, 0.0  ;;  %v11101_v59 = vld [vmem:[%s13668_s7 + $0x40] sm:$0xff]  }
 0x455   : > { %v5801_v48 = vmax.f32 %v9362_v40, 0.0  ;;  %v5803_v57 = vmax.f32 %v9426_v42, 0.0  ;;  %8963 = vmatprep.subr.bf16.mxu0 %v11101_v59 }
 0x456   : > { %v5880_v55 = vpack.c.bf16 %v5800_v46, %v5796_v44  ;;  %v13228_v20 = vpack.c.bf16 %v5802_v28, %v5798_v43 }
 0x457   : > { %v5881_v11 = vpack.c.bf16 %v5801_v48, %v5797_v24  ;;  %v13230_v37 = vpack.c.bf16 %v5803_v57, %v5799_v29  ;;  %v5283_v9 = vpop.f32.mrb[112].mxu0  ;;  %v5669_v5 = vpop.f32.mrb[112].mxu1 }
 0x458   : > { %v9363_v2 = vadd.f32 %v5283_v9, %v12891_v4  ;;  %v9427_v14 = vadd.f32 %v5669_v5, %v12894_v6  ;;  %v5285_v35 = vpop.f32.mrb[113].mxu0  ;;  %v5671_v51 = vpop.f32.mrb[113].mxu1 }
 0x459   : > { %v9364_v36 = vadd.f32 %v5285_v35, %v12897_v60  ;;  %v9428_v16 = vadd.f32 %v5671_v51, %v12900_v62  ;;  %v5287_v52 = vpop.f32.mrb[114].mxu0  ;;  %v5673_v58 = vpop.f32.mrb[114].mxu1  ;;  %6832 = vmatprep.mubr.bf16.mxu0 %v5881_v11  ;;  %7218 = vmatprep.mubr.bf16.mxu1 %v5881_v11 }
 0x45a   : > { %v9365_v49 = vadd.f32 %v5287_v52, %v12891_v4  ;;  %v9429_v61 = vadd.f32 %v5673_v58, %v12894_v6  ;;  %v5289_v26 = vpop.f32.mrb[115].mxu0  ;;  %v5675_v19 = vpop.f32.mrb[115].mxu1  ;;  %6833 = vmatmul.mubr.bf16.gmra.mrb[172].mxu0 %v5880_v55  ;;  %7219 = vmatmul.mubr.bf16.gmra.mrb[172].mxu1 %v5880_v55  ;;  %v5804_v33 = vmax.f32 %v9363_v2, 0.0  ;;  %v5806_v34 = vmax.f32 %v9427_v14, 0.0 }
 0x45b   : > { %v9366_v30 = vadd.f32 %v5289_v26, %v12897_v60  ;;  %v9430_v32 = vadd.f32 %v5675_v19, %v12900_v62  ;;  %v5805_v42 = vmax.f32 %v9364_v36, 0.0  ;;  %v5807_v44 = vmax.f32 %v9428_v16, 0.0 }
 0x45c   : > { %v5808_v38 = vmax.f32 %v9365_v49, 0.0  ;;  %v5810_v40 = vmax.f32 %v9429_v61, 0.0  ;;  %v11103_v61 = vld [vmem:[%s13668_s7 + $0xc0] sm:$0xff]  }
 0x45d   : > { %v5809_v43 = vmax.f32 %v9366_v30, 0.0  ;;  %v5811_v46 = vmax.f32 %v9430_v32, 0.0  ;;  %9075 = vmatprep.subr.bf16.mxu1 %v11103_v61 }
 0x45e   : > { %v5884_v28 = vpack.c.bf16 %v5808_v38, %v5804_v33  ;;  %v13243_v24 = vpack.c.bf16 %v5810_v40, %v5806_v34 }
 0x45f   : > { %v5885_v29 = vpack.c.bf16 %v5809_v43, %v5805_v42  ;;  %v13245_v48 = vpack.c.bf16 %v5811_v46, %v5807_v44  ;;  %v5293_v57 = vpop.f32.mrb[116].mxu0  ;;  %v5679_v55 = vpop.f32.mrb[116].mxu1 }
 0x460   : > { %v9367_v11 = vadd.f32 %v5293_v57, %v12891_v4  ;;  %v9431_v9 = vadd.f32 %v5679_v55, %v12894_v6  ;;  %v5295_v5 = vpop.f32.mrb[117].mxu0  ;;  %v5681_v2 = vpop.f32.mrb[117].mxu1 }
 0x461   : > { %v9368_v14 = vadd.f32 %v5295_v5, %v12897_v60  ;;  %v9432_v35 = vadd.f32 %v5681_v2, %v12900_v62  ;;  %v5297_v51 = vpop.f32.mrb[118].mxu0  ;;  %v5683_v36 = vpop.f32.mrb[118].mxu1  ;;  %6842 = vmatprep.mubr.bf16.mxu0 %v5885_v29  ;;  %7228 = vmatprep.mubr.bf16.mxu1 %v5885_v29 }
 0x462   : > { %v9369_v16 = vadd.f32 %v5297_v51, %v12891_v4  ;;  %v9433_v52 = vadd.f32 %v5683_v36, %v12894_v6  ;;  %v5299_v58 = vpop.f32.mrb[119].mxu0  ;;  %v5685_v49 = vpop.f32.mrb[119].mxu1  ;;  %6843 = vmatmul.mubr.bf16.gmra.mrb[176].mxu0 %v5884_v28  ;;  %7229 = vmatmul.mubr.bf16.gmra.mrb[176].mxu1 %v5884_v28  ;;  %v5812_v30 = vmax.f32 %v9367_v11, 0.0  ;;  %v5814_v32 = vmax.f32 %v9431_v9, 0.0 }
 0x463   : > { %v9370_v26 = vadd.f32 %v5299_v58, %v12897_v60  ;;  %v9434_v19 = vadd.f32 %v5685_v49, %v12900_v62  ;;  %v5813_v34 = vmax.f32 %v9368_v14, 0.0  ;;  %v5815_v38 = vmax.f32 %v9432_v35, 0.0 }
 0x464   : > { %v5816_v59 = vmax.f32 %v9369_v16, 0.0  ;;  %v5818_v33 = vmax.f32 %v9433_v52, 0.0 }
 0x465   : > { %v5817_v40 = vmax.f32 %v9370_v26, 0.0  ;;  %v5819_v42 = vmax.f32 %v9434_v19, 0.0 }
 0x466   : > { %v5888_v44 = vpack.c.bf16 %v5816_v59, %v5812_v30  ;;  %v13258_v43 = vpack.c.bf16 %v5818_v33, %v5814_v32 }
 0x467   : > { %v5889_v46 = vpack.c.bf16 %v5817_v40, %v5813_v34  ;;  %v13260_v28 = vpack.c.bf16 %v5819_v42, %v5815_v38  ;;  %v5303_v29 = vpop.f32.mrb[120].mxu0  ;;  %v5689_v57 = vpop.f32.mrb[120].mxu1 }
 0x468   : > { %v9371_v55 = vadd.f32 %v5303_v29, %v12891_v4  ;;  %v9435_v11 = vadd.f32 %v5689_v57, %v12894_v6  ;;  %v5305_v9 = vpop.f32.mrb[121].mxu0  ;;  %v5691_v5 = vpop.f32.mrb[121].mxu1 }
 0x469   : > { %v9372_v2 = vadd.f32 %v5305_v9, %v12897_v60  ;;  %v9436_v14 = vadd.f32 %v5691_v5, %v12900_v62  ;;  %v5307_v35 = vpop.f32.mrb[122].mxu0  ;;  %v5693_v51 = vpop.f32.mrb[122].mxu1  ;;  %6852 = vmatprep.mubr.bf16.mxu0 %v5889_v46  ;;  %7238 = vmatprep.mubr.bf16.mxu1 %v5889_v46 }
 0x46a   : > { %v9373_v36 = vadd.f32 %v5307_v35, %v12891_v4  ;;  %v9437_v16 = vadd.f32 %v5693_v51, %v12894_v6  ;;  %v5309_v52 = vpop.f32.mrb[123].mxu0  ;;  %v5695_v58 = vpop.f32.mrb[123].mxu1  ;;  %6853 = vmatmul.mubr.bf16.gmra.mrb[180].mxu0 %v5888_v44  ;;  %7239 = vmatmul.mubr.bf16.gmra.mrb[180].mxu1 %v5888_v44  ;;  %v5820_v26 = vmax.f32 %v9371_v55, 0.0  ;;  %v5822_v19 = vmax.f32 %v9435_v11, 0.0 }
 0x46b   : > { %v9374_v49 = vadd.f32 %v5309_v52, %v12897_v60  ;;  %v9438_v61 = vadd.f32 %v5695_v58, %v12900_v62  ;;  %v5821_v59 = vmax.f32 %v9372_v2, 0.0  ;;  %v5823_v33 = vmax.f32 %v9436_v14, 0.0 }
 0x46c   : > { %v5824_v30 = vmax.f32 %v9373_v36, 0.0  ;;  %v5826_v32 = vmax.f32 %v9437_v16, 0.0 }
 0x46d   : > { %v5825_v34 = vmax.f32 %v9374_v49, 0.0  ;;  %v5827_v38 = vmax.f32 %v9438_v61, 0.0 }
 0x46e   : > { %v5892_v40 = vpack.c.bf16 %v5824_v30, %v5820_v26  ;;  %v13270_v42 = vpack.c.bf16 %v5826_v32, %v5822_v19 }
 0x46f   : > { %v5893_v46 = vpack.c.bf16 %v5825_v34, %v5821_v59  ;;  %v13272_v29 = vpack.c.bf16 %v5827_v38, %v5823_v33  ;;  %v5313_v57 = vpop.f32.mrb[124].mxu0  ;;  %v5699_v44 = vpop.f32.mrb[124].mxu1 }
 0x470   : > { %v9375_v9 = vadd.f32 %v5313_v57, %v12891_v4  ;;  %v9439_v5 = vadd.f32 %v5699_v44, %v12894_v6  ;;  %v5315_v55 = vpop.f32.mrb[125].mxu0  ;;  %v5701_v11 = vpop.f32.mrb[125].mxu1  ;;  %v11107_v44 = vld [vmem:[%s13668_s7 + $0xc8] sm:$0xff]  }
 0x471   : > { %v9376_v35 = vadd.f32 %v5315_v55, %v12897_v60  ;;  %v9440_v2 = vadd.f32 %v5701_v11, %v12900_v62  ;;  %v5317_v14 = vpop.f32.mrb[126].mxu0  ;;  %v5703_v51 = vpop.f32.mrb[126].mxu1  ;;  %6862 = vmatprep.mubr.bf16.mxu0 %v5893_v46  ;;  %7248 = vmatprep.mubr.bf16.mxu1 %v5893_v46  ;;  %v11112_v55 = vld [vmem:[%s13668_s7 + $0x90] sm:$0xff]   ;;  %v11113_v11 = vld [vmem:[%s13668_s7 + $0x58] sm:$0xff]  }
 0x472   : > { %v9377_v36 = vadd.f32 %v5317_v14, %v12891_v4  ;;  %v9441_v16 = vadd.f32 %v5703_v51, %v12894_v6  ;;  %v5319_v52 = vpop.f32.mrb[127].mxu0  ;;  %v5705_v58 = vpop.f32.mrb[127].mxu1  ;;  %6863 = vmatmul.mubr.bf16.gmra.mrb[184].mxu0 %v5892_v40  ;;  %7249 = vmatmul.mubr.bf16.gmra.mrb[184].mxu1 %v5892_v40  ;;  %v5828_v26 = vmax.f32 %v9375_v9, 0.0  ;;  %v5830_v19 = vmax.f32 %v9439_v5, 0.0  ;;  %v11105_v40 = vld [vmem:[%s13668_s7 + $0x48] sm:$0xff]   ;;  %v11110_v5 = vld [vmem:[%s13668_s7 + $0x10] sm:$0xff]  }
 0x473   : > { %v9378_v49 = vadd.f32 %v5319_v52, %v12897_v60  ;;  %v9442_v61 = vadd.f32 %v5705_v58, %v12900_v62  ;;  %v5829_v59 = vmax.f32 %v9376_v35, 0.0  ;;  %v5831_v33 = vmax.f32 %v9440_v2, 0.0  ;;  %v11102_v60 = vld [vmem:[%s13668_s7] sm:$0xff]   ;;  %v11108_v9 = vld [vmem:[%s13668_s7 + $0x88] sm:$0xff]   ;;  %v11115_v35 = vld [vmem:[%s13668_s7 + $0xd8] sm:$0xff]  }
 0x474   : > { %v5832_v30 = vmax.f32 %v9377_v36, 0.0  ;;  %v5834_v32 = vmax.f32 %v9441_v16, 0.0  ;;  %v11104_v62 = vld [vmem:[%s13668_s7 + $0x80] sm:$0xff]   ;;  %v11114_v2 = vld [vmem:[%s13668_s7 + $0x18] sm:$0xff]   ;;  %v11121_v16 = vld [vmem:[%s13668_s7 + $0x68] sm:$0xff]  }
 0x475   : > { %v5833_v34 = vmax.f32 %v9378_v49, 0.0  ;;  %v5835_v38 = vmax.f32 %v9442_v61, 0.0  ;;  %v11116_v14 = vld [vmem:[%s13668_s7 + $0x98] sm:$0xff]   ;;  %v11118_v51 = vld [vmem:[%s13668_s7 + $0x20] sm:$0xff]   ;;  %v11123_v52 = vld [vmem:[%s13668_s7 + $0xe8] sm:$0xff]  }
 0x476   : > { %v5896_v46 = vpack.c.bf16 %v5832_v30, %v5828_v26  ;;  %v13282_v4 = vpack.c.bf16 %v5834_v32, %v5830_v19  ;;  %v11120_v36 = vld [vmem:[%s13668_s7 + $0xa0] sm:$0xff]   ;;  %v11122_v58 = vld [vmem:[%s13668_s7 + $0x28] sm:$0xff]   ;;  %v11126_v61 = vld [vmem:[%s13668_s7 + $0x30] sm:$0xff]  }
 0x477   : > { %v5897_v6 = vpack.c.bf16 %v5833_v34, %v5829_v59  ;;  %v13284_v57 = vpack.c.bf16 %v5835_v38, %v5831_v33  ;;  %v11124_v49 = vld [vmem:[%s13668_s7 + $0xa8] sm:$0xff]   ;;  %v11128_v26 = vld [vmem:[%s13668_s7 + $0xb0] sm:$0xff]   ;;  %v11129_v19 = vld [vmem:[%s13668_s7 + $0x78] sm:$0xff]  }
 0x478   : > { %v11131_v30 = vld [vmem:[%s13668_s7 + $0xf8] sm:$0xff]  }
 0x479   : > { %6872 = vmatprep.mubr.bf16.mxu0 %v5897_v6  ;;  %7258 = vmatprep.mubr.bf16.mxu1 %v5897_v6  ;;  %v11130_v32 = vld [vmem:[%s13668_s7 + $0x38] sm:$0xff]  }
 0x47a   : > { %6873 = vmatmul.mubr.bf16.gmra.mrb[188].mxu0 %v5896_v46  ;;  %7259 = vmatmul.mubr.bf16.gmra.mrb[188].mxu1 %v5896_v46  ;;  %v11132_v59 = vld [vmem:[%s13668_s7 + $0xb8] sm:$0xff]  }
 0x47b   : > { %6915 = vmatprep.mubr.bf16.mxu0 %v12912_v27  ;;  %7301 = vmatprep.mubr.bf16.mxu1 %v12912_v27  ;;  %v11106_v27 = vld [vmem:[%s13668_s7 + $0x8] sm:$0xff]  }
 0x482   : > { %6916 = vmatmul.mubr.bf16.vlgmr.msra.gmra.mrb[128].mxu0 %v12910_v47  ;;  %7302 = vmatmul.mubr.bf16.vlgmr.msra.gmra.mrb[128].mxu1 %v12910_v47  ;;  %v11109_v47 = vld [vmem:[%s13668_s7 + $0x50] sm:$0xff]  }
 0x483   : > { %6925 = vmatprep.mubr.bf16.mxu0 %v12948_v17  ;;  %7311 = vmatprep.mubr.bf16.mxu1 %v12948_v17  ;;  %v11111_v17 = vld [vmem:[%s13668_s7 + $0xd0] sm:$0xff]  }
 0x484   : > { %8964 = vmatpush3.bf16.msra.mxu0 %v11102_v60  ;;  %9076 = vmatpush3.bf16.msra.mxu1 %v11104_v62 }
 0x485   : > { %8965 = vmatprep.subr.bf16.mxu0 %v11105_v40  ;;  %9077 = vmatprep.subr.bf16.mxu1 %v11107_v44 }
 0x488   : > { %8966 = vmatpush3.bf16.msra.mxu0 %v11106_v27  ;;  %9078 = vmatpush3.bf16.msra.mxu1 %v11108_v9 }
 0x489   : > { %8967 = vmatprep.subr.bf16.mxu0 %v11109_v47  ;;  %9079 = vmatprep.subr.bf16.mxu1 %v11111_v17 }
 0x48a   : > { %6926 = vmatmul.mubr.bf16.gmra.mrb[132].mxu0 %v12946_v0  ;;  %7312 = vmatmul.mubr.bf16.gmra.mrb[132].mxu1 %v12946_v0  ;;  %v11117_v0 = vld [vmem:[%s13668_s7 + $0x60] sm:$0xff]  }
 0x48b   : > { %6935 = vmatprep.mubr.bf16.mxu0 %v12984_v8  ;;  %7321 = vmatprep.mubr.bf16.mxu1 %v12984_v8  ;;  %v11119_v8 = vld [vmem:[%s13668_s7 + $0xe0] sm:$0xff]  }
 0x48c   : > { %8968 = vmatpush3.bf16.msra.mxu0 %v11110_v5  ;;  %9080 = vmatpush3.bf16.msra.mxu1 %v11112_v55 }
 0x48d   : > { %8969 = vmatprep.subr.bf16.mxu0 %v11113_v11  ;;  %9081 = vmatprep.subr.bf16.mxu1 %v11115_v35 }
 0x490   : > { %8970 = vmatpush3.bf16.msra.mxu0 %v11114_v2  ;;  %9082 = vmatpush3.bf16.msra.mxu1 %v11116_v14 }
 0x491   : > { %8971 = vmatprep.subr.bf16.mxu0 %v11117_v0  ;;  %9083 = vmatprep.subr.bf16.mxu1 %v11119_v8 }
 0x492   : > { %6936 = vmatmul.mubr.bf16.gmra.mrb[136].mxu0 %v12982_v15  ;;  %7322 = vmatmul.mubr.bf16.gmra.mrb[136].mxu1 %v12982_v15  ;;  %v11125_v15 = vld [vmem:[%s13668_s7 + $0x70] sm:$0xff]  }
 0x493   : > { %6945 = vmatprep.mubr.bf16.mxu0 %v13020_v41  ;;  %7331 = vmatprep.mubr.bf16.mxu1 %v13020_v41  ;;  %v11127_v41 = vld [vmem:[%s13668_s7 + $0xf0] sm:$0xff]  }
 0x494   : > { %8972 = vmatpush3.bf16.msra.mxu0 %v11118_v51  ;;  %9084 = vmatpush3.bf16.msra.mxu1 %v11120_v36 }
 0x495   : > { %8973 = vmatprep.subr.bf16.mxu0 %v11121_v16  ;;  %9085 = vmatprep.subr.bf16.mxu1 %v11123_v52 }
 0x498   : > { %8974 = vmatpush3.bf16.msra.mxu0 %v11122_v58  ;;  %9086 = vmatpush3.bf16.msra.mxu1 %v11124_v49 }
 0x499   : > { %8975 = vmatprep.subr.bf16.mxu0 %v11125_v15  ;;  %9087 = vmatprep.subr.bf16.mxu1 %v11127_v41 }
 0x49a   : > { %6946 = vmatmul.mubr.bf16.gmra.mrb[140].mxu0 %v13018_v54  ;;  %7332 = vmatmul.mubr.bf16.gmra.mrb[140].mxu1 %v13018_v54  ;;  %v6028_v54 = vld [vmem:[%s13667_s6] sm:$0xf] }
 0x49b   : > { %6955 = vmatprep.mubr.bf16.mxu0 %v13056_v10  ;;  %7341 = vmatprep.mubr.bf16.mxu1 %v13056_v10  ;;  %v13447_v10 = vrot.slane %v6028_v54, %v12226_v23 }
 0x49c   : > { %8976 = vmatpush3.bf16.msra.mxu0 %v11126_v61  ;;  %9088 = vmatpush3.bf16.msra.mxu1 %v11128_v26 }
 0x49d   : > { %8977 = vmatprep.subr.bf16.mxu0 %v11129_v19  ;;  %9089 = vmatprep.subr.bf16.mxu1 %v11131_v30 }
 0x4a0   : > { %8978 = vmatpush3.bf16.msra.mxu0 %v11130_v32  ;;  %9090 = vmatpush3.bf16.msra.mxu1 %v11132_v59 }
 0x4a2   : > { %6956 = vmatmul.mubr.bf16.gmra.mrb[144].mxu0 %v13054_v31  ;;  %7342 = vmatmul.mubr.bf16.gmra.mrb[144].mxu1 %v13054_v31  ;;  %v13444_v31 = vrot.slane %v6028_v54, %v12224_v22 }
 0x4a3   : > { %6965 = vmatprep.mubr.bf16.mxu0 %v13092_v18  ;;  %7351 = vmatprep.mubr.bf16.mxu1 %v13092_v18  ;;  %v13453_v18 = vrot.slane %v6028_v54, %v12233_v1 }
 0x4aa   : > { %6966 = vmatmul.mubr.bf16.gmra.mrb[148].mxu0 %v13090_v39  ;;  %7352 = vmatmul.mubr.bf16.gmra.mrb[148].mxu1 %v13090_v39  ;;  %v13450_v39 = vrot.slane %v6028_v54, %v12231_v25 }
 0x4ab   : > { %6975 = vmatprep.mubr.bf16.mxu0 %v13128_v13  ;;  %7361 = vmatprep.mubr.bf16.mxu1 %v13128_v13 }
 0x4b2   : > { %6976 = vmatmul.mubr.bf16.gmra.mrb[152].mxu0 %v13126_v3  ;;  %7362 = vmatmul.mubr.bf16.gmra.mrb[152].mxu1 %v13126_v3 }
 0x4b3   : > { %6985 = vmatprep.mubr.bf16.mxu0 %v13164_v7  ;;  %7371 = vmatprep.mubr.bf16.mxu1 %v13164_v7 }
 0x4ba   : > { %6986 = vmatmul.mubr.bf16.gmra.mrb[156].mxu0 %v13162_v50  ;;  %7372 = vmatmul.mubr.bf16.gmra.mrb[156].mxu1 %v13162_v50 }
 0x4bb   : > { %6995 = vmatprep.mubr.bf16.mxu0 %v13194_v45  ;;  %7381 = vmatprep.mubr.bf16.mxu1 %v13194_v45 }
 0x4c2   : > { %6996 = vmatmul.mubr.bf16.gmra.mrb[160].mxu0 %v13192_v56  ;;  %7382 = vmatmul.mubr.bf16.gmra.mrb[160].mxu1 %v13192_v56 }
 0x4c3   : > { %7005 = vmatprep.mubr.bf16.mxu0 %v13206_v21  ;;  %7391 = vmatprep.mubr.bf16.mxu1 %v13206_v21 }
 0x4ca   : > { %7006 = vmatmul.mubr.bf16.gmra.mrb[164].mxu0 %v13204_v12  ;;  %7392 = vmatmul.mubr.bf16.gmra.mrb[164].mxu1 %v13204_v12 }
 0x4cb   : > { %7015 = vmatprep.mubr.bf16.mxu0 %v13218_v53  ;;  %7401 = vmatprep.mubr.bf16.mxu1 %v13218_v53 }
 0x4d2   : > { %7016 = vmatmul.mubr.bf16.gmra.mrb[168].mxu0 %v13216_v63  ;;  %7402 = vmatmul.mubr.bf16.gmra.mrb[168].mxu1 %v13216_v63 }
 0x4d3   : > { %7025 = vmatprep.mubr.bf16.mxu0 %v13230_v37  ;;  %7411 = vmatprep.mubr.bf16.mxu1 %v13230_v37 }
 0x4da   : > { %7026 = vmatmul.mubr.bf16.gmra.mrb[172].mxu0 %v13228_v20  ;;  %7412 = vmatmul.mubr.bf16.gmra.mrb[172].mxu1 %v13228_v20 }
 0x4db   : > { %7035 = vmatprep.mubr.bf16.mxu0 %v13245_v48  ;;  %7421 = vmatprep.mubr.bf16.mxu1 %v13245_v48 }
 0x4e2   : > { %7036 = vmatmul.mubr.bf16.gmra.mrb[176].mxu0 %v13243_v24  ;;  %7422 = vmatmul.mubr.bf16.gmra.mrb[176].mxu1 %v13243_v24 }
 0x4e3   : > { %7045 = vmatprep.mubr.bf16.mxu0 %v13260_v28  ;;  %7431 = vmatprep.mubr.bf16.mxu1 %v13260_v28 }
 0x4ea   : > { %7046 = vmatmul.mubr.bf16.gmra.mrb[180].mxu0 %v13258_v43  ;;  %7432 = vmatmul.mubr.bf16.gmra.mrb[180].mxu1 %v13258_v43 }
 0x4eb   : > { %7055 = vmatprep.mubr.bf16.mxu0 %v13272_v29  ;;  %7441 = vmatprep.mubr.bf16.mxu1 %v13272_v29 }
 0x4f2   : > { %7056 = vmatmul.mubr.bf16.gmra.mrb[184].mxu0 %v13270_v42  ;;  %7442 = vmatmul.mubr.bf16.gmra.mrb[184].mxu1 %v13270_v42 }
 0x4f3   : > { %7065 = vmatprep.mubr.bf16.mxu0 %v13284_v57  ;;  %7451 = vmatprep.mubr.bf16.mxu1 %v13284_v57 }
 0x4fa   : > { %7066 = vmatmul.mubr.bf16.gmra.mrb[188].mxu0 %v13282_v4  ;;  %7452 = vmatmul.mubr.bf16.gmra.mrb[188].mxu1 %v13282_v4 }
 0x555   : > { %v6917_v3 = vpop.f32.mrb[128].mxu0  ;;  %v7303_v13 = vpop.f32.mrb[128].mxu1 }
 0x556   : > { %v9443_v50 = vadd.f32 %v6917_v3, %v13444_v31  ;;  %v9507_v7 = vadd.f32 %v7303_v13, %v13447_v10  ;;  %v6919_v56 = vpop.f32.mrb[129].mxu0  ;;  %v7305_v45 = vpop.f32.mrb[129].mxu1 }
 0x557   : > { %v9444_v22 = vadd.f32 %v6919_v56, %v13450_v39  ;;  %v9508_v12 = vadd.f32 %v7305_v45, %v13453_v18  ;;  %v6921_v23 = vpop.f32.mrb[130].mxu0  ;;  %v7307_v21 = vpop.f32.mrb[130].mxu1 }
 0x558   : > { %v9445_v25 = vadd.f32 %v6921_v23, %v13444_v31  ;;  %v9509_v63 = vadd.f32 %v7307_v21, %v13447_v10  ;;  %v6923_v1 = vpop.f32.mrb[131].mxu0  ;;  %v7309_v53 = vpop.f32.mrb[131].mxu1  ;;  %v7462_v24 = vmax.f32 %v9443_v50, 0.0  ;;  %v7464_v48 = vmax.f32 %v9507_v7, 0.0 }
 0x559   : > { %v9446_v20 = vadd.f32 %v6923_v1, %v13450_v39  ;;  %v9510_v37 = vadd.f32 %v7309_v53, %v13453_v18  ;;  %v7463_v42 = vmax.f32 %v9444_v22, 0.0  ;;  %v7465_v29 = vmax.f32 %v9508_v12, 0.0 }
 0x55a   : > { %v7466_v43 = vmax.f32 %v9445_v25, 0.0  ;;  %v7468_v28 = vmax.f32 %v9509_v63, 0.0 }
 0x55b   : > { %v7467_v33 = vmax.f32 %v9446_v20, 0.0  ;;  %v7469_v34 = vmax.f32 %v9510_v37, 0.0 }
 0x55c   : > { %v7590_v38 = vpack.c.bf16 %v7466_v43, %v7462_v24  ;;  %v7592_v46 = vpack.c.bf16 %v7468_v28, %v7464_v48 }
 0x55d   : > { %v7591_v4 = vpack.c.bf16 %v7467_v33, %v7463_v42  ;;  %v7593_v6 = vpack.c.bf16 %v7469_v34, %v7465_v29  ;;  %v6927_v57 = vpop.f32.mrb[132].mxu0  ;;  %v7313_v60 = vpop.f32.mrb[132].mxu1 }
 0x55e   : > { %v9447_v62 = vadd.f32 %v6927_v57, %v13444_v31  ;;  %v9511_v40 = vadd.f32 %v7313_v60, %v13447_v10  ;;  %v6929_v44 = vpop.f32.mrb[133].mxu0  ;;  %v7315_v27 = vpop.f32.mrb[133].mxu1 }
 0x55f   : > { %v9448_v9 = vadd.f32 %v6929_v44, %v13450_v39  ;;  %v9512_v47 = vadd.f32 %v7315_v27, %v13453_v18  ;;  %v6931_v17 = vpop.f32.mrb[134].mxu0  ;;  %v7317_v5 = vpop.f32.mrb[134].mxu1  ;;  %7949 = vmatprep.mubr.bf16.mxu0 %v7591_v4  ;;  %8110 = vmatprep.mubr.bf16.mxu1 %v7593_v6 }
 0x560   : > { %v9449_v55 = vadd.f32 %v6931_v17, %v13444_v31  ;;  %v9513_v11 = vadd.f32 %v7317_v5, %v13447_v10  ;;  %v6933_v35 = vpop.f32.mrb[135].mxu0  ;;  %v7319_v2 = vpop.f32.mrb[135].mxu1  ;;  %7950 = vmatmul.mubr.bf16.vlgmr.msra.gmra.mrb[192].mxu0 %v7590_v38  ;;  %8111 = vmatmul.mubr.bf16.vlgmr.msra.gmra.mrb[192].mxu1 %v7592_v46  ;;  %v7470_v8 = vmax.f32 %v9447_v62, 0.0  ;;  %v7472_v51 = vmax.f32 %v9511_v40, 0.0 }
 0x561   : > { %v9450_v14 = vadd.f32 %v6933_v35, %v13450_v39  ;;  %v9514_v0 = vadd.f32 %v7319_v2, %v13453_v18  ;;  %v7471_v52 = vmax.f32 %v9448_v9, 0.0  ;;  %v7473_v58 = vmax.f32 %v9512_v47, 0.0 }
 0x562   : > { %v7474_v36 = vmax.f32 %v9449_v55, 0.0  ;;  %v7476_v16 = vmax.f32 %v9513_v11, 0.0 }
 0x563   : > { %v7475_v49 = vmax.f32 %v9450_v14, 0.0  ;;  %v7477_v15 = vmax.f32 %v9514_v0, 0.0 }
 0x564   : > { %v7594_v41 = vpack.c.bf16 %v7474_v36, %v7470_v8  ;;  %v7596_v61 = vpack.c.bf16 %v7476_v16, %v7472_v51 }
 0x565   : > { %v7595_v26 = vpack.c.bf16 %v7475_v49, %v7471_v52  ;;  %v7597_v19 = vpack.c.bf16 %v7477_v15, %v7473_v58  ;;  %v6937_v30 = vpop.f32.mrb[136].mxu0  ;;  %v7323_v32 = vpop.f32.mrb[136].mxu1 }
 0x566   : > { %v9451_v59 = vadd.f32 %v6937_v30, %v13444_v31  ;;  %v9515_v54 = vadd.f32 %v7323_v32, %v13447_v10  ;;  %v6939_v3 = vpop.f32.mrb[137].mxu0  ;;  %v7325_v13 = vpop.f32.mrb[137].mxu1 }
 0x567   : > { %v9452_v50 = vadd.f32 %v6939_v3, %v13450_v39  ;;  %v9516_v7 = vadd.f32 %v7325_v13, %v13453_v18  ;;  %v6941_v56 = vpop.f32.mrb[138].mxu0  ;;  %v7327_v45 = vpop.f32.mrb[138].mxu1  ;;  %7957 = vmatprep.mubr.bf16.mxu0 %v7595_v26  ;;  %8118 = vmatprep.mubr.bf16.mxu1 %v7597_v19 }
 0x568   : > { %v9453_v22 = vadd.f32 %v6941_v56, %v13444_v31  ;;  %v9517_v12 = vadd.f32 %v7327_v45, %v13447_v10  ;;  %v6943_v23 = vpop.f32.mrb[139].mxu0  ;;  %v7329_v21 = vpop.f32.mrb[139].mxu1  ;;  %7958 = vmatmul.mubr.bf16.gmra.mrb[196].mxu0 %v7594_v41  ;;  %8119 = vmatmul.mubr.bf16.gmra.mrb[196].mxu1 %v7596_v61  ;;  %v7478_v1 = vmax.f32 %v9451_v59, 0.0  ;;  %v7480_v53 = vmax.f32 %v9515_v54, 0.0 }
 0x569   : > { %v9454_v25 = vadd.f32 %v6943_v23, %v13450_v39  ;;  %v9518_v63 = vadd.f32 %v7329_v21, %v13453_v18  ;;  %v7479_v24 = vmax.f32 %v9452_v50, 0.0  ;;  %v7481_v48 = vmax.f32 %v9516_v7, 0.0 }
 0x56a   : > { %v7482_v20 = vmax.f32 %v9453_v22, 0.0  ;;  %v7484_v37 = vmax.f32 %v9517_v12, 0.0 }
 0x56b   : > { %v7483_v43 = vmax.f32 %v9454_v25, 0.0  ;;  %v7485_v28 = vmax.f32 %v9518_v63, 0.0 }
 0x56c   : > { %v7598_v42 = vpack.c.bf16 %v7482_v20, %v7478_v1  ;;  %v7600_v29 = vpack.c.bf16 %v7484_v37, %v7480_v53 }
 0x56d   : > { %v7599_v33 = vpack.c.bf16 %v7483_v43, %v7479_v24  ;;  %v7601_v34 = vpack.c.bf16 %v7485_v28, %v7481_v48  ;;  %v6947_v38 = vpop.f32.mrb[140].mxu0  ;;  %v7333_v46 = vpop.f32.mrb[140].mxu1 }
 0x56e   : > { %v9455_v4 = vadd.f32 %v6947_v38, %v13444_v31  ;;  %v9519_v6 = vadd.f32 %v7333_v46, %v13447_v10  ;;  %v6949_v57 = vpop.f32.mrb[141].mxu0  ;;  %v7335_v60 = vpop.f32.mrb[141].mxu1 }
 0x56f   : > { %v9456_v62 = vadd.f32 %v6949_v57, %v13450_v39  ;;  %v9520_v40 = vadd.f32 %v7335_v60, %v13453_v18  ;;  %v6951_v44 = vpop.f32.mrb[142].mxu0  ;;  %v7337_v27 = vpop.f32.mrb[142].mxu1  ;;  %7965 = vmatprep.mubr.bf16.mxu0 %v7599_v33  ;;  %8126 = vmatprep.mubr.bf16.mxu1 %v7601_v34 }
 0x570   : > { %v9457_v9 = vadd.f32 %v6951_v44, %v13444_v31  ;;  %v9521_v47 = vadd.f32 %v7337_v27, %v13447_v10  ;;  %v6953_v17 = vpop.f32.mrb[143].mxu0  ;;  %v7339_v5 = vpop.f32.mrb[143].mxu1  ;;  %7966 = vmatmul.mubr.bf16.gmra.mrb[200].mxu0 %v7598_v42  ;;  %8127 = vmatmul.mubr.bf16.gmra.mrb[200].mxu1 %v7600_v29  ;;  %v7486_v35 = vmax.f32 %v9455_v4, 0.0  ;;  %v7488_v2 = vmax.f32 %v9519_v6, 0.0 }
 0x571   : > { %v9458_v55 = vadd.f32 %v6953_v17, %v13450_v39  ;;  %v9522_v11 = vadd.f32 %v7339_v5, %v13453_v18  ;;  %v7487_v8 = vmax.f32 %v9456_v62, 0.0  ;;  %v7489_v51 = vmax.f32 %v9520_v40, 0.0 }
 0x572   : > { %v7490_v14 = vmax.f32 %v9457_v9, 0.0  ;;  %v7492_v0 = vmax.f32 %v9521_v47, 0.0 }
 0x573   : > { %v7491_v36 = vmax.f32 %v9458_v55, 0.0  ;;  %v7493_v16 = vmax.f32 %v9522_v11, 0.0 }
 0x574   : > { %v7602_v52 = vpack.c.bf16 %v7490_v14, %v7486_v35  ;;  %v7604_v58 = vpack.c.bf16 %v7492_v0, %v7488_v2 }
 0x575   : > { %v7603_v49 = vpack.c.bf16 %v7491_v36, %v7487_v8  ;;  %v7605_v15 = vpack.c.bf16 %v7493_v16, %v7489_v51  ;;  %v6957_v41 = vpop.f32.mrb[144].mxu0  ;;  %v7343_v61 = vpop.f32.mrb[144].mxu1 }
 0x576   : > { %v9459_v26 = vadd.f32 %v6957_v41, %v13444_v31  ;;  %v9523_v19 = vadd.f32 %v7343_v61, %v13447_v10  ;;  %v6959_v30 = vpop.f32.mrb[145].mxu0  ;;  %v7345_v32 = vpop.f32.mrb[145].mxu1 }
 0x577   : > { %v9460_v59 = vadd.f32 %v6959_v30, %v13450_v39  ;;  %v9524_v54 = vadd.f32 %v7345_v32, %v13453_v18  ;;  %v6961_v3 = vpop.f32.mrb[146].mxu0  ;;  %v7347_v13 = vpop.f32.mrb[146].mxu1  ;;  %7973 = vmatprep.mubr.bf16.mxu0 %v7603_v49  ;;  %8134 = vmatprep.mubr.bf16.mxu1 %v7605_v15 }
 0x578   : > { %v9461_v50 = vadd.f32 %v6961_v3, %v13444_v31  ;;  %v9525_v7 = vadd.f32 %v7347_v13, %v13447_v10  ;;  %v6963_v56 = vpop.f32.mrb[147].mxu0  ;;  %v7349_v45 = vpop.f32.mrb[147].mxu1  ;;  %7974 = vmatmul.mubr.bf16.gmra.mrb[204].mxu0 %v7602_v52  ;;  %8135 = vmatmul.mubr.bf16.gmra.mrb[204].mxu1 %v7604_v58  ;;  %v7494_v23 = vmax.f32 %v9459_v26, 0.0  ;;  %v7496_v21 = vmax.f32 %v9523_v19, 0.0 }
 0x579   : > { %v9462_v22 = vadd.f32 %v6963_v56, %v13450_v39  ;;  %v9526_v12 = vadd.f32 %v7349_v45, %v13453_v18  ;;  %v7495_v1 = vmax.f32 %v9460_v59, 0.0  ;;  %v7497_v53 = vmax.f32 %v9524_v54, 0.0 }
 0x57a   : > { %v7498_v25 = vmax.f32 %v9461_v50, 0.0  ;;  %v7500_v63 = vmax.f32 %v9525_v7, 0.0 }
 0x57b   : > { %v7499_v20 = vmax.f32 %v9462_v22, 0.0  ;;  %v7501_v37 = vmax.f32 %v9526_v12, 0.0 }
 0x57c   : > { %v7606_v24 = vpack.c.bf16 %v7498_v25, %v7494_v23  ;;  %v7608_v48 = vpack.c.bf16 %v7500_v63, %v7496_v21 }
 0x57d   : > { %v7607_v43 = vpack.c.bf16 %v7499_v20, %v7495_v1  ;;  %v7609_v28 = vpack.c.bf16 %v7501_v37, %v7497_v53  ;;  %v6967_v42 = vpop.f32.mrb[148].mxu0  ;;  %v7353_v29 = vpop.f32.mrb[148].mxu1 }
 0x57e   : > { %v9463_v33 = vadd.f32 %v6967_v42, %v13444_v31  ;;  %v9527_v34 = vadd.f32 %v7353_v29, %v13447_v10  ;;  %v6969_v38 = vpop.f32.mrb[149].mxu0  ;;  %v7355_v46 = vpop.f32.mrb[149].mxu1 }
 0x57f   : > { %v9464_v4 = vadd.f32 %v6969_v38, %v13450_v39  ;;  %v9528_v6 = vadd.f32 %v7355_v46, %v13453_v18  ;;  %v6971_v57 = vpop.f32.mrb[150].mxu0  ;;  %v7357_v60 = vpop.f32.mrb[150].mxu1  ;;  %7981 = vmatprep.mubr.bf16.mxu0 %v7607_v43  ;;  %8142 = vmatprep.mubr.bf16.mxu1 %v7609_v28 }
 0x580   : > { %v9465_v62 = vadd.f32 %v6971_v57, %v13444_v31  ;;  %v9529_v40 = vadd.f32 %v7357_v60, %v13447_v10  ;;  %v6973_v44 = vpop.f32.mrb[151].mxu0  ;;  %v7359_v27 = vpop.f32.mrb[151].mxu1  ;;  %7982 = vmatmul.mubr.bf16.gmra.mrb[208].mxu0 %v7606_v24  ;;  %8143 = vmatmul.mubr.bf16.gmra.mrb[208].mxu1 %v7608_v48  ;;  %v7502_v17 = vmax.f32 %v9463_v33, 0.0  ;;  %v7504_v5 = vmax.f32 %v9527_v34, 0.0 }
 0x581   : > { %v9466_v9 = vadd.f32 %v6973_v44, %v13450_v39  ;;  %v9530_v47 = vadd.f32 %v7359_v27, %v13453_v18  ;;  %v7503_v35 = vmax.f32 %v9464_v4, 0.0  ;;  %v7505_v2 = vmax.f32 %v9528_v6, 0.0 }
 0x582   : > { %v7506_v55 = vmax.f32 %v9465_v62, 0.0  ;;  %v7508_v11 = vmax.f32 %v9529_v40, 0.0 }
 0x583   : > { %v7507_v14 = vmax.f32 %v9466_v9, 0.0  ;;  %v7509_v0 = vmax.f32 %v9530_v47, 0.0 }
 0x584   : > { %v7610_v8 = vpack.c.bf16 %v7506_v55, %v7502_v17  ;;  %v7612_v51 = vpack.c.bf16 %v7508_v11, %v7504_v5 }
 0x585   : > { %v7611_v36 = vpack.c.bf16 %v7507_v14, %v7503_v35  ;;  %v7613_v16 = vpack.c.bf16 %v7509_v0, %v7505_v2  ;;  %v6977_v52 = vpop.f32.mrb[152].mxu0  ;;  %v7363_v58 = vpop.f32.mrb[152].mxu1 }
 0x586   : > { %v9467_v49 = vadd.f32 %v6977_v52, %v13444_v31  ;;  %v9531_v15 = vadd.f32 %v7363_v58, %v13447_v10  ;;  %v6979_v41 = vpop.f32.mrb[153].mxu0  ;;  %v7365_v61 = vpop.f32.mrb[153].mxu1 }
 0x587   : > { %v9468_v26 = vadd.f32 %v6979_v41, %v13450_v39  ;;  %v9532_v19 = vadd.f32 %v7365_v61, %v13453_v18  ;;  %v6981_v30 = vpop.f32.mrb[154].mxu0  ;;  %v7367_v32 = vpop.f32.mrb[154].mxu1  ;;  %7989 = vmatprep.mubr.bf16.mxu0 %v7611_v36  ;;  %8150 = vmatprep.mubr.bf16.mxu1 %v7613_v16 }
 0x588   : > { %v9469_v59 = vadd.f32 %v6981_v30, %v13444_v31  ;;  %v9533_v54 = vadd.f32 %v7367_v32, %v13447_v10  ;;  %v6983_v3 = vpop.f32.mrb[155].mxu0  ;;  %v7369_v13 = vpop.f32.mrb[155].mxu1  ;;  %7990 = vmatmul.mubr.bf16.gmra.mrb[212].mxu0 %v7610_v8  ;;  %8151 = vmatmul.mubr.bf16.gmra.mrb[212].mxu1 %v7612_v51  ;;  %v7510_v56 = vmax.f32 %v9467_v49, 0.0  ;;  %v7512_v45 = vmax.f32 %v9531_v15, 0.0 }
 0x589   : > { %v9470_v50 = vadd.f32 %v6983_v3, %v13450_v39  ;;  %v9534_v7 = vadd.f32 %v7369_v13, %v13453_v18  ;;  %v7511_v23 = vmax.f32 %v9468_v26, 0.0  ;;  %v7513_v21 = vmax.f32 %v9532_v19, 0.0 }
 0x58a   : > { %v7514_v22 = vmax.f32 %v9469_v59, 0.0  ;;  %v7516_v12 = vmax.f32 %v9533_v54, 0.0 }
 0x58b   : > { %v7515_v25 = vmax.f32 %v9470_v50, 0.0  ;;  %v7517_v63 = vmax.f32 %v9534_v7, 0.0 }
 0x58c   : > { %v7614_v1 = vpack.c.bf16 %v7514_v22, %v7510_v56  ;;  %v7616_v53 = vpack.c.bf16 %v7516_v12, %v7512_v45 }
 0x58d   : > { %v7615_v20 = vpack.c.bf16 %v7515_v25, %v7511_v23  ;;  %v7617_v37 = vpack.c.bf16 %v7517_v63, %v7513_v21  ;;  %v6987_v24 = vpop.f32.mrb[156].mxu0  ;;  %v7373_v48 = vpop.f32.mrb[156].mxu1 }
 0x58e   : > { %v9471_v43 = vadd.f32 %v6987_v24, %v13444_v31  ;;  %v9535_v28 = vadd.f32 %v7373_v48, %v13447_v10  ;;  %v6989_v42 = vpop.f32.mrb[157].mxu0  ;;  %v7375_v29 = vpop.f32.mrb[157].mxu1 }
 0x58f   : > { %v9472_v33 = vadd.f32 %v6989_v42, %v13450_v39  ;;  %v9536_v34 = vadd.f32 %v7375_v29, %v13453_v18  ;;  %v6991_v38 = vpop.f32.mrb[158].mxu0  ;;  %v7377_v46 = vpop.f32.mrb[158].mxu1  ;;  %7997 = vmatprep.mubr.bf16.mxu0 %v7615_v20  ;;  %8158 = vmatprep.mubr.bf16.mxu1 %v7617_v37 }
 0x590   : > { %v9473_v4 = vadd.f32 %v6991_v38, %v13444_v31  ;;  %v9537_v6 = vadd.f32 %v7377_v46, %v13447_v10  ;;  %v6993_v57 = vpop.f32.mrb[159].mxu0  ;;  %v7379_v60 = vpop.f32.mrb[159].mxu1  ;;  %7998 = vmatmul.mubr.bf16.gmra.mrb[216].mxu0 %v7614_v1  ;;  %8159 = vmatmul.mubr.bf16.gmra.mrb[216].mxu1 %v7616_v53  ;;  %v7518_v44 = vmax.f32 %v9471_v43, 0.0  ;;  %v7520_v27 = vmax.f32 %v9535_v28, 0.0 }
 0x591   : > { %v9474_v62 = vadd.f32 %v6993_v57, %v13450_v39  ;;  %v9538_v40 = vadd.f32 %v7379_v60, %v13453_v18  ;;  %v7519_v17 = vmax.f32 %v9472_v33, 0.0  ;;  %v7521_v5 = vmax.f32 %v9536_v34, 0.0 }
 0x592   : > { %v7522_v9 = vmax.f32 %v9473_v4, 0.0  ;;  %v7524_v47 = vmax.f32 %v9537_v6, 0.0 }
 0x593   : > { %v7523_v55 = vmax.f32 %v9474_v62, 0.0  ;;  %v7525_v11 = vmax.f32 %v9538_v40, 0.0 }
 0x594   : > { %v7618_v35 = vpack.c.bf16 %v7522_v9, %v7518_v44  ;;  %v7620_v2 = vpack.c.bf16 %v7524_v47, %v7520_v27 }
 0x595   : > { %v7619_v14 = vpack.c.bf16 %v7523_v55, %v7519_v17  ;;  %v7621_v0 = vpack.c.bf16 %v7525_v11, %v7521_v5  ;;  %v6997_v8 = vpop.f32.mrb[160].mxu0  ;;  %v7383_v51 = vpop.f32.mrb[160].mxu1 }
 0x596   : > { %v9475_v36 = vadd.f32 %v6997_v8, %v13444_v31  ;;  %v9539_v16 = vadd.f32 %v7383_v51, %v13447_v10  ;;  %v6999_v52 = vpop.f32.mrb[161].mxu0  ;;  %v7385_v58 = vpop.f32.mrb[161].mxu1 }
 0x597   : > { %v9476_v49 = vadd.f32 %v6999_v52, %v13450_v39  ;;  %v9540_v15 = vadd.f32 %v7385_v58, %v13453_v18  ;;  %v7001_v41 = vpop.f32.mrb[162].mxu0  ;;  %v7387_v61 = vpop.f32.mrb[162].mxu1  ;;  %8005 = vmatprep.mubr.bf16.mxu0 %v7619_v14  ;;  %8166 = vmatprep.mubr.bf16.mxu1 %v7621_v0 }
 0x598   : > { %v9477_v26 = vadd.f32 %v7001_v41, %v13444_v31  ;;  %v9541_v19 = vadd.f32 %v7387_v61, %v13447_v10  ;;  %v7003_v30 = vpop.f32.mrb[163].mxu0  ;;  %v7389_v32 = vpop.f32.mrb[163].mxu1  ;;  %8006 = vmatmul.mubr.bf16.gmra.mrb[220].mxu0 %v7618_v35  ;;  %8167 = vmatmul.mubr.bf16.gmra.mrb[220].mxu1 %v7620_v2  ;;  %v7526_v3 = vmax.f32 %v9475_v36, 0.0  ;;  %v7528_v13 = vmax.f32 %v9539_v16, 0.0 }
 0x599   : > { %v9478_v59 = vadd.f32 %v7003_v30, %v13450_v39  ;;  %v9542_v54 = vadd.f32 %v7389_v32, %v13453_v18  ;;  %v7527_v56 = vmax.f32 %v9476_v49, 0.0  ;;  %v7529_v45 = vmax.f32 %v9540_v15, 0.0 }
 0x59a   : > { %v7530_v50 = vmax.f32 %v9477_v26, 0.0  ;;  %v7532_v7 = vmax.f32 %v9541_v19, 0.0 }
 0x59b   : > { %v7531_v22 = vmax.f32 %v9478_v59, 0.0  ;;  %v7533_v12 = vmax.f32 %v9542_v54, 0.0 }
 0x59c   : > { %v7622_v23 = vpack.c.bf16 %v7530_v50, %v7526_v3  ;;  %v7624_v21 = vpack.c.bf16 %v7532_v7, %v7528_v13 }
 0x59d   : > { %v7623_v25 = vpack.c.bf16 %v7531_v22, %v7527_v56  ;;  %v7625_v63 = vpack.c.bf16 %v7533_v12, %v7529_v45  ;;  %v7007_v1 = vpop.f32.mrb[164].mxu0  ;;  %v7393_v53 = vpop.f32.mrb[164].mxu1 }
 0x59e   : > { %v9479_v20 = vadd.f32 %v7007_v1, %v13444_v31  ;;  %v9543_v37 = vadd.f32 %v7393_v53, %v13447_v10  ;;  %v7009_v24 = vpop.f32.mrb[165].mxu0  ;;  %v7395_v48 = vpop.f32.mrb[165].mxu1 }
 0x59f   : > { %v9480_v43 = vadd.f32 %v7009_v24, %v13450_v39  ;;  %v9544_v28 = vadd.f32 %v7395_v48, %v13453_v18  ;;  %v7011_v42 = vpop.f32.mrb[166].mxu0  ;;  %v7397_v29 = vpop.f32.mrb[166].mxu1  ;;  %8013 = vmatprep.mubr.bf16.mxu0 %v7623_v25  ;;  %8174 = vmatprep.mubr.bf16.mxu1 %v7625_v63 }
 0x5a0   : > { %v9481_v33 = vadd.f32 %v7011_v42, %v13444_v31  ;;  %v9545_v34 = vadd.f32 %v7397_v29, %v13447_v10  ;;  %v7013_v38 = vpop.f32.mrb[167].mxu0  ;;  %v7399_v46 = vpop.f32.mrb[167].mxu1  ;;  %8014 = vmatmul.mubr.bf16.gmra.mrb[224].mxu0 %v7622_v23  ;;  %8175 = vmatmul.mubr.bf16.gmra.mrb[224].mxu1 %v7624_v21  ;;  %v7534_v57 = vmax.f32 %v9479_v20, 0.0  ;;  %v7536_v60 = vmax.f32 %v9543_v37, 0.0 }
 0x5a1   : > { %v9482_v4 = vadd.f32 %v7013_v38, %v13450_v39  ;;  %v9546_v6 = vadd.f32 %v7399_v46, %v13453_v18  ;;  %v7535_v44 = vmax.f32 %v9480_v43, 0.0  ;;  %v7537_v27 = vmax.f32 %v9544_v28, 0.0 }
 0x5a2   : > { %v7538_v62 = vmax.f32 %v9481_v33, 0.0  ;;  %v7540_v40 = vmax.f32 %v9545_v34, 0.0 }
 0x5a3   : > { %v7539_v9 = vmax.f32 %v9482_v4, 0.0  ;;  %v7541_v47 = vmax.f32 %v9546_v6, 0.0 }
 0x5a4   : > { %v7626_v17 = vpack.c.bf16 %v7538_v62, %v7534_v57  ;;  %v7628_v5 = vpack.c.bf16 %v7540_v40, %v7536_v60 }
 0x5a5   : > { %v7627_v55 = vpack.c.bf16 %v7539_v9, %v7535_v44  ;;  %v7629_v11 = vpack.c.bf16 %v7541_v47, %v7537_v27  ;;  %v7017_v35 = vpop.f32.mrb[168].mxu0  ;;  %v7403_v2 = vpop.f32.mrb[168].mxu1 }
 0x5a6   : > { %v9483_v14 = vadd.f32 %v7017_v35, %v13444_v31  ;;  %v9547_v0 = vadd.f32 %v7403_v2, %v13447_v10  ;;  %v7019_v8 = vpop.f32.mrb[169].mxu0  ;;  %v7405_v51 = vpop.f32.mrb[169].mxu1 }
 0x5a7   : > { %v9484_v36 = vadd.f32 %v7019_v8, %v13450_v39  ;;  %v9548_v16 = vadd.f32 %v7405_v51, %v13453_v18  ;;  %v7021_v52 = vpop.f32.mrb[170].mxu0  ;;  %v7407_v58 = vpop.f32.mrb[170].mxu1  ;;  %8021 = vmatprep.mubr.bf16.mxu0 %v7627_v55  ;;  %8182 = vmatprep.mubr.bf16.mxu1 %v7629_v11 }
 0x5a8   : > { %v9485_v49 = vadd.f32 %v7021_v52, %v13444_v31  ;;  %v9549_v15 = vadd.f32 %v7407_v58, %v13447_v10  ;;  %v7023_v41 = vpop.f32.mrb[171].mxu0  ;;  %v7409_v61 = vpop.f32.mrb[171].mxu1  ;;  %8022 = vmatmul.mubr.bf16.gmra.mrb[228].mxu0 %v7626_v17  ;;  %8183 = vmatmul.mubr.bf16.gmra.mrb[228].mxu1 %v7628_v5  ;;  %v7542_v30 = vmax.f32 %v9483_v14, 0.0  ;;  %v7544_v32 = vmax.f32 %v9547_v0, 0.0 }
 0x5a9   : > { %v9486_v26 = vadd.f32 %v7023_v41, %v13450_v39  ;;  %v9550_v19 = vadd.f32 %v7409_v61, %v13453_v18  ;;  %v7543_v3 = vmax.f32 %v9484_v36, 0.0  ;;  %v7545_v13 = vmax.f32 %v9548_v16, 0.0 }
 0x5aa   : > { %v7546_v59 = vmax.f32 %v9485_v49, 0.0  ;;  %v7548_v54 = vmax.f32 %v9549_v15, 0.0 }
 0x5ab   : > { %v7547_v50 = vmax.f32 %v9486_v26, 0.0  ;;  %v7549_v7 = vmax.f32 %v9550_v19, 0.0 }
 0x5ac   : > { %v7630_v56 = vpack.c.bf16 %v7546_v59, %v7542_v30  ;;  %v7632_v45 = vpack.c.bf16 %v7548_v54, %v7544_v32 }
 0x5ad   : > { %v7631_v22 = vpack.c.bf16 %v7547_v50, %v7543_v3  ;;  %v7633_v12 = vpack.c.bf16 %v7549_v7, %v7545_v13  ;;  %v7027_v23 = vpop.f32.mrb[172].mxu0  ;;  %v7413_v21 = vpop.f32.mrb[172].mxu1 }
 0x5ae   : > { %v9487_v25 = vadd.f32 %v7027_v23, %v13444_v31  ;;  %v9551_v63 = vadd.f32 %v7413_v21, %v13447_v10  ;;  %v7029_v1 = vpop.f32.mrb[173].mxu0  ;;  %v7415_v53 = vpop.f32.mrb[173].mxu1 }
 0x5af   : > { %v9488_v20 = vadd.f32 %v7029_v1, %v13450_v39  ;;  %v9552_v37 = vadd.f32 %v7415_v53, %v13453_v18  ;;  %v7031_v24 = vpop.f32.mrb[174].mxu0  ;;  %v7417_v48 = vpop.f32.mrb[174].mxu1  ;;  %8029 = vmatprep.mubr.bf16.mxu0 %v7631_v22  ;;  %8190 = vmatprep.mubr.bf16.mxu1 %v7633_v12 }
 0x5b0   : > { %v9489_v43 = vadd.f32 %v7031_v24, %v13444_v31  ;;  %v9553_v28 = vadd.f32 %v7417_v48, %v13447_v10  ;;  %v7033_v42 = vpop.f32.mrb[175].mxu0  ;;  %v7419_v29 = vpop.f32.mrb[175].mxu1  ;;  %8030 = vmatmul.mubr.bf16.gmra.mrb[232].mxu0 %v7630_v56  ;;  %8191 = vmatmul.mubr.bf16.gmra.mrb[232].mxu1 %v7632_v45  ;;  %v7550_v38 = vmax.f32 %v9487_v25, 0.0  ;;  %v7552_v46 = vmax.f32 %v9551_v63, 0.0 }
 0x5b1   : > { %v9490_v33 = vadd.f32 %v7033_v42, %v13450_v39  ;;  %v9554_v34 = vadd.f32 %v7419_v29, %v13453_v18  ;;  %v7551_v57 = vmax.f32 %v9488_v20, 0.0  ;;  %v7553_v60 = vmax.f32 %v9552_v37, 0.0 }
 0x5b2   : > { %v7554_v4 = vmax.f32 %v9489_v43, 0.0  ;;  %v7556_v6 = vmax.f32 %v9553_v28, 0.0 }
 0x5b3   : > { %v7555_v62 = vmax.f32 %v9490_v33, 0.0  ;;  %v7557_v40 = vmax.f32 %v9554_v34, 0.0 }
 0x5b4   : > { %v7634_v44 = vpack.c.bf16 %v7554_v4, %v7550_v38  ;;  %v7636_v27 = vpack.c.bf16 %v7556_v6, %v7552_v46 }
 0x5b5   : > { %v7635_v9 = vpack.c.bf16 %v7555_v62, %v7551_v57  ;;  %v7637_v47 = vpack.c.bf16 %v7557_v40, %v7553_v60  ;;  %v7037_v17 = vpop.f32.mrb[176].mxu0  ;;  %v7423_v5 = vpop.f32.mrb[176].mxu1 }
 0x5b6   : > { %v9491_v55 = vadd.f32 %v7037_v17, %v13444_v31  ;;  %v9555_v11 = vadd.f32 %v7423_v5, %v13447_v10  ;;  %v7039_v35 = vpop.f32.mrb[177].mxu0  ;;  %v7425_v2 = vpop.f32.mrb[177].mxu1 }
 0x5b7   : > { %v9492_v14 = vadd.f32 %v7039_v35, %v13450_v39  ;;  %v9556_v0 = vadd.f32 %v7425_v2, %v13453_v18  ;;  %v7041_v8 = vpop.f32.mrb[178].mxu0  ;;  %v7427_v51 = vpop.f32.mrb[178].mxu1  ;;  %8037 = vmatprep.mubr.bf16.mxu0 %v7635_v9  ;;  %8198 = vmatprep.mubr.bf16.mxu1 %v7637_v47 }
 0x5b8   : > { %v9493_v36 = vadd.f32 %v7041_v8, %v13444_v31  ;;  %v9557_v16 = vadd.f32 %v7427_v51, %v13447_v10  ;;  %v7043_v52 = vpop.f32.mrb[179].mxu0  ;;  %v7429_v58 = vpop.f32.mrb[179].mxu1  ;;  %8038 = vmatmul.mubr.bf16.gmra.mrb[236].mxu0 %v7634_v44  ;;  %8199 = vmatmul.mubr.bf16.gmra.mrb[236].mxu1 %v7636_v27  ;;  %v7558_v41 = vmax.f32 %v9491_v55, 0.0  ;;  %v7560_v61 = vmax.f32 %v9555_v11, 0.0 }
 0x5b9   : > { %v9494_v49 = vadd.f32 %v7043_v52, %v13450_v39  ;;  %v9558_v15 = vadd.f32 %v7429_v58, %v13453_v18  ;;  %v7559_v30 = vmax.f32 %v9492_v14, 0.0  ;;  %v7561_v32 = vmax.f32 %v9556_v0, 0.0 }
 0x5ba   : > { %v7562_v26 = vmax.f32 %v9493_v36, 0.0  ;;  %v7564_v19 = vmax.f32 %v9557_v16, 0.0 }
 0x5bb   : > { %v7563_v59 = vmax.f32 %v9494_v49, 0.0  ;;  %v7565_v54 = vmax.f32 %v9558_v15, 0.0 }
 0x5bc   : > { %v7638_v3 = vpack.c.bf16 %v7562_v26, %v7558_v41  ;;  %v7640_v13 = vpack.c.bf16 %v7564_v19, %v7560_v61 }
 0x5bd   : > { %v7639_v50 = vpack.c.bf16 %v7563_v59, %v7559_v30  ;;  %v7641_v7 = vpack.c.bf16 %v7565_v54, %v7561_v32  ;;  %v7047_v56 = vpop.f32.mrb[180].mxu0  ;;  %v7433_v45 = vpop.f32.mrb[180].mxu1 }
 0x5be   : > { %v9495_v22 = vadd.f32 %v7047_v56, %v13444_v31  ;;  %v9559_v12 = vadd.f32 %v7433_v45, %v13447_v10  ;;  %v7049_v23 = vpop.f32.mrb[181].mxu0  ;;  %v7435_v21 = vpop.f32.mrb[181].mxu1 }
 0x5bf   : > { %v9496_v25 = vadd.f32 %v7049_v23, %v13450_v39  ;;  %v9560_v63 = vadd.f32 %v7435_v21, %v13453_v18  ;;  %v7051_v1 = vpop.f32.mrb[182].mxu0  ;;  %v7437_v53 = vpop.f32.mrb[182].mxu1  ;;  %8045 = vmatprep.mubr.bf16.mxu0 %v7639_v50  ;;  %8206 = vmatprep.mubr.bf16.mxu1 %v7641_v7 }
 0x5c0   : > { %v9497_v20 = vadd.f32 %v7051_v1, %v13444_v31  ;;  %v9561_v37 = vadd.f32 %v7437_v53, %v13447_v10  ;;  %v7053_v24 = vpop.f32.mrb[183].mxu0  ;;  %v7439_v48 = vpop.f32.mrb[183].mxu1  ;;  %8046 = vmatmul.mubr.bf16.gmra.mrb[240].mxu0 %v7638_v3  ;;  %8207 = vmatmul.mubr.bf16.gmra.mrb[240].mxu1 %v7640_v13  ;;  %v7566_v42 = vmax.f32 %v9495_v22, 0.0  ;;  %v7568_v29 = vmax.f32 %v9559_v12, 0.0 }
 0x5c1   : > { %v9498_v43 = vadd.f32 %v7053_v24, %v13450_v39  ;;  %v9562_v28 = vadd.f32 %v7439_v48, %v13453_v18  ;;  %v7567_v38 = vmax.f32 %v9496_v25, 0.0  ;;  %v7569_v46 = vmax.f32 %v9560_v63, 0.0 }
 0x5c2   : > { %v7570_v33 = vmax.f32 %v9497_v20, 0.0  ;;  %v7572_v34 = vmax.f32 %v9561_v37, 0.0 }
 0x5c3   : > { %v7571_v4 = vmax.f32 %v9498_v43, 0.0  ;;  %v7573_v6 = vmax.f32 %v9562_v28, 0.0 }
 0x5c4   : > { %v7642_v57 = vpack.c.bf16 %v7570_v33, %v7566_v42  ;;  %v7644_v60 = vpack.c.bf16 %v7572_v34, %v7568_v29 }
 0x5c5   : > { %v7643_v62 = vpack.c.bf16 %v7571_v4, %v7567_v38  ;;  %v7645_v40 = vpack.c.bf16 %v7573_v6, %v7569_v46  ;;  %v7057_v44 = vpop.f32.mrb[184].mxu0  ;;  %v7443_v27 = vpop.f32.mrb[184].mxu1 }
 0x5c6   : > { %v9499_v9 = vadd.f32 %v7057_v44, %v13444_v31  ;;  %v9563_v47 = vadd.f32 %v7443_v27, %v13447_v10  ;;  %v7059_v17 = vpop.f32.mrb[185].mxu0  ;;  %v7445_v5 = vpop.f32.mrb[185].mxu1 }
 0x5c7   : > { %v9500_v55 = vadd.f32 %v7059_v17, %v13450_v39  ;;  %v9564_v11 = vadd.f32 %v7445_v5, %v13453_v18  ;;  %v7061_v35 = vpop.f32.mrb[186].mxu0  ;;  %v7447_v2 = vpop.f32.mrb[186].mxu1  ;;  %8053 = vmatprep.mubr.bf16.mxu0 %v7643_v62  ;;  %8214 = vmatprep.mubr.bf16.mxu1 %v7645_v40 }
 0x5c8   : > { %v9501_v14 = vadd.f32 %v7061_v35, %v13444_v31  ;;  %v9565_v0 = vadd.f32 %v7447_v2, %v13447_v10  ;;  %v7063_v8 = vpop.f32.mrb[187].mxu0  ;;  %v7449_v51 = vpop.f32.mrb[187].mxu1  ;;  %8054 = vmatmul.mubr.bf16.gmra.mrb[244].mxu0 %v7642_v57  ;;  %8215 = vmatmul.mubr.bf16.gmra.mrb[244].mxu1 %v7644_v60  ;;  %v7574_v52 = vmax.f32 %v9499_v9, 0.0  ;;  %v7576_v58 = vmax.f32 %v9563_v47, 0.0 }
 0x5c9   : > { %v9502_v36 = vadd.f32 %v7063_v8, %v13450_v39  ;;  %v9566_v16 = vadd.f32 %v7449_v51, %v13453_v18  ;;  %v7575_v41 = vmax.f32 %v9500_v55, 0.0  ;;  %v7577_v61 = vmax.f32 %v9564_v11, 0.0 }
 0x5ca   : > { %v7578_v49 = vmax.f32 %v9501_v14, 0.0  ;;  %v7580_v15 = vmax.f32 %v9565_v0, 0.0 }
 0x5cb   : > { %v7579_v26 = vmax.f32 %v9502_v36, 0.0  ;;  %v7581_v19 = vmax.f32 %v9566_v16, 0.0 }
 0x5cc   : > { %v7646_v30 = vpack.c.bf16 %v7578_v49, %v7574_v52  ;;  %v7648_v32 = vpack.c.bf16 %v7580_v15, %v7576_v58 }
 0x5cd   : > { %v7647_v59 = vpack.c.bf16 %v7579_v26, %v7575_v41  ;;  %v7649_v54 = vpack.c.bf16 %v7581_v19, %v7577_v61  ;;  %v7067_v3 = vpop.f32.mrb[188].mxu0  ;;  %v7453_v13 = vpop.f32.mrb[188].mxu1 }
 0x5ce   : > { %v9503_v50 = vadd.f32 %v7067_v3, %v13444_v31  ;;  %v9567_v7 = vadd.f32 %v7453_v13, %v13447_v10  ;;  %v7069_v56 = vpop.f32.mrb[189].mxu0  ;;  %v7455_v45 = vpop.f32.mrb[189].mxu1 }
 0x5cf   : > { %v9504_v22 = vadd.f32 %v7069_v56, %v13450_v39  ;;  %v9568_v12 = vadd.f32 %v7455_v45, %v13453_v18  ;;  %v7071_v23 = vpop.f32.mrb[190].mxu0  ;;  %v7457_v21 = vpop.f32.mrb[190].mxu1  ;;  %8061 = vmatprep.mubr.bf16.mxu0 %v7647_v59  ;;  %8222 = vmatprep.mubr.bf16.mxu1 %v7649_v54 }
 0x5d0   : > { %v9505_v25 = vadd.f32 %v7071_v23, %v13444_v31  ;;  %v9569_v63 = vadd.f32 %v7457_v21, %v13447_v10  ;;  %v7073_v1 = vpop.f32.mrb[191].mxu0  ;;  %v7459_v53 = vpop.f32.mrb[191].mxu1  ;;  %8062 = vmatmul.mubr.bf16.gmra.mrb[248].mxu0 %v7646_v30  ;;  %8223 = vmatmul.mubr.bf16.gmra.mrb[248].mxu1 %v7648_v32  ;;  %v7582_v24 = vmax.f32 %v9503_v50, 0.0  ;;  %v7584_v48 = vmax.f32 %v9567_v7, 0.0 }
 0x5d1   : > { %v9506_v20 = vadd.f32 %v7073_v1, %v13450_v39  ;;  %v9570_v37 = vadd.f32 %v7459_v53, %v13453_v18  ;;  %v7583_v42 = vmax.f32 %v9504_v22, 0.0  ;;  %v7585_v29 = vmax.f32 %v9568_v12, 0.0  ;;  %v13586_v18 = vld [vmem:[%s13669_s8] ss:$0 sm:$0xff] }
 0x5d2   : > { %v7586_v43 = vmax.f32 %v9505_v25, 0.0  ;;  %v7588_v28 = vmax.f32 %v9569_v63, 0.0 }
 0x5d3   : > { %v7587_v33 = vmax.f32 %v9506_v20, 0.0  ;;  %v7589_v34 = vmax.f32 %v9570_v37, 0.0 }
 0x5d4   : > { %v7650_v31 = vpack.c.bf16 %v7586_v43, %v7582_v24  ;;  %v7652_v38 = vpack.c.bf16 %v7588_v28, %v7584_v48 }
 0x5d5   : > { %v7651_v10 = vpack.c.bf16 %v7587_v33, %v7583_v42  ;;  %v7653_v46 = vpack.c.bf16 %v7589_v34, %v7585_v29 }
 0x5d7   : > { %8069 = vmatprep.mubr.bf16.mxu0 %v7651_v10  ;;  %8230 = vmatprep.mubr.bf16.mxu1 %v7653_v46 }
 0x5d8   : > { %8070 = vmatmul.mubr.bf16.gmra.mrb[252].mxu0 %v7650_v31  ;;  %8231 = vmatmul.mubr.bf16.gmra.mrb[252].mxu1 %v7652_v38 }
 0x633   : > { %v8979_v39 = vpop.f32.mrb[192].mxu0  ;;  %v9091_v4 = vpop.f32.mrb[192].mxu1 }
 0x634   : > { %v8980_v6 = vpop.f32.mrb[193].mxu0  ;;  %v9092_v57 = vpop.f32.mrb[193].mxu1 }
 0x635   : > { %v8981_v60 = vadd.f32 %v8980_v6, %v8979_v39  ;;  %v9093_v62 = vadd.f32 %v9092_v57, %v9091_v4  ;;  %v8982_v40 = vpop.f32.mrb[194].mxu0  ;;  %v9094_v44 = vpop.f32.mrb[194].mxu1 }
 0x636   : > { %v8983_v27 = vpop.f32.mrb[195].mxu0  ;;  %v9095_v9 = vpop.f32.mrb[195].mxu1 }
 0x637   : > { %v7952_v47 = vadd.f32 %v8981_v60, %v13586_v18  ;;  %v8984_v17 = vadd.f32 %v8983_v27, %v8982_v40  ;;  %v9096_v5 = vadd.f32 %v9095_v9, %v9094_v44 }
 0x639   : > { %v8113_v55 = vadd.f32 %v9093_v62, %v7952_v47  ;;  %v7955_v11 = vadd.f32 %v8984_v17, %v13586_v18 }
 0x63b   : > { %8239 = vst [vmem:[%s13593_s13] sm:$0xff] %v8113_v55  ;;  %v8116_v35 = vadd.f32 %v9096_v5, %v7955_v11  ;;  %v8985_v2 = vpop.f32.mrb[196].mxu0  ;;  %v9097_v14 = vpop.f32.mrb[196].mxu1 }
 0x63c   : > { %v8986_v0 = vpop.f32.mrb[197].mxu0  ;;  %v9098_v8 = vpop.f32.mrb[197].mxu1 }
 0x63d   : > { %8240 = vst [vmem:[%s13593_s13 + $0x8] sm:$0xff] %v8116_v35  ;;  %v8987_v51 = vadd.f32 %v8986_v0, %v8985_v2  ;;  %v9099_v36 = vadd.f32 %v9098_v8, %v9097_v14  ;;  %v8988_v16 = vpop.f32.mrb[198].mxu0  ;;  %v9100_v52 = vpop.f32.mrb[198].mxu1 }
 0x63e   : > { %v8989_v58 = vpop.f32.mrb[199].mxu0  ;;  %v9101_v49 = vpop.f32.mrb[199].mxu1 }
 0x63f   : > { %v7960_v15 = vadd.f32 %v8987_v51, %v13586_v18  ;;  %v8990_v41 = vadd.f32 %v8989_v58, %v8988_v16  ;;  %v9102_v61 = vadd.f32 %v9101_v49, %v9100_v52 }
 0x641   : > { %v8121_v26 = vadd.f32 %v9099_v36, %v7960_v15  ;;  %v7963_v19 = vadd.f32 %v8990_v41, %v13586_v18 }
 0x643   : > { %8241 = vst [vmem:[%s13593_s13 + $0x10] sm:$0xff] %v8121_v26  ;;  %v8124_v30 = vadd.f32 %v9102_v61, %v7963_v19  ;;  %v8991_v32 = vpop.f32.mrb[200].mxu0  ;;  %v9103_v59 = vpop.f32.mrb[200].mxu1 }
 0x644   : > { %v8992_v54 = vpop.f32.mrb[201].mxu0  ;;  %v9104_v3 = vpop.f32.mrb[201].mxu1 }
 0x645   : > { %8242 = vst [vmem:[%s13593_s13 + $0x18] sm:$0xff] %v8124_v30  ;;  %v8993_v13 = vadd.f32 %v8992_v54, %v8991_v32  ;;  %v9105_v50 = vadd.f32 %v9104_v3, %v9103_v59  ;;  %v8994_v7 = vpop.f32.mrb[202].mxu0  ;;  %v9106_v56 = vpop.f32.mrb[202].mxu1 }
 0x646   : > { %v8995_v45 = vpop.f32.mrb[203].mxu0  ;;  %v9107_v22 = vpop.f32.mrb[203].mxu1 }
 0x647   : > { %v7968_v12 = vadd.f32 %v8993_v13, %v13586_v18  ;;  %v8996_v23 = vadd.f32 %v8995_v45, %v8994_v7  ;;  %v9108_v21 = vadd.f32 %v9107_v22, %v9106_v56 }
 0x649   : > { %v8129_v25 = vadd.f32 %v9105_v50, %v7968_v12  ;;  %v7971_v63 = vadd.f32 %v8996_v23, %v13586_v18 }
 0x64b   : > { %8243 = vst [vmem:[%s13593_s13 + $0x20] sm:$0xff] %v8129_v25  ;;  %v8132_v1 = vadd.f32 %v9108_v21, %v7971_v63  ;;  %v8997_v53 = vpop.f32.mrb[204].mxu0  ;;  %v9109_v20 = vpop.f32.mrb[204].mxu1 }
 0x64c   : > { %v8998_v37 = vpop.f32.mrb[205].mxu0  ;;  %v9110_v24 = vpop.f32.mrb[205].mxu1 }
 0x64d   : > { %8244 = vst [vmem:[%s13593_s13 + $0x28] sm:$0xff] %v8132_v1  ;;  %v8999_v48 = vadd.f32 %v8998_v37, %v8997_v53  ;;  %v9111_v43 = vadd.f32 %v9110_v24, %v9109_v20  ;;  %v9000_v28 = vpop.f32.mrb[206].mxu0  ;;  %v9112_v42 = vpop.f32.mrb[206].mxu1 }
 0x64e   : > { %v9001_v29 = vpop.f32.mrb[207].mxu0  ;;  %v9113_v33 = vpop.f32.mrb[207].mxu1 }
 0x64f   : > { %v7976_v34 = vadd.f32 %v8999_v48, %v13586_v18  ;;  %v9002_v31 = vadd.f32 %v9001_v29, %v9000_v28  ;;  %v9114_v38 = vadd.f32 %v9113_v33, %v9112_v42 }
 0x651   : > { %v8137_v10 = vadd.f32 %v9111_v43, %v7976_v34  ;;  %v7979_v46 = vadd.f32 %v9002_v31, %v13586_v18 }
 0x653   : > { %8245 = vst [vmem:[%s13593_s13 + $0x30] sm:$0xff] %v8137_v10  ;;  %v8140_v39 = vadd.f32 %v9114_v38, %v7979_v46  ;;  %v9003_v4 = vpop.f32.mrb[208].mxu0  ;;  %v9115_v6 = vpop.f32.mrb[208].mxu1 }
 0x654   : > { %v9004_v57 = vpop.f32.mrb[209].mxu0  ;;  %v9116_v60 = vpop.f32.mrb[209].mxu1 }
 0x655   : > { %8246 = vst [vmem:[%s13593_s13 + $0x38] sm:$0xff] %v8140_v39  ;;  %v9005_v62 = vadd.f32 %v9004_v57, %v9003_v4  ;;  %v9117_v40 = vadd.f32 %v9116_v60, %v9115_v6  ;;  %v9006_v44 = vpop.f32.mrb[210].mxu0  ;;  %v9118_v27 = vpop.f32.mrb[210].mxu1 }
 0x656   : > { %v9007_v9 = vpop.f32.mrb[211].mxu0  ;;  %v9119_v47 = vpop.f32.mrb[211].mxu1 }
 0x657   : > { %v7984_v17 = vadd.f32 %v9005_v62, %v13586_v18  ;;  %v9008_v5 = vadd.f32 %v9007_v9, %v9006_v44  ;;  %v9120_v55 = vadd.f32 %v9119_v47, %v9118_v27 }
 0x659   : > { %v8145_v11 = vadd.f32 %v9117_v40, %v7984_v17  ;;  %v7987_v35 = vadd.f32 %v9008_v5, %v13586_v18 }
 0x65b   : > { %8247 = vst [vmem:[%s13593_s13 + $0x40] sm:$0xff] %v8145_v11  ;;  %v8148_v2 = vadd.f32 %v9120_v55, %v7987_v35  ;;  %v9009_v14 = vpop.f32.mrb[212].mxu0  ;;  %v9121_v0 = vpop.f32.mrb[212].mxu1 }
 0x65c   : > { %v9010_v8 = vpop.f32.mrb[213].mxu0  ;;  %v9122_v51 = vpop.f32.mrb[213].mxu1 }
 0x65d   : > { %8248 = vst [vmem:[%s13593_s13 + $0x48] sm:$0xff] %v8148_v2  ;;  %v9011_v36 = vadd.f32 %v9010_v8, %v9009_v14  ;;  %v9123_v16 = vadd.f32 %v9122_v51, %v9121_v0  ;;  %v9012_v52 = vpop.f32.mrb[214].mxu0  ;;  %v9124_v58 = vpop.f32.mrb[214].mxu1 }
 0x65e   : > { %v9013_v49 = vpop.f32.mrb[215].mxu0  ;;  %v9125_v15 = vpop.f32.mrb[215].mxu1 }
 0x65f   : > { %v7992_v41 = vadd.f32 %v9011_v36, %v13586_v18  ;;  %v9014_v61 = vadd.f32 %v9013_v49, %v9012_v52  ;;  %v9126_v26 = vadd.f32 %v9125_v15, %v9124_v58 }
 0x661   : > { %v8153_v19 = vadd.f32 %v9123_v16, %v7992_v41  ;;  %v7995_v30 = vadd.f32 %v9014_v61, %v13586_v18 }
 0x663   : > { %8249 = vst [vmem:[%s13593_s13 + $0x50] sm:$0xff] %v8153_v19  ;;  %v8156_v32 = vadd.f32 %v9126_v26, %v7995_v30  ;;  %v9015_v59 = vpop.f32.mrb[216].mxu0  ;;  %v9127_v54 = vpop.f32.mrb[216].mxu1 }
 0x664   : > { %v9016_v3 = vpop.f32.mrb[217].mxu0  ;;  %v9128_v13 = vpop.f32.mrb[217].mxu1 }
 0x665   : > { %8250 = vst [vmem:[%s13593_s13 + $0x58] sm:$0xff] %v8156_v32  ;;  %v9017_v50 = vadd.f32 %v9016_v3, %v9015_v59  ;;  %v9129_v7 = vadd.f32 %v9128_v13, %v9127_v54  ;;  %v9018_v56 = vpop.f32.mrb[218].mxu0  ;;  %v9130_v45 = vpop.f32.mrb[218].mxu1 }
 0x666   : > { %v9019_v22 = vpop.f32.mrb[219].mxu0  ;;  %v9131_v12 = vpop.f32.mrb[219].mxu1 }
 0x667   : > { %v8000_v23 = vadd.f32 %v9017_v50, %v13586_v18  ;;  %v9020_v21 = vadd.f32 %v9019_v22, %v9018_v56  ;;  %v9132_v25 = vadd.f32 %v9131_v12, %v9130_v45 }
 0x669   : > { %v8161_v63 = vadd.f32 %v9129_v7, %v8000_v23  ;;  %v8003_v1 = vadd.f32 %v9020_v21, %v13586_v18 }
 0x66b   : > { %8251 = vst [vmem:[%s13593_s13 + $0x60] sm:$0xff] %v8161_v63  ;;  %v8164_v53 = vadd.f32 %v9132_v25, %v8003_v1  ;;  %v9021_v20 = vpop.f32.mrb[220].mxu0  ;;  %v9133_v37 = vpop.f32.mrb[220].mxu1 }
 0x66c   : > { %v9022_v24 = vpop.f32.mrb[221].mxu0  ;;  %v9134_v48 = vpop.f32.mrb[221].mxu1 }
 0x66d   : > { %8252 = vst [vmem:[%s13593_s13 + $0x68] sm:$0xff] %v8164_v53  ;;  %v9023_v43 = vadd.f32 %v9022_v24, %v9021_v20  ;;  %v9135_v28 = vadd.f32 %v9134_v48, %v9133_v37  ;;  %v9024_v42 = vpop.f32.mrb[222].mxu0  ;;  %v9136_v29 = vpop.f32.mrb[222].mxu1 }
 0x66e   : > { %v9025_v33 = vpop.f32.mrb[223].mxu0  ;;  %v9137_v34 = vpop.f32.mrb[223].mxu1 }
 0x66f   : > { %v8008_v31 = vadd.f32 %v9023_v43, %v13586_v18  ;;  %v9026_v38 = vadd.f32 %v9025_v33, %v9024_v42  ;;  %v9138_v10 = vadd.f32 %v9137_v34, %v9136_v29 }
 0x671   : > { %v8169_v46 = vadd.f32 %v9135_v28, %v8008_v31  ;;  %v8011_v39 = vadd.f32 %v9026_v38, %v13586_v18 }
 0x673   : > { %8253 = vst [vmem:[%s13593_s13 + $0x70] sm:$0xff] %v8169_v46  ;;  %v8172_v4 = vadd.f32 %v9138_v10, %v8011_v39  ;;  %v9027_v6 = vpop.f32.mrb[224].mxu0  ;;  %v9139_v57 = vpop.f32.mrb[224].mxu1 }
 0x674   : > { %v9028_v60 = vpop.f32.mrb[225].mxu0  ;;  %v9140_v62 = vpop.f32.mrb[225].mxu1 }
 0x675   : > { %8254 = vst [vmem:[%s13593_s13 + $0x78] sm:$0xff] %v8172_v4  ;;  %v9029_v40 = vadd.f32 %v9028_v60, %v9027_v6  ;;  %v9141_v44 = vadd.f32 %v9140_v62, %v9139_v57  ;;  %v9030_v27 = vpop.f32.mrb[226].mxu0  ;;  %v9142_v9 = vpop.f32.mrb[226].mxu1 }
 0x676   : > { %v9031_v47 = vpop.f32.mrb[227].mxu0  ;;  %v9143_v17 = vpop.f32.mrb[227].mxu1 }
 0x677   : > { %v8016_v5 = vadd.f32 %v9029_v40, %v13586_v18  ;;  %v9032_v55 = vadd.f32 %v9031_v47, %v9030_v27  ;;  %v9144_v11 = vadd.f32 %v9143_v17, %v9142_v9 }
 0x679   : > { %v8177_v35 = vadd.f32 %v9141_v44, %v8016_v5  ;;  %v8019_v2 = vadd.f32 %v9032_v55, %v13586_v18 }
 0x67b   : > { %8255 = vst [vmem:[%s13593_s13 + $0x80] sm:$0xff] %v8177_v35  ;;  %v8180_v14 = vadd.f32 %v9144_v11, %v8019_v2  ;;  %v9033_v0 = vpop.f32.mrb[228].mxu0  ;;  %v9145_v8 = vpop.f32.mrb[228].mxu1 }
 0x67c   : > { %v9034_v51 = vpop.f32.mrb[229].mxu0  ;;  %v9146_v36 = vpop.f32.mrb[229].mxu1 }
 0x67d   : > { %8256 = vst [vmem:[%s13593_s13 + $0x88] sm:$0xff] %v8180_v14  ;;  %v9035_v16 = vadd.f32 %v9034_v51, %v9033_v0  ;;  %v9147_v52 = vadd.f32 %v9146_v36, %v9145_v8  ;;  %v9036_v58 = vpop.f32.mrb[230].mxu0  ;;  %v9148_v49 = vpop.f32.mrb[230].mxu1 }
 0x67e   : > { %v9037_v15 = vpop.f32.mrb[231].mxu0  ;;  %v9149_v41 = vpop.f32.mrb[231].mxu1 }
 0x67f   : > { %v8024_v61 = vadd.f32 %v9035_v16, %v13586_v18  ;;  %v9038_v26 = vadd.f32 %v9037_v15, %v9036_v58  ;;  %v9150_v19 = vadd.f32 %v9149_v41, %v9148_v49 }
 0x681   : > { %v8185_v30 = vadd.f32 %v9147_v52, %v8024_v61  ;;  %v8027_v32 = vadd.f32 %v9038_v26, %v13586_v18 }
 0x683   : > { %8257 = vst [vmem:[%s13593_s13 + $0x90] sm:$0xff] %v8185_v30  ;;  %v8188_v59 = vadd.f32 %v9150_v19, %v8027_v32  ;;  %v9039_v54 = vpop.f32.mrb[232].mxu0  ;;  %v9151_v3 = vpop.f32.mrb[232].mxu1 }
 0x684   : > { %v9040_v13 = vpop.f32.mrb[233].mxu0  ;;  %v9152_v50 = vpop.f32.mrb[233].mxu1 }
 0x685   : > { %8258 = vst [vmem:[%s13593_s13 + $0x98] sm:$0xff] %v8188_v59  ;;  %v9041_v7 = vadd.f32 %v9040_v13, %v9039_v54  ;;  %v9153_v56 = vadd.f32 %v9152_v50, %v9151_v3  ;;  %v9042_v45 = vpop.f32.mrb[234].mxu0  ;;  %v9154_v22 = vpop.f32.mrb[234].mxu1 }
 0x686   : > { %v9043_v12 = vpop.f32.mrb[235].mxu0  ;;  %v9155_v23 = vpop.f32.mrb[235].mxu1 }
 0x687   : > { %v8032_v21 = vadd.f32 %v9041_v7, %v13586_v18  ;;  %v9044_v25 = vadd.f32 %v9043_v12, %v9042_v45  ;;  %v9156_v63 = vadd.f32 %v9155_v23, %v9154_v22 }
 0x689   : > { %v8193_v1 = vadd.f32 %v9153_v56, %v8032_v21  ;;  %v8035_v53 = vadd.f32 %v9044_v25, %v13586_v18 }
 0x68b   : > { %8259 = vst [vmem:[%s13593_s13 + $0xa0] sm:$0xff] %v8193_v1  ;;  %v8196_v20 = vadd.f32 %v9156_v63, %v8035_v53  ;;  %v9045_v37 = vpop.f32.mrb[236].mxu0  ;;  %v9157_v24 = vpop.f32.mrb[236].mxu1 }
 0x68c   : > { %v9046_v48 = vpop.f32.mrb[237].mxu0  ;;  %v9158_v43 = vpop.f32.mrb[237].mxu1 }
 0x68d   : > { %8260 = vst [vmem:[%s13593_s13 + $0xa8] sm:$0xff] %v8196_v20  ;;  %v9047_v28 = vadd.f32 %v9046_v48, %v9045_v37  ;;  %v9159_v42 = vadd.f32 %v9158_v43, %v9157_v24  ;;  %v9048_v29 = vpop.f32.mrb[238].mxu0  ;;  %v9160_v33 = vpop.f32.mrb[238].mxu1 }
 0x68e   : > { %v9049_v34 = vpop.f32.mrb[239].mxu0  ;;  %v9161_v31 = vpop.f32.mrb[239].mxu1 }
 0x68f   : > { %v8040_v38 = vadd.f32 %v9047_v28, %v13586_v18  ;;  %v9050_v10 = vadd.f32 %v9049_v34, %v9048_v29  ;;  %v9162_v46 = vadd.f32 %v9161_v31, %v9160_v33 }
 0x691   : > { %v8201_v39 = vadd.f32 %v9159_v42, %v8040_v38  ;;  %v8043_v4 = vadd.f32 %v9050_v10, %v13586_v18 }
 0x693   : > { %8261 = vst [vmem:[%s13593_s13 + $0xb0] sm:$0xff] %v8201_v39  ;;  %v8204_v6 = vadd.f32 %v9162_v46, %v8043_v4  ;;  %v9051_v57 = vpop.f32.mrb[240].mxu0  ;;  %v9163_v60 = vpop.f32.mrb[240].mxu1 }
 0x694   : > { %v9052_v62 = vpop.f32.mrb[241].mxu0  ;;  %v9164_v40 = vpop.f32.mrb[241].mxu1 }
 0x695   : > { %8262 = vst [vmem:[%s13593_s13 + $0xb8] sm:$0xff] %v8204_v6  ;;  %v9053_v44 = vadd.f32 %v9052_v62, %v9051_v57  ;;  %v9165_v27 = vadd.f32 %v9164_v40, %v9163_v60  ;;  %v9054_v9 = vpop.f32.mrb[242].mxu0  ;;  %v9166_v47 = vpop.f32.mrb[242].mxu1 }
 0x696   : > { %v9055_v17 = vpop.f32.mrb[243].mxu0  ;;  %v9167_v5 = vpop.f32.mrb[243].mxu1 }
 0x697   : > { %v8048_v55 = vadd.f32 %v9053_v44, %v13586_v18  ;;  %v9056_v11 = vadd.f32 %v9055_v17, %v9054_v9  ;;  %v9168_v35 = vadd.f32 %v9167_v5, %v9166_v47 }
 0x699   : > { %v8209_v2 = vadd.f32 %v9165_v27, %v8048_v55  ;;  %v8051_v14 = vadd.f32 %v9056_v11, %v13586_v18 }
 0x69b   : > { %8263 = vst [vmem:[%s13593_s13 + $0xc0] sm:$0xff] %v8209_v2  ;;  %v8212_v0 = vadd.f32 %v9168_v35, %v8051_v14  ;;  %v9057_v8 = vpop.f32.mrb[244].mxu0  ;;  %v9169_v51 = vpop.f32.mrb[244].mxu1 }
 0x69c   : > { %v9058_v36 = vpop.f32.mrb[245].mxu0  ;;  %v9170_v16 = vpop.f32.mrb[245].mxu1 }
 0x69d   : > { %8264 = vst [vmem:[%s13593_s13 + $0xc8] sm:$0xff] %v8212_v0  ;;  %v9059_v52 = vadd.f32 %v9058_v36, %v9057_v8  ;;  %v9171_v58 = vadd.f32 %v9170_v16, %v9169_v51  ;;  %v9060_v49 = vpop.f32.mrb[246].mxu0  ;;  %v9172_v15 = vpop.f32.mrb[246].mxu1 }
 0x69e   : > { %v9061_v41 = vpop.f32.mrb[247].mxu0  ;;  %v9173_v61 = vpop.f32.mrb[247].mxu1 }
 0x69f   : > { %v8056_v26 = vadd.f32 %v9059_v52, %v13586_v18  ;;  %v9062_v19 = vadd.f32 %v9061_v41, %v9060_v49  ;;  %v9174_v30 = vadd.f32 %v9173_v61, %v9172_v15 }
 0x6a1   : > { %v8217_v32 = vadd.f32 %v9171_v58, %v8056_v26  ;;  %v8059_v59 = vadd.f32 %v9062_v19, %v13586_v18 }
 0x6a3   : > { %8265 = vst [vmem:[%s13593_s13 + $0xd0] sm:$0xff] %v8217_v32  ;;  %v8220_v54 = vadd.f32 %v9174_v30, %v8059_v59  ;;  %v9063_v3 = vpop.f32.mrb[248].mxu0  ;;  %v9175_v13 = vpop.f32.mrb[248].mxu1 }
 0x6a4   : > { %v9064_v50 = vpop.f32.mrb[249].mxu0  ;;  %v9176_v7 = vpop.f32.mrb[249].mxu1 }
 0x6a5   : > { %8266 = vst [vmem:[%s13593_s13 + $0xd8] sm:$0xff] %v8220_v54  ;;  %v9065_v56 = vadd.f32 %v9064_v50, %v9063_v3  ;;  %v9177_v45 = vadd.f32 %v9176_v7, %v9175_v13  ;;  %v9066_v22 = vpop.f32.mrb[250].mxu0  ;;  %v9178_v12 = vpop.f32.mrb[250].mxu1 }
 0x6a6   : > { %v9067_v23 = vpop.f32.mrb[251].mxu0  ;;  %v9179_v21 = vpop.f32.mrb[251].mxu1 }
 0x6a7   : > { %v8064_v25 = vadd.f32 %v9065_v56, %v13586_v18  ;;  %v9068_v63 = vadd.f32 %v9067_v23, %v9066_v22  ;;  %v9180_v1 = vadd.f32 %v9179_v21, %v9178_v12 }
 0x6a9   : > { %v8225_v53 = vadd.f32 %v9177_v45, %v8064_v25  ;;  %v8067_v20 = vadd.f32 %v9068_v63, %v13586_v18 }
 0x6ab   : > { %8267 = vst [vmem:[%s13593_s13 + $0xe0] sm:$0xff] %v8225_v53  ;;  %v8228_v37 = vadd.f32 %v9180_v1, %v8067_v20  ;;  %v9069_v24 = vpop.f32.mrb[252].mxu0  ;;  %v9181_v48 = vpop.f32.mrb[252].mxu1 }
 0x6ac   : > { %v9070_v43 = vpop.f32.mrb[253].mxu0  ;;  %v9182_v28 = vpop.f32.mrb[253].mxu1 }
 0x6ad   : > { %8268 = vst [vmem:[%s13593_s13 + $0xe8] sm:$0xff] %v8228_v37  ;;  %v9071_v42 = vadd.f32 %v9070_v43, %v9069_v24  ;;  %v9183_v29 = vadd.f32 %v9182_v28, %v9181_v48  ;;  %v9072_v33 = vpop.f32.mrb[254].mxu0  ;;  %v9184_v34 = vpop.f32.mrb[254].mxu1 }
 0x6ae   : > { %v9073_v31 = vpop.f32.mrb[255].mxu0  ;;  %v9185_v38 = vpop.f32.mrb[255].mxu1 }
 0x6af   : > { %v8072_v10 = vadd.f32 %v9071_v42, %v13586_v18  ;;  %v9074_v46 = vadd.f32 %v9073_v31, %v9072_v33  ;;  %v9186_v39 = vadd.f32 %v9185_v38, %v9184_v34 }
 0x6b1   : > { %v8233_v4 = vadd.f32 %v9183_v29, %v8072_v10  ;;  %v8075_v6 = vadd.f32 %v9074_v46, %v13586_v18 }
 0x6b3   : > { %8269 = vst [vmem:[%s13593_s13 + $0xf0] sm:$0xff] %v8233_v4  ;;  %v8236_v57 = vadd.f32 %v9186_v39, %v8075_v6 }
 0x6b5   : > { %8270 = vst [vmem:[%s13593_s13 + $0xf8] sm:$0xff] %v8236_v57 }
 0x6b6 PF: > { %s19_s30 = sadd.s32 1, %s11139_s30  }
 0x6b7   : > { %p16_p4 = scmp.ge.s32.totalorder %s19_s30, 4  }
 0x6b9   :  { %18 = sbr.rel (!%p16_p4) target bundleno = 1 (0x1), region = 86 }

</bundles_post_ra>
